<compile_context>
chip_gen: v6e
topology: v6e:2x2x1
jax: 0.10.0
libtpu: 0.0.40
codegen_flags: <defaults>
</compile_context>

<pallas_src>
import math

import jax
import jax.numpy as jnp
from jax.experimental import pallas as pl
from jax.experimental.pallas import tpu as pltpu


def _cdiv(a, b):
    return -(-a // b)


# ------------------------------ wrapper + kernel ----------------------------- #

def lidar_encoder_forward(x, params, *, tile=None, num_splits=None):
    """x: (N, 4) float32; params: W in (in, out) layout.  Returns (emb_size,)."""
    N, C = x.shape
    assert N >= 1, "MiniPointNet max-pool needs at least one point"
    f32 = jnp.float32

    H1 = params["w1"].shape[1]            # 64
    H2 = params["w2"].shape[1]            # 128
    E = params["w3"].shape[1]             # 100 (emb_size)
    pad128 = lambda n: _cdiv(n, 128) * 128
    H1P, H2P, EP = pad128(H1), pad128(H2), pad128(E)   # 128, 128, 128

    # Big lane tiles: single grid step for N <= 2048, 2048-wide tiles above.
    if tile is None:
        tile = max(256, _cdiv(min(N, 2048), 256) * 256)
    assert tile % 128 == 0

    num_blocks = _cdiv(N, tile)
    if num_splits is None:
        num_splits = 2 if num_blocks >= 4 else 1       # v7x: 2 TCs; only if enough work
    blocks_per_split = _cdiv(num_blocks, num_splits)

    # Lane-dense, zero-padded, transposed weights (zero padding keeps math exact).
    w1t = jnp.pad(params["w1"].T.astype(f32), ((0, H1P - H1), (0, 0)))            # (H1P, C)
    b1c = jnp.pad(params["b1"].astype(f32).reshape(H1, 1), ((0, H1P - H1), (0, 0)))
    w2t = jnp.pad(params["w2"].T.astype(f32), ((0, H2P - H2), (0, H1P - H1)))     # (H2P, H1P)
    b2c = jnp.pad(params["b2"].astype(f32).reshape(H2, 1), ((0, H2P - H2), (0, 0)))
    w3t = jnp.pad(params["w3"].T.astype(f32), ((0, EP - E), (0, H2P - H2)))       # (EP, H2P)
    b3c = jnp.pad(params["b3"].astype(f32).reshape(E, 1), ((0, EP - E), (0, 0)))

    x_t = x.astype(f32).T                                                         # (C, N)

    def kernel(x_ref, w1_ref, b1_ref, w2_ref, b2_ref, w3_ref, b3_ref, out_ref):
        split = pl.program_id(0)
        step = pl.program_id(1)

        # Resident running-max block for this split: init once per split.
        @pl.when(step == 0)
        def _init():
            out_ref[...] = jnp.full(out_ref.shape, -jnp.inf, f32)

        xt = x_ref[...]                              # (C, T), lane-dense in points
        w1 = w1_ref[...]                             # (H1P, C)

        # Layer 1 (K=4): unrolled broadcast FMAs on the VPU.
        h = b1_ref[...]                              # (H1P, 1)
        for c in range(xt.shape[0]):                 # C = 4, static unroll
            h = h + w1[:, c:c + 1] * xt[c:c + 1, :]
        h1 = jnp.maximum(h, 0.0)                     # (H1P, T)

        # Layers 2/3: MXU, f32 accumulation.
        h2 = jnp.maximum(
            jnp.dot(w2_ref[...], h1, preferred_element_type=f32) + b2_ref[...], 0.0)
        y = jnp.dot(w3_ref[...], h2, preferred_element_type=f32) + b3_ref[...]   # (EP, T)

        # Mask the ragged tail (and fully out-of-range blocks) before the max.
        start = (split * blocks_per_split + step) * tile
        lane = jax.lax.broadcasted_iota(jnp.int32, (1, tile), 1)
        y = jnp.where(start + lane < N, y, -jnp.inf)

        # Per-tile max over points (lane reduce), folded into the resident block
        # (the (EP, 1) column broadcasts across the 128-lane output block).
        out_ref[...] = jnp.maximum(out_ref[...], jnp.max(y, axis=1, keepdims=True))

    def x_index_map(s, i):
        blk = s * blocks_per_split + i
        return (0, jnp.minimum(blk, num_blocks - 1))   # clamp fully-OOB blocks

    const = lambda s, i: (0, 0)

    flops = 2 * num_splits * blocks_per_split * tile * (C * H1P + H1P * H2P + H2P * EP)
    bytes_accessed = 4 * (N * C + C * H1P + H1P + H1P * H2P + H2P
                          + H2P * EP + EP + EP * 128 * num_splits)

    out = pl.pallas_call(
        kernel,
        out_shape=jax.ShapeDtypeStruct((EP, 128 * num_splits), f32),
        grid_spec=pltpu.PrefetchScalarGridSpec(
            num_scalar_prefetch=0,
            grid=(num_splits, blocks_per_split),
            in_specs=[
                pl.BlockSpec((C, tile), x_index_map),     # points (lane-dense tiles)
                pl.BlockSpec((H1P, C), const),            # W1^T (resident)
                pl.BlockSpec((H1P, 1), const),            # b1
                pl.BlockSpec((H2P, H1P), const),          # W2^T
                pl.BlockSpec((H2P, 1), const),            # b2
                pl.BlockSpec((EP, H2P), const),           # W3^T
                pl.BlockSpec((EP, 1), const),             # b3
            ],
            out_specs=pl.BlockSpec((EP, 128), lambda s, i: (0, s)),  # per-split partial max
        ),
        compiler_params=pltpu.CompilerParams(
            dimension_semantics=("parallel", "arbitrary"),
            vmem_limit_bytes=(64 * 1024 * 1024 if tile > 2048 else None)),
        cost_estimate=pl.CostEstimate(flops=flops, transcendentals=0,
                                      bytes_accessed=bytes_accessed),
    )(x_t, w1t, b1c, w2t, b2c, w3t, b3c)

    # Every lane of a split's 128-lane block holds the same partial max.
    partial = out.reshape(EP, num_splits, 128)[:, :, 0]    # (EP, num_splits)
    return jnp.max(partial, axis=1)[:E]


# --------------------------- pure-JAX reference ------------------------------- #

def lidar_encoder_reference(x, p):
    h1 = jnp.maximum(x @ p["w1"] + p["b1"], 0.0)
    h2 = jnp.maximum(h1 @ p["w2"] + p["b2"], 0.0)
    y = h2 @ p["w3"] + p["b3"]
    return jnp.max(y, axis=0)


# --------------------------------- main --------------------------------------- #

if __name__ == "__main__":
    C, H1, H2, E = 4, 64, 128, 100

    key = jax.random.PRNGKey(0)
    ks = jax.random.split(key, 5)

    def linear_params(k, fan_in, fan_out):
        s = 1.0 / math.sqrt(fan_in)
        kw, kb = jax.random.split(k)
        w = jax.random.uniform(kw, (fan_in, fan_out), jnp.float32, -s, s)
        b = jax.random.uniform(kb, (fan_out,), jnp.float32, -s, s)
        return w, b

    w1, b1 = linear_params(ks[0], C, H1)
    w2, b2 = linear_params(ks[1], H1, H2)
    w3, b3 = linear_params(ks[2], H2, E)
    params = {"w1": w1, "b1": b1, "w2": w2, "b2": b2, "w3": w3, "b3": b3}

    # Case 1: small cloud (N=1000) -> auto tile=1024, single grid step.
    x1 = jax.random.normal(ks[3], (1000, C), jnp.float32)
    out1 = jax.block_until_ready(lidar_encoder_forward(x1, params))
    ref1 = lidar_encoder_reference(x1, params)
    assert out1.shape == (E,) and out1.dtype == jnp.float32
    assert jnp.allclose(out1, ref1, atol=1e-4, rtol=1e-4), \
        f"case1 max abs err {jnp.max(jnp.abs(out1 - ref1))}"

    # Case 2: larger ragged cloud with explicit 2-way split (exercises the
    # parallel split axis, the in-kernel tail mask and the OOB block clamp).
    x2 = jax.random.normal(ks[4], (4500, C), jnp.float32)
    out2 = jax.block_until_ready(
        lidar_encoder_forward(x2, params, tile=512, num_splits=2))
    ref2 = lidar_encoder_reference(x2, params)
    assert jnp.allclose(out2, ref2, atol=1e-4, rtol=1e-4), \
        f"case2 max abs err {jnp.max(jnp.abs(out2 - ref2))}"

    print("KERNEL_OK")
</pallas_src>

<mosaic_0001>
module attributes {stable_mosaic.version = 11 : i64} {
  func.func @kernel(%arg0: i32, %arg1: i32, %arg2: memref<4x1024xf32, #tpu.memory_space<vmem>>, %arg3: memref<128x4xf32, #tpu.memory_space<vmem>>, %arg4: memref<128x1xf32, #tpu.memory_space<vmem>>, %arg5: memref<128x128xf32, #tpu.memory_space<vmem>>, %arg6: memref<128x1xf32, #tpu.memory_space<vmem>>, %arg7: memref<128x128xf32, #tpu.memory_space<vmem>>, %arg8: memref<128x1xf32, #tpu.memory_space<vmem>>, %arg9: memref<128x128xf32, #tpu.memory_space<vmem>>) attributes {dimension_semantics = [#tpu.dimension_semantics<parallel>, #tpu.dimension_semantics<arbitrary>], iteration_bounds = array<i64: 1, 1>, scalar_prefetch = 0 : i64, scratch_operands = 0 : i64, tpu.core_type = #tpu.core_type<tc>, window_params = [{transform_indices = @transform_0, window_bounds = array<i64: 4, 1024>}, {pipeline_mode = #tpu.pipeline_mode<synchronous>, transform_indices = @transform_1, window_bounds = array<i64: 128, 4>}, {pipeline_mode = #tpu.pipeline_mode<synchronous>, transform_indices = @transform_2, window_bounds = array<i64: 128, 1>}, {pipeline_mode = #tpu.pipeline_mode<synchronous>, transform_indices = @transform_3, window_bounds = array<i64: 128, 128>}, {pipeline_mode = #tpu.pipeline_mode<synchronous>, transform_indices = @transform_4, window_bounds = array<i64: 128, 1>}, {pipeline_mode = #tpu.pipeline_mode<synchronous>, transform_indices = @transform_5, window_bounds = array<i64: 128, 128>}, {pipeline_mode = #tpu.pipeline_mode<synchronous>, transform_indices = @transform_6, window_bounds = array<i64: 128, 1>}, {transform_indices = @transform_7, window_bounds = array<i64: 128, 128>}]} {
    %c0_i32 = arith.constant 0 : i32
    %0 = arith.cmpi eq, %arg1, %c0_i32 : i32
    %1 = arith.extui %0 : i1 to i32
    %c0_i32_0 = arith.constant 0 : i32
    %2 = arith.cmpi ne, %1, %c0_i32_0 : i32
    scf.if %2 {
      %cst_23 = arith.constant 0xFF800000 : f32
      %63 = vector.broadcast %cst_23 : f32 to vector<128x128xf32>
      %c0_24 = arith.constant 0 : index
      %c0_25 = arith.constant 0 : index
      %64 = vector.load %arg9[%c0_24, %c0_25] : memref<128x128xf32, #tpu.memory_space<vmem>>, vector<128x128xf32>
      tpu.vector_store %arg9[%c0_24, %c0_25], %63 {strides = array<i32>} : memref<128x128xf32, #tpu.memory_space<vmem>>, vector<128x128xf32>,
    } else {
    }
    %c0 = arith.constant 0 : index
    %c0_1 = arith.constant 0 : index
    %3 = vector.load %arg2[%c0, %c0_1] : memref<4x1024xf32, #tpu.memory_space<vmem>>, vector<4x1024xf32>
    %c0_2 = arith.constant 0 : index
    %c0_3 = arith.constant 0 : index
    %4 = vector.load %arg3[%c0_2, %c0_3] : memref<128x4xf32, #tpu.memory_space<vmem>>, vector<128x4xf32>
    %c0_4 = arith.constant 0 : index
    %c0_5 = arith.constant 0 : index
    %5 = vector.load %arg4[%c0_4, %c0_5] : memref<128x1xf32, #tpu.memory_space<vmem>>, vector<128x1xf32>
    %6 = vector.extract_strided_slice %4 {offsets = [0, 0], sizes = [128, 1], strides = [1, 1]} : vector<128x4xf32> to vector<128x1xf32>
    %7 = vector.extract_strided_slice %3 {offsets = [0, 0], sizes = [1, 1024], strides = [1, 1]} : vector<4x1024xf32> to vector<1x1024xf32>
    %8 = vector.broadcast %6 : vector<128x1xf32> to vector<128x1024xf32>
    %9 = vector.broadcast %7 : vector<1x1024xf32> to vector<128x1024xf32>
    %10 = arith.mulf %8, %9 : vector<128x1024xf32>
    %11 = vector.broadcast %5 : vector<128x1xf32> to vector<128x1024xf32>
    %12 = arith.addf %11, %10 : vector<128x1024xf32>
    %13 = vector.extract_strided_slice %4 {offsets = [0, 1], sizes = [128, 1], strides = [1, 1]} : vector<128x4xf32> to vector<128x1xf32>
    %14 = vector.extract_strided_slice %3 {offsets = [1, 0], sizes = [1, 1024], strides = [1, 1]} : vector<4x1024xf32> to vector<1x1024xf32>
    %15 = vector.broadcast %13 : vector<128x1xf32> to vector<128x1024xf32>
    %16 = vector.broadcast %14 : vector<1x1024xf32> to vector<128x1024xf32>
    %17 = arith.mulf %15, %16 : vector<128x1024xf32>
    %18 = arith.addf %12, %17 : vector<128x1024xf32>
    %19 = vector.extract_strided_slice %4 {offsets = [0, 2], sizes = [128, 1], strides = [1, 1]} : vector<128x4xf32> to vector<128x1xf32>
    %20 = vector.extract_strided_slice %3 {offsets = [2, 0], sizes = [1, 1024], strides = [1, 1]} : vector<4x1024xf32> to vector<1x1024xf32>
    %21 = vector.broadcast %19 : vector<128x1xf32> to vector<128x1024xf32>
    %22 = vector.broadcast %20 : vector<1x1024xf32> to vector<128x1024xf32>
    %23 = arith.mulf %21, %22 : vector<128x1024xf32>
    %24 = arith.addf %18, %23 : vector<128x1024xf32>
    %25 = vector.extract_strided_slice %4 {offsets = [0, 3], sizes = [128, 1], strides = [1, 1]} : vector<128x4xf32> to vector<128x1xf32>
    %26 = vector.extract_strided_slice %3 {offsets = [3, 0], sizes = [1, 1024], strides = [1, 1]} : vector<4x1024xf32> to vector<1x1024xf32>
    %27 = vector.broadcast %25 : vector<128x1xf32> to vector<128x1024xf32>
    %28 = vector.broadcast %26 : vector<1x1024xf32> to vector<128x1024xf32>
    %29 = arith.mulf %27, %28 : vector<128x1024xf32>
    %30 = arith.addf %24, %29 : vector<128x1024xf32>
    %cst = arith.constant 0.000000e+00 : f32
    %31 = vector.broadcast %cst : f32 to vector<128x1024xf32>
    %32 = arith.maximumf %30, %31 : vector<128x1024xf32>
    %c0_6 = arith.constant 0 : index
    %c0_7 = arith.constant 0 : index
    %33 = vector.load %arg5[%c0_6, %c0_7] : memref<128x128xf32, #tpu.memory_space<vmem>>, vector<128x128xf32>
    %cst_8 = arith.constant dense<0.000000e+00> : vector<128x1024xf32>
    %34 = tpu.matmul %33, %32, %cst_8 {dimension_numbers = #tpu.dot_dimension_numbers<[1], [0], [0], [1], [0, 0, 1, 1], [], []>} : vector<128x128xf32>, vector<128x1024xf32>, vector<128x1024xf32> -> vector<128x1024xf32>
    %c0_9 = arith.constant 0 : index
    %c0_10 = arith.constant 0 : index
    %35 = vector.load %arg6[%c0_9, %c0_10] : memref<128x1xf32, #tpu.memory_space<vmem>>, vector<128x1xf32>
    %36 = vector.broadcast %35 : vector<128x1xf32> to vector<128x1024xf32>
    %37 = arith.addf %34, %36 : vector<128x1024xf32>
    %cst_11 = arith.constant 0.000000e+00 : f32
    %38 = vector.broadcast %cst_11 : f32 to vector<128x1024xf32>
    %39 = arith.maximumf %37, %38 : vector<128x1024xf32>
    %c0_12 = arith.constant 0 : index
    %c0_13 = arith.constant 0 : index
    %40 = vector.load %arg7[%c0_12, %c0_13] : memref<128x128xf32, #tpu.memory_space<vmem>>, vector<128x128xf32>
    %cst_14 = arith.constant dense<0.000000e+00> : vector<128x1024xf32>
    %41 = tpu.matmul %40, %39, %cst_14 {dimension_numbers = #tpu.dot_dimension_numbers<[1], [0], [0], [1], [0, 0, 1, 1], [], []>} : vector<128x128xf32>, vector<128x1024xf32>, vector<128x1024xf32> -> vector<128x1024xf32>
    %c0_15 = arith.constant 0 : index
    %c0_16 = arith.constant 0 : index
    %42 = vector.load %arg8[%c0_15, %c0_16] : memref<128x1xf32, #tpu.memory_space<vmem>>, vector<128x1xf32>
    %43 = vector.broadcast %42 : vector<128x1xf32> to vector<128x1024xf32>
    %44 = arith.addf %41, %43 : vector<128x1024xf32>
    %c1_i32 = arith.constant 1 : i32
    %45 = arith.muli %arg0, %c1_i32 : i32
    %46 = arith.addi %45, %arg1 : i32
    %c1024_i32 = arith.constant 1024 : i32
    %47 = arith.muli %46, %c1024_i32 : i32
    %48 = tpu.iota {dimensions = array<i32: 1>} : vector<1x1024xi32>
    %49 = vector.broadcast %47 : i32 to vector<1x1024xi32>
    %50 = arith.addi %49, %48 : vector<1x1024xi32>
    %c1000_i32 = arith.constant 1000 : i32
    %51 = vector.broadcast %c1000_i32 : i32 to vector<1x1024xi32>
    %52 = arith.cmpi slt, %50, %51 : vector<1x1024xi32>
    %cst_17 = arith.constant 0xFF800000 : f32
    %53 = vector.shape_cast %52 : vector<1x1024xi1> to vector<1x1024xi1>
    %54 = vector.broadcast %53 : vector<1x1024xi1> to vector<128x1024xi1>
    %55 = vector.broadcast %cst_17 : f32 to vector<128x1024xf32>
    %56 = arith.select %54, %44, %55 : vector<128x1024xi1>, vector<128x1024xf32>
    %c0_18 = arith.constant 0 : index
    %c0_19 = arith.constant 0 : index
    %57 = vector.load %arg9[%c0_18, %c0_19] : memref<128x128xf32, #tpu.memory_space<vmem>>, vector<128x128xf32>
    %cst_20 = arith.constant dense<0xFF800000> : vector<128xf32>
    %58 = vector.multi_reduction <maximumf>, %56, %cst_20 [1] : vector<128x1024xf32> to vector<128xf32>
    %59 = vector.shape_cast %58 : vector<128xf32> to vector<128x1xf32>
    %60 = vector.broadcast %59 : vector<128x1xf32> to vector<128x128xf32>
    %61 = arith.maximumf %57, %60 : vector<128x128xf32>
    %c0_21 = arith.constant 0 : index
    %c0_22 = arith.constant 0 : index
    %62 = vector.load %arg9[%c0_21, %c0_22] : memref<128x128xf32, #tpu.memory_space<vmem>>, vector<128x128xf32>
    tpu.vector_store %arg9[%c0_21, %c0_22], %61 {strides = array<i32>} : memref<128x128xf32, #tpu.memory_space<vmem>>, vector<128x128xf32>,
    return
  }
  func.func @transform_0(%arg0: i32, %arg1: i32) -> (i32, i32) {
    %c1_i32 = arith.constant 1 : i32
    %0 = arith.muli %arg0, %c1_i32 : i32
    %1 = arith.addi %0, %arg1 : i32
    %c0_i32 = arith.constant 0 : i32
    %2 = arith.minsi %1, %c0_i32 : i32
    %c0_i32_0 = arith.constant 0 : i32
    %c0_i32_1 = arith.constant 0 : i32
    return %c0_i32_0, %2 : i32, i32
  }
  func.func @transform_1(%arg0: i32, %arg1: i32) -> (i32, i32) {
    %c0_i32 = arith.constant 0 : i32
    %c0_i32_0 = arith.constant 0 : i32
    %c0_i32_1 = arith.constant 0 : i32
    return %c0_i32, %c0_i32_0 : i32, i32
  }
  func.func @transform_2(%arg0: i32, %arg1: i32) -> (i32, i32) {
    %c0_i32 = arith.constant 0 : i32
    %c0_i32_0 = arith.constant 0 : i32
    %c0_i32_1 = arith.constant 0 : i32
    return %c0_i32, %c0_i32_0 : i32, i32
  }
  func.func @transform_3(%arg0: i32, %arg1: i32) -> (i32, i32) {
    %c0_i32 = arith.constant 0 : i32
    %c0_i32_0 = arith.constant 0 : i32
    %c0_i32_1 = arith.constant 0 : i32
    return %c0_i32, %c0_i32_0 : i32, i32
  }
  func.func @transform_4(%arg0: i32, %arg1: i32) -> (i32, i32) {
    %c0_i32 = arith.constant 0 : i32
    %c0_i32_0 = arith.constant 0 : i32
    %c0_i32_1 = arith.constant 0 : i32
    return %c0_i32, %c0_i32_0 : i32, i32
  }
  func.func @transform_5(%arg0: i32, %arg1: i32) -> (i32, i32) {
    %c0_i32 = arith.constant 0 : i32
    %c0_i32_0 = arith.constant 0 : i32
    %c0_i32_1 = arith.constant 0 : i32
    return %c0_i32, %c0_i32_0 : i32, i32
  }
  func.func @transform_6(%arg0: i32, %arg1: i32) -> (i32, i32) {
    %c0_i32 = arith.constant 0 : i32
    %c0_i32_0 = arith.constant 0 : i32
    %c0_i32_1 = arith.constant 0 : i32
    return %c0_i32, %c0_i32_0 : i32, i32
  }
  func.func @transform_7(%arg0: i32, %arg1: i32) -> (i32, i32) {
    %c0_i32 = arith.constant 0 : i32
    %c0_i32_0 = arith.constant 0 : i32
    return %c0_i32, %arg0 : i32, i32
  }
}

</mosaic_0001>

<bundles_post_ra>
// kernel: tpu_custom_call.1
= control target key start
LH: loop header
LB: loop body
LE: loop exit
PB: predicated region body
PF: predicated region fallthrough
CT: control target
= control target key end

     0   :  { %v7858_v2 = vmov 3   ;;  %v7860_v3 = vmov 0   ;;  %v7856_v5 = vmov 1   ;;  %s7845_s0 = inlined_call_operand.vmem [shape: f32[4,1000], index: 0, kind: input, shape index: {}]   ;;  %s7846_s1 = inlined_call_operand.vmem [shape: f32[128,4], index: 1, kind: input, shape index: {}]   ;;  %s7847_s2 = inlined_call_operand.vmem [shape: f32[128,1], index: 2, kind: input, shape index: {}]   ;;  %s7848_s3 = inlined_call_operand.vmem [shape: f32[128,128], index: 3, kind: input, shape index: {}]   ;;  %s7849_s4 = inlined_call_operand.vmem [shape: f32[128,1], index: 4, kind: input, shape index: {}]   ;;  %s7850_s5 = inlined_call_operand.vmem [shape: f32[128,128], index: 5, kind: input, shape index: {}]   ;;  %s7851_s6 = inlined_call_operand.vmem [shape: f32[128,1], index: 6, kind: input, shape index: {}]   ;;  %s7852_s7 = inlined_call_operand.hbm [shape: f32[128,128], index: 7, kind: output, shape index: {}]  }
   0x1   :  { %v114_v0 = vld [vmem:[%s7847_s2 + $0x78] sm:$0xff]  ;;  %3953 = vset.pattern.permute.xlu0 %v7858_v2  ;;  %3946 = vset.pattern.permute.xlu1 %v7860_v3  ;;  %v4082_v4 = vld [vmem:[%s7846_s1 + $0x60] sm:$0xff]  ;;  %v4089_v6 = vld [vmem:[%s7846_s1 + $0x48] sm:$0xff] }
   0x2   :  { %v98_v1 = vld [vmem:[%s7846_s1 + $0x78] sm:$0xff]  ;;  %476 = vperm.xlu1 %3946, %v114_v0   ;;  %v113_v7 = vld [vmem:[%s7847_s2 + $0x70] sm:$0xff] }
   0x3   :  { %1452 = vperm.xlu0 %3953, %v98_v1  }
   0x6   :  { %3947 = vset.pattern.permute.xlu1 %v7856_v5 }
   0x7   :  { %1440 = vperm.xlu0 %3953, %v4082_v4   ;;  %668 = vperm.xlu1 %3947, %v98_v1  }
   0x8   :  { %12 = vsyncpa [#allocation3], 0  ;;  %v4099_v8 = vld [vmem:[%s7846_s1 + $0x30] sm:$0xff]  ;;  %v7853_v9 = vlaneseq  ;;  %v7854_v10 = vmov 2   ;;  %v96_v14 = vld [vmem:[%s7846_s1 + $0x68] sm:$0xff] }
   0x9   :  { %v97_v11 = vld [vmem:[%s7846_s1 + $0x70] sm:$0xff]  ;;  %v4147_v22 = vld [vmem:[%s7846_s1 + $0x18] sm:$0xff]  ;;  %v111_v29 = vld [vmem:[%s7847_s2 + $0x60] sm:$0xff] }
   0xa   :  { %v4108_v12 = vshrl.u32 %v7853_v9, 7  ;;  %v4122_v15 = vld [vmem:[%s7845_s0 + $0x10] sm:$0xff]  ;;  %v4155_v24 = vld [vmem:[%s7845_s0 + $0x18] sm:$0xff]  ;;  %v112_v35 = vld [vmem:[%s7847_s2 + $0x68] sm:$0xff] }
   0xb   :  { %1428 = vperm.xlu0 %3953, %v4089_v6   ;;  %3948 = vset.pattern.permute.xlu1 %v7860_v3  ;;  %v4160_v25 = vld [vmem:[%s7846_s1 + $0x58] sm:$0xff]  ;;  %v93_v39 = vld [vmem:[%s7846_s1 + $0x50] sm:$0xff]  ;;  %v4228_v44 = vld [vmem:[%s7846_s1 + $0x20] sm:$0xff] }
   0xc   :  { %471 = vperm.xlu1 %3948, %v113_v7   ;;  %v4112_v13 = vsub.s32 4, %v4108_v12  ;;  %v4125_v16 = vsub.s32 0, %v4108_v12  ;;  %v4131_v18 = vsub.s32 5, %v4108_v12  ;;  %v4138_v20 = vsub.s32 1, %v4108_v12  ;;  %v110_v38 = vld [vmem:[%s7847_s2 + $0x58] sm:$0xff]  ;;  %v109_v40 = vld [vmem:[%s7847_s2 + $0x50] sm:$0xff] }
   0xd   :  { %v4171_v28 = vsub.s32 6, %v4108_v12  ;;  %v4178_v30 = vsub.s32 2, %v4108_v12  ;;  %v4215_v41 = vld [vmem:[%s7846_s1 + $0x38] sm:$0xff]  ;;  %v4223_v43 = vsub.s32 7, %v4108_v12  ;;  %v4233_v45 = vsub.s32 3, %v4108_v12  ;;  %v103_v47 = vld [vmem:[%s7847_s2 + $0x20] sm:$0xff] }
   0xe   :  { %v222_v17 = vrot.slane %v4122_v15, %v4112_v13  ;;  %v694_v21 = vrot.slane %v4122_v15, %v4131_v18  ;;  %v702_v26 = vrot.slane %v4155_v24, %v4131_v18  ;;  %v230_v36 = vrot.slane %v4155_v24, %v4112_v13  ;;  %v106_v42 = vld [vmem:[%s7847_s2 + $0x38] sm:$0xff]  ;;  %v4253_v51 = vld [vmem:[%s7846_s1 + $0x8] sm:$0xff]  ;;  %v4264_v53 = vld [vmem:[%s7846_s1 + $0x40] sm:$0xff] }
   0xf   :  { %1416 = vperm.xlu0 %3953, %v4099_v8   ;;  %v1086_v31 = vrot.slane %v4122_v15, %v4171_v28  ;;  %v1094_v33 = vrot.slane %v4155_v24, %v4171_v28  ;;  %v1478_v46 = vrot.slane %v4122_v15, %v4223_v43  ;;  %v1486_v49 = vrot.slane %v4155_v24, %v4223_v43  ;;  %v100_v52 = vld [vmem:[%s7847_s2 + $0x8] sm:$0xff]  ;;  %v107_v55 = vld [vmem:[%s7847_s2 + $0x40] sm:$0xff] }
  0x10   :  { %3949 = vset.pattern.permute.xlu1 %v7854_v10  ;;  %v4135_v19 = vrot.slane %v222_v17, %v4125_v16  ;;  %v4150_v23 = vrot.slane %v694_v21, %v4138_v20  ;;  %v4167_v27 = vrot.slane %v702_v26, %v4138_v20  ;;  %v4198_v37 = vrot.slane %v230_v36, %v4125_v16  ;;  %v108_v54 = vld [vmem:[%s7847_s2 + $0x48] sm:$0xff]  ;;  %v79_v61 = vld [vmem:[%s7845_s0] sm:$0xff] }
  0x11   :  { %1060 = vperm.xlu1 %3949, %v98_v1   ;;  %v4183_v32 = vrot.slane %v1086_v31, %v4178_v30  ;;  %v4189_v34 = vrot.slane %v1094_v33, %v4178_v30  ;;  %v4242_v48 = vrot.slane %v1478_v46, %v4233_v45  ;;  %v4248_v50 = vrot.slane %v1486_v49, %v4233_v45  ;;  %v4308_v60 = vld [vmem:[%s7846_s1 + $0x28] sm:$0xff] }
  0x12   :  { %8155 = vst [vmem:[#allocation5_spill] sm:$0xff] %v4135_v19  ;;  %8156 = vst [vmem:[#allocation6_spill] sm:$0xff] %v4150_v23  ;;  %v80_v63 = vld [vmem:[%s7845_s0 + $0x8] sm:$0xff]  ;;  %v690_v17 = vrot.slane %v4122_v15, %v4138_v20  ;;  %v698_v21 = vrot.slane %v4155_v24, %v4138_v20  ;;  %v206_v36 = vrot.slane %v79_v61, %v4112_v13 }
  0x13   :  { %3981 = vset.pattern.permute.xlu0 %v7856_v5  ;;  %8157 = vst [vmem:[#allocation7_spill] sm:$0xff] %v4167_v27  ;;  %8158 = vst [vmem:[#allocation8_spill] sm:$0xff] %v4183_v32  ;;  %v686_v7 = vrot.slane %v80_v63, %v4131_v18  ;;  %v1074_v26 = vrot.slane %v80_v63, %v4178_v30  ;;  %v1462_v46 = vrot.slane %v79_v61, %v4223_v43 }
  0x14   :  { %664 = vperm.xlu0 %3981, %v97_v11   ;;  %8159 = vst [vmem:[#allocation9_spill] sm:$0xff] %v4189_v34  ;;  %8160 = vst [vmem:[#allocation10_spill] sm:$0xff] %v4198_v37  ;;  %v4367_v49 = vrot.slane %v690_v17, %v4138_v20 }
  0x15   :  { %3950 = vset.pattern.permute.xlu1 %v7860_v3  ;;  %8161 = vst [vmem:[#allocation11_spill] sm:$0xff] %v4242_v48  ;;  %8162 = vst [vmem:[#allocation12_spill] sm:$0xff] %v4248_v50  ;;  %v4348_v31 = vrot.slane %v686_v7, %v4138_v20 }
  0x16   :  { %177 = vperm.xlu1 %3950, %v4082_v4   ;;  %8163 = vst [vmem:[#allocation13_spill] sm:$0xff] %v4253_v51  ;;  %8175 = vst [vmem:[#allocation25_spill] sm:$0xff] %v4367_v49 }
  0x17   :  { %8171 = vst [vmem:[#allocation21_spill] sm:$0xff] %v4348_v31 }
  0x18   :  { %656 = vperm.xlu0 %3981, %v4082_v4  }
  0x1a   :  { %3951 = vset.pattern.permute.xlu1 %v7856_v5 }
  0x1b   :  { %660 = vperm.xlu1 %3951, %v96_v14  }
  0x1c   :  { %644 = vperm.xlu0 %3981, %v4089_v6  }
  0x1f   :  { %3952 = vset.pattern.permute.xlu1 %v7854_v10 }
  0x20   :  { %632 = vperm.xlu0 %3981, %v4099_v8   ;;  %1056 = vperm.xlu1 %3952, %v97_v11  }
  0x24   :  { %620 = vperm.xlu0 %3981, %v4147_v22   ;;  %3954 = vset.pattern.permute.xlu1 %v7860_v3 }
  0x25   :  { %172 = vperm.xlu1 %3954, %v4160_v25  }
  0x28   :  { %3983 = vset.pattern.permute.xlu0 %v7860_v3 }
  0x29   :  { %192 = vperm.xlu0 %3983, %v98_v1   ;;  %461 = vperm.xlu1 %3954, %v111_v29   ;;  %v678_v1 = vrot.slane %v79_v61, %v4131_v18  ;;  %v682_v18 = vrot.slane %v80_v63, %v4138_v20 }
  0x2b   :  { %v4398_v7 = vrot.slane %v682_v18, %v4138_v20  ;;  %v1090_v18 = vrot.slane %v4155_v24, %v4178_v30 }
  0x2d   :  { %187 = vperm.xlu0 %3983, %v97_v11   ;;  %3955 = vset.pattern.permute.xlu1 %v7854_v10  ;;  %8181 = vst [vmem:[#allocation31_spill] sm:$0xff] %v4398_v7 }
  0x2e   :  { %1052 = vperm.xlu1 %3955, %v96_v14  }
  0x31   :  { %182 = vperm.xlu0 %3983, %v96_v14  }
  0x32   :  { %3956 = vset.pattern.permute.xlu1 %v7858_v2 }
  0x33   :  { %1448 = vperm.xlu1 %3956, %v97_v11   ;;  %v674_v11 = vrot.slane %v79_v61, %v4138_v20 }
  0x35   :  { %466 = vperm.xlu0 %3983, %v112_v35   ;;  %v4354_v35 = vrot.slane %v674_v11, %v4138_v20  ;;  %v1082_v11 = vrot.slane %v4122_v15, %v4178_v30 }
  0x37   :  { %3957 = vset.pattern.permute.xlu1 %v7860_v3  ;;  %8173 = vst [vmem:[#allocation23_spill] sm:$0xff] %v4354_v35 }
  0x38   :  { %456 = vperm.xlu1 %3957, %v110_v38   ;;  %v214_v38 = vrot.slane %v80_v63, %v4112_v13  ;;  %v1470_v13 = vrot.slane %v80_v63, %v4223_v43 }
  0x39   :  { %167 = vperm.xlu0 %3983, %v93_v39  }
  0x3a   :  { %v4413_v9 = vrot.slane %v214_v38, %v4125_v16 }
  0x3c   :  { %3958 = vset.pattern.permute.xlu1 %v7856_v5  ;;  %8184 = vst [vmem:[#allocation34_spill] sm:$0xff] %v4413_v9 }
  0x3d   :  { %451 = vperm.xlu0 %3983, %v109_v40   ;;  %652 = vperm.xlu1 %3958, %v4160_v25  }
  0x41   :  { %152 = vperm.xlu0 %3983, %v4215_v41   ;;  %3959 = vset.pattern.permute.xlu1 %v7858_v2 }
  0x42   :  { %1444 = vperm.xlu1 %3959, %v96_v14   ;;  %v1066_v14 = vrot.slane %v79_v61, %v4178_v30 }
  0x44   :  { %v4360_v40 = vrot.slane %v1066_v14, %v4178_v30  ;;  %v1482_v14 = vrot.slane %v4155_v24, %v4233_v45 }
  0x45   :  { %436 = vperm.xlu0 %3983, %v106_v42  }
  0x46   :  { %3960 = vset.pattern.permute.xlu1 %v7860_v3  ;;  %8174 = vst [vmem:[#allocation24_spill] sm:$0xff] %v4360_v40 }
  0x47   :  { %162 = vperm.xlu1 %3960, %v4089_v6  }
  0x49   :  { %137 = vperm.xlu0 %3983, %v4228_v44  }
  0x4b   :  { %3961 = vset.pattern.permute.xlu1 %v7856_v5 }
  0x4c   :  { %648 = vperm.xlu1 %3961, %v93_v39  }
  0x4d   :  { %421 = vperm.xlu0 %3983, %v103_v47   ;;  %v210_v47 = vrot.slane %v80_v63, %v4125_v16 }
  0x50   :  { %3962 = vset.pattern.permute.xlu1 %v7854_v10 }
  0x51   :  { %122 = vperm.xlu0 %3983, %v4253_v51   ;;  %1044 = vperm.xlu1 %3962, %v4160_v25  }
  0x55   :  { %406 = vperm.xlu0 %3983, %v100_v52   ;;  %3963 = vset.pattern.permute.xlu1 %v7860_v3  ;;  %v4370_v52 = vrot.slane %v698_v21, %v4138_v20  ;;  %v4410_v21 = vrot.slane %v206_v36, %v4125_v16  ;;  %v226_v36 = vrot.slane %v4155_v24, %v4125_v16 }
  0x56   :  { %157 = vperm.xlu1 %3963, %v4264_v53   ;;  %v4448_v24 = vrot.slane %v1482_v14, %v4233_v45 }
  0x57   :  { %8176 = vst [vmem:[#allocation26_spill] sm:$0xff] %v4370_v52  ;;  %8183 = vst [vmem:[#allocation33_spill] sm:$0xff] %v4410_v21 }
  0x58   :  { %8193 = vst [vmem:[#allocation43_spill] sm:$0xff] %v4448_v24 }
  0x59   :  { %3990 = vset.pattern.permute.xlu0 %v7854_v10 }
  0x5a   :  { %1048 = vperm.xlu0 %3990, %v4082_v4   ;;  %446 = vperm.xlu1 %3963, %v108_v54   ;;  %v105_v4 = vld [vmem:[%s7847_s2 + $0x30] sm:$0xff]  ;;  %v1458_v54 = vrot.slane %v79_v61, %v4233_v45 }
  0x5e   :  { %1036 = vperm.xlu0 %3990, %v4089_v6   ;;  %3964 = vset.pattern.permute.xlu1 %v7854_v10  ;;  %v1070_v6 = vrot.slane %v79_v61, %v4171_v28 }
  0x5f   :  { %1040 = vperm.xlu1 %3964, %v93_v39  }
  0x60   :  { %v4345_v29 = vrot.slane %v1070_v6, %v4178_v30 }
  0x62   :  { %1024 = vperm.xlu0 %3990, %v4099_v8   ;;  %8170 = vst [vmem:[#allocation20_spill] sm:$0xff] %v4345_v29 }
  0x63   :  { %3965 = vset.pattern.permute.xlu1 %v7858_v2 }
  0x64   :  { %1436 = vperm.xlu1 %3965, %v4160_v25   ;;  %v4338_v25 = vrot.slane %v678_v1, %v4138_v20  ;;  %v1474_v1 = vrot.slane %v4122_v15, %v4233_v45  ;;  %v218_v20 = vrot.slane %v4122_v15, %v4125_v16  ;;  %v4435_v15 = vrot.slane %v210_v47, %v4125_v16 }
  0x66   :  { %1012 = vperm.xlu0 %3990, %v4147_v22   ;;  %8169 = vst [vmem:[#allocation19_spill] sm:$0xff] %v4338_v25  ;;  %8189 = vst [vmem:[#allocation39_spill] sm:$0xff] %v4435_v15 }
  0x68   :  { %3966 = vset.pattern.permute.xlu1 %v7860_v3 }
  0x69   :  { %441 = vperm.xlu1 %3966, %v107_v55   ;;  %v1466_v55 = vrot.slane %v80_v63, %v4233_v45 }
  0x6a   :  { %1004 = vperm.xlu0 %3990, %v4253_v51  }
  0x6d   :  { %3967 = vset.pattern.permute.xlu1 %v7856_v5 }
  0x6e   :  { %3995 = vset.pattern.permute.xlu0 %v7858_v2  ;;  %640 = vperm.xlu1 %3967, %v4264_v53  }
  0x6f   :  { %1404 = vperm.xlu0 %3995, %v4147_v22  }
  0x72   :  { %3968 = vset.pattern.permute.xlu1 %v7858_v2 }
  0x73   :  { %1396 = vperm.xlu0 %3995, %v4253_v51   ;;  %1432 = vperm.xlu1 %3968, %v93_v39   ;;  %v202_v39 = vrot.slane %v79_v61, %v4125_v16 }
  0x75   :  { %v4432_v38 = vrot.slane %v202_v39, %v4125_v16 }
  0x77   :  { %4000 = vset.pattern.permute.xlu0 %v7860_v3  ;;  %3969 = vset.pattern.permute.xlu1 %v7860_v3  ;;  %8188 = vst [vmem:[#allocation38_spill] sm:$0xff] %v4432_v38 }
  0x78   :  { %147 = vperm.xlu1 %3969, %v4099_v8   ;;  %v1078_v8 = vrot.slane %v80_v63, %v4171_v28 }
  0x7a   :  { %v4351_v33 = vrot.slane %v1078_v8, %v4178_v30  ;;  %v4401_v8 = vrot.slane %v1074_v26, %v4178_v30  ;;  %v4420_v26 = vrot.slane %v1462_v46, %v4233_v45  ;;  %v4438_v46 = vrot.slane %v1466_v55, %v4233_v45 }
  0x7c   :  { %3970 = vset.pattern.permute.xlu1 %v7856_v5  ;;  %8172 = vst [vmem:[#allocation22_spill] sm:$0xff] %v4351_v33  ;;  %8182 = vst [vmem:[#allocation32_spill] sm:$0xff] %v4401_v8  ;;  %v4426_v5 = vrot.slane %v1458_v54, %v4233_v45  ;;  %v4445_v54 = vrot.slane %v1082_v11, %v4178_v30  ;;  %v4466_v11 = vrot.slane %v1090_v18, %v4178_v30 }
  0x7d   :  { %v4294_v56 = vpop.permute.xlu1 %476  ;;  %636 = vperm.xlu1 %3970, %v4215_v41   ;;  %8185 = vst [vmem:[#allocation35_spill] sm:$0xff] %v4420_v26  ;;  %8190 = vst [vmem:[#allocation40_spill] sm:$0xff] %v4438_v46  ;;  %v4492_v18 = vrot.slane %v226_v36, %v4125_v16 }
  0x7e   :  { %8164 = vst [vmem:[#allocation14_spill] sm:$0xff] %v4294_v56  ;;  %v4297_v57 = vpop.permute.xlu0 %1452  ;;  %8187 = vst [vmem:[#allocation37_spill] sm:$0xff] %v4426_v5 }
  0x7f   :  { %8192 = vst [vmem:[#allocation42_spill] sm:$0xff] %v4445_v54  ;;  %8198 = vst [vmem:[#allocation48_spill] sm:$0xff] %v4466_v11 }
  0x80   :  { %8201 = vst [vmem:[#allocation51_spill] sm:$0xff] %v4492_v18 }
  0x81   :  { %3971 = vset.pattern.permute.xlu1 %v7854_v10 }
  0x82   :  { %v4300_v58 = vpop.permute.xlu0 %1440  ;;  %v4302_v59 = vpop.permute.xlu1 %668  ;;  %1032 = vperm.xlu1 %3971, %v4264_v53  }
  0x83   :  { %8165 = vst [vmem:[#allocation15_spill] sm:$0xff] %v4300_v58  ;;  %v4539_v51 = vmul.f32 %v4354_v35, %v4302_v59 }
  0x86   :  { %v4313_v62 = vpop.permute.xlu0 %1428  ;;  %3972 = vset.pattern.permute.xlu1 %v7860_v3  ;;  %v4481_v3 = vmul.f32 %v4420_v26, %v4297_v57 }
  0x87   :  { %8166 = vst [vmem:[#allocation16_spill] sm:$0xff] %v4313_v62  ;;  %v4319_v0 = vpop.permute.xlu1 %471  ;;  %142 = vperm.xlu1 %3972, %v4308_v60  }
  0x88   :  { %8167 = vst [vmem:[#allocation17_spill] sm:$0xff] %v4319_v0 }
  0x8a   :  { %v4330_v12 = vpop.permute.xlu0 %1416 }
  0x8b   :  { %8168 = vst [vmem:[#allocation18_spill] sm:$0xff] %v4330_v12  ;;  %431 = vperm.xlu1 %3972, %v105_v4  }
  0x8c   :  { %v4342_v28 = vpop.permute.xlu1 %1060 }
  0x8f   :  { %v4362_v42 = vpop.permute.xlu0 %664  ;;  %3973 = vset.pattern.permute.xlu1 %v7854_v10  ;;  %v4423_v10 = vrot.slane %v1470_v13, %v4233_v45  ;;  %v4441_v13 = vrot.slane %v1474_v1, %v4233_v45 }
  0x90   :  { %1028 = vperm.xlu1 %3973, %v4215_v41   ;;  %v4381_v4 = vmul.f32 %v4150_v23, %v4362_v42  ;;  %v4385_v6 = vmul.f32 %v4167_v27, %v4362_v42  ;;  %v4389_v43 = vmul.f32 %v4367_v49, %v4362_v42  ;;  %v4393_v61 = vmul.f32 %v4370_v52, %v4362_v42 }
  0x91   :  { %v4395_v63 = vpop.permute.xlu1 %177  ;;  %8186 = vst [vmem:[#allocation36_spill] sm:$0xff] %v4423_v10  ;;  %8191 = vst [vmem:[#allocation41_spill] sm:$0xff] %v4441_v13  ;;  %v4485_v30 = vmul.f32 %v4423_v10, %v4297_v57  ;;  %v4517_v36 = vmul.f32 %v4423_v10, %v4300_v58 }
  0x92   :  { %8177 = vst [vmem:[#allocation27_spill] sm:$0xff] %v4381_v4  ;;  %8178 = vst [vmem:[#allocation28_spill] sm:$0xff] %v4385_v6  ;;  %v4531_v6 = vmul.f32 %v4338_v25, %v4302_v59  ;;  %v4535_v4 = vmul.f32 %v4348_v31, %v4302_v59 }
  0x93   :  { %8179 = vst [vmem:[#allocation29_spill] sm:$0xff] %v4389_v43  ;;  %8180 = vst [vmem:[#allocation30_spill] sm:$0xff] %v4393_v61  ;;  %v4407_v17 = vpop.permute.xlu0 %656  ;;  %v8205_v61 = vmov 0   ;;  %v4521_v43 = vmul.f32 %v4426_v5, %v4300_v58 }
  0x94   :  { %3974 = vset.pattern.permute.xlu1 %v7858_v2  ;;  %v4452_v39 = vmul.f32 %v4150_v23, %v4407_v17  ;;  %v4456_v47 = vmul.f32 %v4167_v27, %v4407_v17  ;;  %v4470_v45 = vmul.f32 %v4367_v49, %v4407_v17  ;;  %v4474_v14 = vmul.f32 %v4370_v52, %v4407_v17  ;;  %v104_v2 = vld [vmem:[%s7847_s2 + $0x28] sm:$0xff] }
  0x95   :  { %1424 = vperm.xlu1 %3974, %v4264_v53   ;;  %v4463_v53 = vrot.slane %v218_v20, %v4125_v16  ;;  %v4489_v20 = vmul.f32 %v4426_v5, %v4297_v57  ;;  %v4513_v16 = vmul.f32 %v4420_v26, %v4300_v58  ;;  %8207 = vst [vmem:[#allocation56_spill] sm:$0xff] %v4517_v36  ;;  %8208 = vst [vmem:[#allocation57_spill] sm:$0xff] %v4521_v43 }
  0x96   :  { %8194 = vst [vmem:[#allocation44_spill] sm:$0xff] %v4452_v39  ;;  %8195 = vst [vmem:[#allocation45_spill] sm:$0xff] %v4456_v47  ;;  %v4458_v55 = vpop.permute.xlu1 %660  ;;  %v4504_v47 = vmul.f32 %v4248_v50, %v4297_v57  ;;  %v4508_v39 = vmul.f32 %v4441_v13, %v4297_v57  ;;  %v4525_v50 = vmul.f32 %v4448_v24, %v4297_v57 }
  0x97   :  { %v4460_v1 = vpop.permute.xlu0 %644  ;;  %8197 = vst [vmem:[#allocation47_spill] sm:$0xff] %v4463_v53  ;;  %8199 = vst [vmem:[#allocation49_spill] sm:$0xff] %v4470_v45  ;;  %v4500_v45 = vmul.f32 %v4242_v48, %v4297_v57  ;;  %v4543_v43 = vmul.f32 %v4438_v46, %v4300_v58  ;;  %v4553_v24 = vmul.f32 %v4150_v23, %v4302_v59 }
  0x98   :  { %8196 = vst [vmem:[#allocation46_spill] sm:$0xff] %v4460_v1  ;;  %8200 = vst [vmem:[#allocation50_spill] sm:$0xff] %v4474_v14  ;;  %v4496_v14 = vmul.f32 %v4438_v46, %v4297_v57  ;;  %v4557_v36 = vmul.f32 %v4167_v27, %v4302_v59  ;;  %v4565_v58 = vmul.f32 %v4420_v26, %v4313_v62 }
  0x99   :  { %8202 = vst [vmem:[#allocation52_spill] sm:$0xff] %v4500_v45  ;;  %8203 = vst [vmem:[#allocation53_spill] sm:$0xff] %v4504_v47  ;;  %3975 = vset.pattern.permute.xlu1 %v8205_v61  ;;  %v4573_v48 = vmul.f32 %v4426_v5, %v4313_v62  ;;  %v4585_v47 = vmul.f32 %v4351_v33, %v4342_v28  ;;  %v4606_v45 = vmul.f32 %v4189_v34, %v4342_v28 }
  0x9a   :  { %8204 = vst [vmem:[#allocation54_spill] sm:$0xff] %v4508_v39  ;;  %8206 = vst [vmem:[#allocation55_spill] sm:$0xff] %v4513_v16  ;;  %426 = vperm.xlu1 %3975, %v104_v2   ;;  %v4549_v2 = vmul.f32 %v4398_v7, %v4302_v59  ;;  %v4561_v16 = vmul.f32 %v4367_v49, %v4302_v59  ;;  %v4581_v39 = vmul.f32 %v4345_v29, %v4342_v28 }
  0x9b   :  { %8209 = vst [vmem:[#allocation58_spill] sm:$0xff] %v4525_v50  ;;  %v4527_v13 = vpop.permute.xlu0 %632  ;;  %8211 = vst [vmem:[#allocation60_spill] sm:$0xff] %v4543_v43  ;;  %v4545_v57 = vpop.permute.xlu1 %1056  ;;  %v4569_v43 = vmul.f32 %v4423_v10, %v4313_v62  ;;  %v4577_v50 = vmul.f32 %v4370_v52, %v4302_v59  ;;  %v4645_v34 = vmul.f32 %v4432_v38, %v4395_v63 }
  0x9c   :  { %8210 = vst [vmem:[#allocation59_spill] sm:$0xff] %v4527_v13  ;;  %8212 = vst [vmem:[#allocation61_spill] sm:$0xff] %v4553_v24 }
  0x9d   :  { %8213 = vst [vmem:[#allocation62_spill] sm:$0xff] %v4557_v36  ;;  %8214 = vst [vmem:[#allocation63_spill] sm:$0xff] %v4561_v16  ;;  %v4602_v16 = vmul.f32 %v4183_v32, %v4342_v28  ;;  %v4610_v36 = vmul.f32 %v4445_v54, %v4342_v28  ;;  %v4641_v54 = vmul.f32 %v4413_v9, %v4395_v63 }
  0x9e   :  { %8215 = vst [vmem:[#allocation64_spill] sm:$0xff] %v4565_v58  ;;  %8216 = vst [vmem:[#allocation65_spill] sm:$0xff] %v4569_v43  ;;  %v4589_v58 = vmul.f32 %v4360_v40, %v4342_v28  ;;  %v4593_v43 = vmul.f32 %v4438_v46, %v4313_v62  ;;  %v4615_v62 = vmul.f32 %v4338_v25, %v4362_v42 }
  0x9f   :  { %8217 = vst [vmem:[#allocation66_spill] sm:$0xff] %v4573_v48  ;;  %8218 = vst [vmem:[#allocation67_spill] sm:$0xff] %v4577_v50  ;;  %v8220_v48 = vmov 1   ;;  %v4596_v59 = vpop.permute.xlu0 %620  ;;  %v1257_v50 = vmul.f32 %v4401_v8, %v4342_v28  ;;  %v1250_v32 = vmul.f32 %v4351_v33, %v4545_v57 }
  0xa0   :  { %8219 = vst [vmem:[#allocation68_spill] sm:$0xff] %v4593_v43  ;;  %3976 = vset.pattern.permute.xlu1 %v8220_v48  ;;  %8221 = vst [vmem:[#allocation69_spill] sm:$0xff] %v4596_v59  ;;  %v4619_v43 = vmul.f32 %v4348_v31, %v4362_v42  ;;  %v4629_v24 = vpop.permute.xlu1 %172  ;;  %v4637_v59 = vmul.f32 %v4410_v21, %v4395_v63 }
  0xa1   :  { %8222 = vst [vmem:[#allocation70_spill] sm:$0xff] %v4602_v16  ;;  %8223 = vst [vmem:[#allocation71_spill] sm:$0xff] %v4606_v45  ;;  %628 = vperm.xlu1 %3976, %v4308_v60   ;;  %v4623_v16 = vmul.f32 %v4354_v35, %v4362_v42  ;;  %v4627_v45 = vmul.f32 %v4466_v11, %v4342_v28  ;;  %v4649_v28 = vmul.f32 %v4338_v25, %v4407_v17 }
  0xa2   :  { %8224 = vst [vmem:[#allocation72_spill] sm:$0xff] %v4610_v36  ;;  %8226 = vst [vmem:[#allocation74_spill] sm:$0xff] %v4629_v24  ;;  %v4633_v36 = vmul.f32 %v4398_v7, %v4362_v42  ;;  %v4653_v42 = vmul.f32 %v4348_v31, %v4407_v17  ;;  %v1248_v11 = vmul.f32 %v4345_v29, %v4545_v57 }
  0xa3   :  { %8225 = vst [vmem:[#allocation73_spill] sm:$0xff] %v4627_v45  ;;  %8227 = vst [vmem:[#allocation75_spill] sm:$0xff] %v4637_v59  ;;  %v4657_v45 = vmul.f32 %v4354_v35, %v4407_v17  ;;  %v4661_v59 = vmul.f32 %v4435_v15, %v4395_v63 }
  0xa4   :  { %8228 = vst [vmem:[#allocation76_spill] sm:$0xff] %v4641_v54  ;;  %8229 = vst [vmem:[#allocation77_spill] sm:$0xff] %v4645_v34  ;;  %v4665_v54 = vmul.f32 %v4398_v7, %v4407_v17  ;;  %v4669_v34 = vmul.f32 %v4420_v26, %v4330_v12  ;;  %v4680_v24 = vpop.permute.xlu0 %192  ;;  %v4684_v17 = vmul.f32 %v4438_v46, %v4330_v12 }
  0xa5   :  { %8230 = vst [vmem:[#allocation78_spill] sm:$0xff] %v4649_v28  ;;  %8231 = vst [vmem:[#allocation79_spill] sm:$0xff] %v4653_v42  ;;  %v4673_v28 = vmul.f32 %v4423_v10, %v4330_v12  ;;  %v4677_v42 = vmul.f32 %v4426_v5, %v4330_v12  ;;  %v392_v12 = vmul.f32 %v4410_v21, %v4680_v24 }
  0xa6   :  { %8232 = vst [vmem:[#allocation80_spill] sm:$0xff] %v4657_v45  ;;  %8233 = vst [vmem:[#allocation81_spill] sm:$0xff] %v4661_v59  ;;  %v8238_v45 = vmov 3  }
  0xa7   :  { %8234 = vst [vmem:[#allocation82_spill] sm:$0xff] %v4665_v54  ;;  %8235 = vst [vmem:[#allocation83_spill] sm:$0xff] %v4669_v34  ;;  %3977 = vset.pattern.permute.xlu1 %v8238_v45  ;;  %v4688_v54 = vmul.f32 %v4135_v19, %v4395_v63  ;;  %v4692_v34 = vmul.f32 %v4198_v37, %v4395_v63  ;;  %v4711_v45 = vmul.f32 %v4338_v25, %v4458_v55 }
  0xa8   :  { %8236 = vst [vmem:[#allocation84_spill] sm:$0xff] %v4673_v28  ;;  %8237 = vst [vmem:[#allocation85_spill] sm:$0xff] %v4677_v42  ;;  %v4696_v28 = vmul.f32 %v4463_v53, %v4395_v63  ;;  %v4698_v42 = vpop.permute.xlu1 %461  ;;  %1420 = vperm.xlu1 %3977, %v4215_v41   ;;  %v4719_v41 = vmul.f32 %v4354_v35, %v4458_v55  ;;  %v4723_v53 = vmul.f32 %v4492_v18, %v4395_v63 }
  0xa9   :  { %8239 = vst [vmem:[#allocation86_spill] sm:$0xff] %v4680_v24  ;;  %8240 = vst [vmem:[#allocation87_spill] sm:$0xff] %v4684_v17  ;;  %v394_v17 = vmul.f32 %v4413_v9, %v4680_v24  ;;  %v600_v37 = vadd.f32 %v4294_v56, %v392_v12  ;;  %v1247_v63 = vmul.f32 %v4360_v40, %v4545_v57 }
  0xaa   :  { %8241 = vst [vmem:[#allocation88_spill] sm:$0xff] %v4688_v54  ;;  %8242 = vst [vmem:[#allocation89_spill] sm:$0xff] %v4692_v34  ;;  %v391_v54 = vmul.f32 %v4432_v38, %v4680_v24  ;;  %v393_v34 = vmul.f32 %v4435_v15, %v4680_v24  ;;  %v1249_v12 = vmul.f32 %v4401_v8, %v4545_v57 }
  0xab   :  { %8243 = vst [vmem:[#allocation90_spill] sm:$0xff] %v4696_v28  ;;  %8244 = vst [vmem:[#allocation91_spill] sm:$0xff] %v4698_v42  ;;  %v4715_v28 = vmul.f32 %v4348_v31, %v4458_v55  ;;  %v602_v59 = vadd.f32 %v4294_v56, %v394_v17  ;;  %v4729_v42 = vpop.permute.xlu0 %187 }
  0xac   :  { %8245 = vst [vmem:[#allocation92_spill] sm:$0xff] %v4723_v53  ;;  %v599_v19 = vadd.f32 %v4294_v56, %v391_v54  ;;  %v601_v24 = vadd.f32 %v4294_v56, %v393_v34  ;;  %8246 = vst [vmem:[#allocation93_spill] sm:$0xff] %v4729_v42  ;;  %3978 = vset.pattern.permute.xlu1 %v8205_v61  ;;  %v992_v54 = vadd.f32 %v4531_v6, %v600_v37  ;;  %v4744_v56 = vpop.permute.xlu1 %1052 }
  0xad   :  { %v994_v34 = vadd.f32 %v4535_v4, %v602_v59  ;;  %8247 = vst [vmem:[#allocation94_spill] sm:$0xff] %v4744_v56  ;;  %132 = vperm.xlu1 %3978, %v4147_v22   ;;  %v384_v18 = vmul.f32 %v4410_v21, %v4729_v42  ;;  %v386_v8 = vmul.f32 %v4413_v9, %v4729_v42 }
  0xae   :  { %v991_v17 = vadd.f32 %v4539_v51, %v599_v19  ;;  %v993_v53 = vadd.f32 %v4549_v2, %v601_v24  ;;  %v383_v40 = vmul.f32 %v4432_v38, %v4729_v42  ;;  %v385_v37 = vmul.f32 %v4435_v15, %v4729_v42 }
  0xaf   :  { %v1384_v19 = vadd.f32 %v4581_v39, %v992_v54  ;;  %v1386_v51 = vadd.f32 %v4585_v47, %v994_v34  ;;  %v4758_v22 = vpop.permute.xlu0 %182  ;;  %v592_v24 = vadd.f32 %v4319_v0, %v384_v18  ;;  %v594_v2 = vadd.f32 %v4319_v0, %v386_v8 }
  0xb0   :  { %v1383_v4 = vadd.f32 %v4589_v58, %v991_v17  ;;  %v1385_v6 = vadd.f32 %v1257_v50, %v993_v53  ;;  %8248 = vst [vmem:[#allocation95_spill] sm:$0xff] %v4758_v22  ;;  %v591_v59 = vadd.f32 %v4319_v0, %v383_v40  ;;  %v593_v33 = vadd.f32 %v4319_v0, %v385_v37  ;;  %v4773_v53 = vpop.permute.xlu1 %1448 }
  0xb1   :  { %v1776_v29 = vadd.f32 %v4481_v3, %v1384_v19  ;;  %v1778_v42 = vadd.f32 %v4485_v30, %v1386_v51  ;;  %3979 = vset.pattern.permute.xlu1 %v8220_v48  ;;  %v984_v50 = vadd.f32 %v4615_v62, %v592_v24  ;;  %v986_v58 = vadd.f32 %v4619_v43, %v594_v2 }
  0xb2   :  { %v1775_v39 = vadd.f32 %v4489_v20, %v1383_v4  ;;  %v1777_v47 = vadd.f32 %v4496_v14, %v1385_v6  ;;  %v983_v8 = vadd.f32 %v4623_v16, %v591_v59  ;;  %v985_v40 = vadd.f32 %v4633_v36, %v593_v33  ;;  %624 = vperm.xlu1 %3979, %v4228_v44  }
  0xb3   :  { %v1904_v3 = vmax.f32 %v1776_v29, 0.0  ;;  %v1906_v30 = vmax.f32 %v1778_v42, 0.0  ;;  %v4776_v54 = vpop.permute.xlu0 %466  ;;  %v1376_v14 = vadd.f32 %v1248_v11, %v984_v50  ;;  %v1640_v62 = vmul.f32 %v4420_v26, %v4773_v53 }
  0xb4   :  { %v1903_v18 = vmax.f32 %v1775_v39, 0.0  ;;  %v1905_v20 = vmax.f32 %v1777_v47, 0.0  ;;  %8249 = vst [vmem:[#allocation96_spill] sm:$0xff] %v4776_v54  ;;  %v1378_v34 = vadd.f32 %v1250_v32, %v986_v58  ;;  %v1642_v43 = vmul.f32 %v4423_v10, %v4773_v53 }
  0xb5   :  { %2023 = vmatprep.subr.mxu0 %v1904_v3  ;;  %2184 = vmatprep.subr.mxu1 %v1906_v30  ;;  %v1375_v33 = vadd.f32 %v1247_v63, %v983_v8  ;;  %v1639_v16 = vmul.f32 %v4426_v5, %v4773_v53  ;;  %v1377_v29 = vadd.f32 %v1249_v12, %v985_v40  ;;  %v8250_v17 = vmov 2   ;;  %v4793_v12 = vpop.permute.xlu1 %456  ;;  %v4815_v8 = vld [vmem:[%s7846_s1 + $0x10] sm:$0xff] }
  0xb6   :  { %2024 = vmatpush1.msra.mxu0 %v1903_v18  ;;  %2185 = vmatpush1.msra.mxu1 %v1905_v20  ;;  %v1768_v36 = vadd.f32 %v1640_v62, %v1376_v14  ;;  %v1770_v42 = vadd.f32 %v1642_v43, %v1378_v34  ;;  %v1641_v11 = vmul.f32 %v4438_v46, %v4773_v53 }
  0xb7   :  { %3980 = vset.pattern.permute.xlu1 %v8250_v17  ;;  %v1767_v32 = vadd.f32 %v1639_v16, %v1375_v33  ;;  %v376_v37 = vmul.f32 %v4410_v21, %v4758_v22  ;;  %v378_v63 = vmul.f32 %v4413_v9, %v4758_v22  ;;  %v849_v19 = vmul.f32 %v4398_v7, %v4458_v55  ;;  %v4796_v51 = vpop.permute.xlu0 %167 }
  0xb8   :  { %8251 = vst [vmem:[#allocation97_spill] sm:$0xff] %v4793_v12  ;;  %1020 = vperm.xlu1 %3980, %v4308_v60   ;;  %8252 = vst [vmem:[#allocation98_spill] sm:$0xff] %v4796_v51  ;;  %v1896_v4 = vmax.f32 %v1768_v36, 0.0  ;;  %v1898_v6 = vmax.f32 %v1770_v42, 0.0  ;;  %v1769_v24 = vadd.f32 %v1641_v11, %v1377_v29  ;;  %v4800_v2 = vmul.f32 %v4338_v25, %v4460_v1 }
  0xb9   :  { %v1895_v59 = vmax.f32 %v1767_v32, 0.0  ;;  %v375_v39 = vmul.f32 %v4432_v38, %v4758_v22  ;;  %v4806_v47 = vmul.f32 %v4348_v31, %v4460_v1  ;;  %v4810_v50 = vmul.f32 %v4354_v35, %v4460_v1  ;;  %v4846_v29 = vpop.permute.xlu1 %652  ;;  %v102_v32 = vld [vmem:[%s7847_s2 + $0x18] sm:$0xff] }
  0xba   :  { %8253 = vst [vmem:[#allocation99_spill] sm:$0xff] %v4800_v2  ;;  %2025 = vmatprep.subr.mxu0 %v1896_v4  ;;  %2186 = vmatprep.subr.mxu1 %v1898_v6  ;;  %v1897_v58 = vmax.f32 %v1769_v24, 0.0  ;;  %v584_v40 = vadd.f32 %v4776_v54, %v376_v37  ;;  %v586_v3 = vadd.f32 %v4776_v54, %v378_v63  ;;  %8262 = vst [vmem:[#allocation108_spill] sm:$0xff] %v4846_v29  ;;  %v8267_v24 = vld [vmem:[#allocation8_spill] sm:$0xff] }
  0xbb   :  { %8254 = vst [vmem:[#allocation100_spill] sm:$0xff] %v4806_v47  ;;  %8255 = vst [vmem:[#allocation101_spill] sm:$0xff] %v4810_v50  ;;  %v377_v30 = vmul.f32 %v4435_v15, %v4758_v22  ;;  %2026 = vmatpush1.msra.mxu0 %v1895_v59  ;;  %v583_v18 = vadd.f32 %v4776_v54, %v375_v39  ;;  %v4824_v20 = vmul.f32 %v4398_v7, %v4460_v1  ;;  %v4835_v34 = vpop.permute.xlu0 %451  ;;  %v8269_v39 = vld [vmem:[#allocation9_spill] sm:$0xff]  ;;  %v8273_v1 = vld [vmem:[#allocation48_spill] sm:$0xff] }
  0xbc   :  { %v4828_v14 = vmul.f32 %v4150_v23, %v4458_v55  ;;  %v4832_v62 = vmul.f32 %v4167_v27, %v4458_v55  ;;  %2187 = vmatpush1.msra.mxu1 %v1897_v58  ;;  %3982 = vset.pattern.permute.xlu1 %v8205_v61  ;;  %8259 = vst [vmem:[#allocation105_spill] sm:$0xff] %v4835_v34  ;;  %v8280_v27 = vld [vmem:[#allocation74_spill] sm:$0xff] }
  0xbd   :  { %8256 = vst [vmem:[#allocation102_spill] sm:$0xff] %v4824_v20  ;;  %v585_v43 = vadd.f32 %v4776_v54, %v377_v30  ;;  %v4840_v33 = vmul.f32 %v4367_v49, %v4458_v55  ;;  %v4844_v16 = vmul.f32 %v4370_v52, %v4458_v55  ;;  %127 = vperm.xlu1 %3982, %v4815_v8   ;;  %v8271_v30 = vld [vmem:[#allocation42_spill] sm:$0xff]  ;;  %v8279_v52 = vld [vmem:[#allocation32_spill] sm:$0xff] }
  0xbe   :  { %8257 = vst [vmem:[#allocation103_spill] sm:$0xff] %v4828_v14  ;;  %8258 = vst [vmem:[#allocation104_spill] sm:$0xff] %v4832_v62  ;;  %v4851_v36 = vmul.f32 %v4338_v25, %v4527_v13  ;;  %v4855_v42 = vmul.f32 %v4348_v31, %v4527_v13  ;;  %v4859_v11 = vmul.f32 %v4354_v35, %v4527_v13  ;;  %v8315_v47 = vld [vmem:[#allocation62_spill] sm:$0xff] }
  0xbf   :  { %8260 = vst [vmem:[#allocation106_spill] sm:$0xff] %v4840_v33  ;;  %8261 = vst [vmem:[#allocation107_spill] sm:$0xff] %v4844_v16  ;;  %v4863_v55 = vmul.f32 %v4398_v7, %v4527_v13  ;;  %v976_v37 = vadd.f32 %v4711_v45, %v584_v40  ;;  %v978_v63 = vadd.f32 %v4715_v28, %v586_v3  ;;  %v4887_v28 = vpop.permute.xlu0 %152  ;;  %v8277_v40 = vld [vmem:[#allocation22_spill] sm:$0xff] }
  0xc0   :  { %8263 = vst [vmem:[#allocation109_spill] sm:$0xff] %v4851_v36  ;;  %8264 = vst [vmem:[#allocation110_spill] sm:$0xff] %v4855_v42  ;;  %v975_v4 = vadd.f32 %v4719_v41, %v583_v18  ;;  %v977_v6 = vadd.f32 %v849_v19, %v585_v43  ;;  %v4873_v59 = vmul.f32 %v8267_v24, %v4545_v57  ;;  %v8276_v41 = vld [vmem:[#allocation20_spill] sm:$0xff]  ;;  %v4905_v42 = vpop.permute.xlu1 %1444  ;;  %v8283_v24 = vld [vmem:[#allocation75_spill] sm:$0xff] }
  0xc1   :  { %8265 = vst [vmem:[#allocation111_spill] sm:$0xff] %v4859_v11  ;;  %8266 = vst [vmem:[#allocation112_spill] sm:$0xff] %v4863_v55  ;;  %v4877_v58 = vmul.f32 %v8269_v39, %v4545_v57  ;;  %v4881_v13 = vmul.f32 %v8271_v30, %v4545_v57  ;;  %v4885_v45 = vmul.f32 %v8273_v1, %v4545_v57  ;;  %v8278_v18 = vld [vmem:[#allocation24_spill] sm:$0xff]  ;;  %416 = vperm.xlu1 %3982, %v102_v32  }
  0xc2   :  { %8268 = vst [vmem:[#allocation113_spill] sm:$0xff] %v4873_v59  ;;  %8275 = vst [vmem:[#allocation117_spill] sm:$0xff] %v4887_v28  ;;  %v1240_v19 = vmul.f32 %v8276_v41, %v4744_v56  ;;  %v1242_v3 = vmul.f32 %v8277_v40, %v4744_v56  ;;  %v1239_v43 = vmul.f32 %v8278_v18, %v4744_v56 }
  0xc3   :  { %8270 = vst [vmem:[#allocation114_spill] sm:$0xff] %v4877_v58  ;;  %8272 = vst [vmem:[#allocation115_spill] sm:$0xff] %v4881_v13  ;;  %v1241_v49 = vmul.f32 %v8279_v52, %v4744_v56  ;;  %v360_v23 = vmul.f32 %v4410_v21, %v8280_v27  ;;  %v362_v57 = vmul.f32 %v4413_v9, %v8280_v27  ;;  %v4915_v14 = vpop.permute.xlu0 %436  ;;  %v8284_v56 = vld [vmem:[#allocation91_spill] sm:$0xff]  ;;  %v8290_v13 = vld [vmem:[#allocation81_spill] sm:$0xff] }
  0xc4   :  { %8274 = vst [vmem:[#allocation116_spill] sm:$0xff] %v4885_v45  ;;  %v359_v55 = vmul.f32 %v4432_v38, %v8280_v27  ;;  %v361_v11 = vmul.f32 %v4435_v15, %v8280_v27  ;;  %8281 = vst [vmem:[#allocation20_spill] sm:$0xff] %v4905_v42  ;;  %v1368_v36 = vadd.f32 %v1240_v19, %v976_v37  ;;  %v8289_v45 = vld [vmem:[#allocation77_spill] sm:$0xff]  ;;  %v8291_v58 = vld [vmem:[#allocation10_spill] sm:$0xff] }
  0xc5   :  { %v1370_v16 = vadd.f32 %v1242_v3, %v978_v63  ;;  %v1367_v1 = vadd.f32 %v1239_v43, %v975_v4  ;;  %v1369_v30 = vadd.f32 %v1241_v49, %v977_v6  ;;  %v1632_v32 = vmul.f32 %v4420_v26, %v4905_v42  ;;  %8282 = vst [vmem:[#allocation74_spill] sm:$0xff] %v4915_v14  ;;  %v8285_v63 = vld [vmem:[#allocation76_spill] sm:$0xff]  ;;  %v8286_v4 = vld [vmem:[#allocation86_spill] sm:$0xff]  ;;  %v8287_v6 = vld [vmem:[#allocation5_spill] sm:$0xff] }
  0xc6   :  { %v1634_v33 = vmul.f32 %v4423_v10, %v4905_v42  ;;  %v1631_v39 = vmul.f32 %v4426_v5, %v4905_v42  ;;  %v1633_v62 = vmul.f32 %v4438_v46, %v4905_v42  ;;  %v576_v37 = vadd.f32 %v8284_v56, %v8283_v24  ;;  %3984 = vset.pattern.permute.xlu1 %v8250_v17 }
  0xc7   :  { %v578_v49 = vadd.f32 %v8284_v56, %v8285_v63  ;;  %v396_v19 = vmul.f32 %v8287_v6, %v8286_v4  ;;  %v4925_v3 = vmul.f32 %v8287_v6, %v8280_v27  ;;  %v1760_v43 = vadd.f32 %v1632_v32, %v1368_v36  ;;  %1016 = vperm.xlu1 %3984, %v4228_v44   ;;  %v4941_v36 = vpop.permute.xlu1 %162 }
  0xc8   :  { %v1762_v54 = vadd.f32 %v1634_v33, %v1370_v16  ;;  %v1759_v42 = vadd.f32 %v1631_v39, %v1367_v1  ;;  %v1761_v22 = vadd.f32 %v1633_v62, %v1369_v30  ;;  %v575_v24 = vadd.f32 %v8284_v56, %v8289_v45  ;;  %8295 = vst [vmem:[#allocation77_spill] sm:$0xff] %v4941_v36  ;;  %v4943_v39 = vpop.permute.xlu0 %137  ;;  %v8297_v30 = vld [vmem:[#allocation69_spill] sm:$0xff] }
  0xc9   :  { %8288 = vst [vmem:[#allocation75_spill] sm:$0xff] %v4925_v3  ;;  %v577_v63 = vadd.f32 %v8284_v56, %v8290_v13  ;;  %v4935_v59 = vmul.f32 %v8291_v58, %v8280_v27  ;;  %v8293_v3 = vld [vmem:[#allocation47_spill] sm:$0xff]  ;;  %v1888_v1 = vmax.f32 %v1760_v43, 0.0  ;;  %8296 = vst [vmem:[#allocation81_spill] sm:$0xff] %v4943_v39  ;;  %v4947_v45 = vmul.f32 %v4338_v25, %v8297_v30 }
  0xca   :  { %v4939_v20 = vmul.f32 %v8293_v3, %v8280_v27  ;;  %v1890_v62 = vmax.f32 %v1762_v54, 0.0  ;;  %v1887_v33 = vmax.f32 %v1759_v42, 0.0  ;;  %v1889_v16 = vmax.f32 %v1761_v22, 0.0  ;;  %v8303_v22 = vld [vmem:[#allocation78_spill] sm:$0xff]  ;;  %v8304_v42 = vld [vmem:[#allocation79_spill] sm:$0xff] }
  0xcb   :  { %8292 = vst [vmem:[#allocation76_spill] sm:$0xff] %v4935_v59  ;;  %8298 = vst [vmem:[#allocation118_spill] sm:$0xff] %v4947_v45  ;;  %v4951_v13 = vmul.f32 %v4348_v31, %v8297_v30  ;;  %v4955_v32 = vmul.f32 %v4354_v35, %v8297_v30  ;;  %2027 = vmatprep.subr.mxu0 %v1888_v1  ;;  %v4962_v54 = vadd.f32 %v8303_v22, %v576_v37  ;;  %v8309_v37 = vld [vmem:[#allocation82_spill] sm:$0xff]  ;;  %v4986_v22 = vpop.permute.xlu1 %648 }
  0xcc   :  { %8294 = vst [vmem:[#allocation86_spill] sm:$0xff] %v4939_v20  ;;  %v8301_v20 = vld [vmem:[#allocation51_spill] sm:$0xff]  ;;  %2188 = vmatprep.subr.mxu1 %v1890_v62  ;;  %v4965_v59 = vadd.f32 %v8304_v42, %v578_v49  ;;  %v4969_v45 = vmul.f32 %v4398_v7, %v8297_v30  ;;  %2028 = vmatpush1.msra.mxu0 %v1887_v33  ;;  %8310 = vst [vmem:[#allocation79_spill] sm:$0xff] %v4986_v22 }
  0xcd   :  { %8299 = vst [vmem:[#allocation119_spill] sm:$0xff] %v4951_v13  ;;  %8300 = vst [vmem:[#allocation120_spill] sm:$0xff] %v4955_v32  ;;  %v4959_v43 = vmul.f32 %v8301_v20, %v8280_v27  ;;  %v8306_v13 = vmov 3   ;;  %v8307_v32 = vld [vmem:[#allocation80_spill] sm:$0xff]  ;;  %v8308_v27 = vld [vmem:[#allocation14_spill] sm:$0xff]  ;;  %v398_v1 = vmul.f32 %v8291_v58, %v8286_v4  ;;  %2189 = vmatpush1.msra.mxu1 %v1889_v16  ;;  %v4980_v49 = vadd.f32 %v8309_v37, %v577_v63 }
  0xce   :  { %8305 = vst [vmem:[#allocation78_spill] sm:$0xff] %v4969_v45  ;;  %3985 = vset.pattern.permute.xlu1 %v8306_v13  ;;  %v4973_v56 = vadd.f32 %v8307_v32, %v575_v24  ;;  %v395_v62 = vmul.f32 %v8293_v3, %v8286_v4  ;;  %v397_v33 = vmul.f32 %v8301_v20, %v8286_v4  ;;  %v4988_v24 = vpop.permute.xlu0 %421  ;;  %v8312_v16 = vld [vmem:[#allocation61_spill] sm:$0xff]  ;;  %v101_v63 = vld [vmem:[%s7847_s2 + $0x10] sm:$0xff]  ;;  %v8314_v20 = vld [vmem:[#allocation70_spill] sm:$0xff] }
  0xcf   :  { %8302 = vst [vmem:[#allocation121_spill] sm:$0xff] %v4959_v43  ;;  %v604_v43 = vadd.f32 %v8308_v27, %v396_v19  ;;  %1412 = vperm.xlu1 %3985, %v4308_v60   ;;  %8311 = vst [vmem:[#allocation80_spill] sm:$0xff] %v4988_v24  ;;  %v568_v19 = vadd.f32 %v4793_v12, %v360_v23  ;;  %v570_v32 = vadd.f32 %v4793_v12, %v362_v57  ;;  %v5026_v2 = vpop.permute.xlu1 %1044 }
  0xd0   :  { %v606_v60 = vadd.f32 %v8308_v27, %v398_v1  ;;  %v832_v37 = vmul.f32 %v4338_v25, %v4846_v29  ;;  %v834_v4 = vmul.f32 %v4348_v31, %v4846_v29  ;;  %v567_v30 = vadd.f32 %v4793_v12, %v359_v55  ;;  %8316 = vst [vmem:[#allocation82_spill] sm:$0xff] %v5026_v2 }
  0xd1   :  { %v996_v42 = vadd.f32 %v8312_v16, %v604_v43  ;;  %v569_v23 = vadd.f32 %v4793_v12, %v361_v11  ;;  %v831_v57 = vmul.f32 %v4354_v35, %v4846_v29  ;;  %v833_v43 = vmul.f32 %v4398_v7, %v4846_v29 }
  0xd2   :  { %v352_v1 = vmul.f32 %v4410_v21, %v4796_v51  ;;  %v354_v16 = vmul.f32 %v4413_v9, %v4796_v51  ;;  %v351_v45 = vmul.f32 %v4432_v38, %v4796_v51  ;;  %v353_v11 = vmul.f32 %v4435_v15, %v4796_v51  ;;  %v5020_v12 = vpop.permute.xlu0 %122 }
  0xd3   :  { %3986 = vset.pattern.permute.xlu1 %v8205_v61  ;;  %v328_v55 = vmul.f32 %v4410_v21, %v4887_v28  ;;  %v330_v29 = vmul.f32 %v4413_v9, %v4887_v28  ;;  %8313 = vst [vmem:[#allocation14_spill] sm:$0xff] %v5020_v12  ;;  %v1388_v50 = vadd.f32 %v8314_v20, %v996_v42  ;;  %v8320_v42 = vld [vmem:[#allocation63_spill] sm:$0xff] }
  0xd4   :  { %411 = vperm.xlu1 %3986, %v101_v63   ;;  %v998_v3 = vadd.f32 %v8315_v47, %v606_v60  ;;  %v603_v0 = vadd.f32 %v8308_v27, %v395_v62  ;;  %v605_v17 = vadd.f32 %v8308_v27, %v397_v33  ;;  %v5028_v51 = vadd.f32 %v832_v37, %v568_v19  ;;  %v8317_v62 = vld [vmem:[#allocation52_spill] sm:$0xff]  ;;  %v8319_v19 = vld [vmem:[#allocation71_spill] sm:$0xff] }
  0xd5   :  { %v5030_v46 = vadd.f32 %v834_v4, %v570_v32  ;;  %v327_v5 = vmul.f32 %v4432_v38, %v4887_v28  ;;  %v329_v63 = vmul.f32 %v4435_v15, %v4887_v28  ;;  %v5036_v10 = vadd.f32 %v831_v57, %v567_v30  ;;  %v8321_v37 = vld [vmem:[#allocation67_spill] sm:$0xff] }
  0xd6   :  { %v5038_v20 = vadd.f32 %v833_v43, %v569_v23  ;;  %v560_v47 = vadd.f32 %v4835_v34, %v352_v1  ;;  %v5042_v27 = vadd.f32 %v4835_v34, %v354_v16  ;;  %v5045_v33 = vadd.f32 %v8317_v62, %v1388_v50  ;;  %v5051_v30 = vpop.permute.xlu0 %406  ;;  %v5080_v1 = vpop.permute.xlu1 %157  ;;  %v8328_v16 = vld [vmem:[#allocation53_spill] sm:$0xff] }
  0xd7   :  { %v1390_v32 = vadd.f32 %v8319_v19, %v998_v3  ;;  %v995_v60 = vadd.f32 %v8320_v42, %v603_v0  ;;  %v997_v4 = vadd.f32 %v8321_v37, %v605_v17  ;;  %8322 = vst [vmem:[#allocation70_spill] sm:$0xff] %v5051_v30  ;;  %v5054_v23 = vadd.f32 %v4835_v34, %v351_v45  ;;  %v8331_v19 = vld [vmem:[#allocation73_spill] sm:$0xff] }
  0xd8   :  { %8318 = vst [vmem:[#allocation61_spill] sm:$0xff] %v5045_v33  ;;  %3987 = vset.pattern.permute.xlu1 %v8220_v48  ;;  %v5057_v57 = vadd.f32 %v4835_v34, %v353_v11  ;;  %v5060_v43 = vadd.f32 %v4915_v14, %v328_v55  ;;  %v5063_v50 = vadd.f32 %v4915_v14, %v330_v29  ;;  %8327 = vst [vmem:[#allocation67_spill] sm:$0xff] %v5080_v1  ;;  %v8330_v55 = vld [vmem:[#allocation72_spill] sm:$0xff] }
  0xd9   :  { %616 = vperm.xlu1 %3987, %v4815_v8   ;;  %v5068_v0 = vmul.f32 %v4410_v21, %v4941_v36  ;;  %v5072_v17 = vmul.f32 %v4413_v9, %v4941_v36  ;;  %v5075_v3 = vadd.f32 %v4915_v14, %v327_v5  ;;  %v5078_v45 = vadd.f32 %v4915_v14, %v329_v63 }
  0xda   :  { %8323 = vst [vmem:[#allocation62_spill] sm:$0xff] %v5060_v43  ;;  %8324 = vst [vmem:[#allocation52_spill] sm:$0xff] %v5063_v50  ;;  %v5084_v29 = vmul.f32 %v4432_v38, %v4941_v36  ;;  %v5087_v11 = vadd.f32 %v8328_v16, %v1390_v32  ;;  %v1387_v62 = vadd.f32 %v8330_v55, %v995_v60  ;;  %v8332_v16 = vld [vmem:[#allocation54_spill] sm:$0xff] }
  0xdb   :  { %8325 = vst [vmem:[#allocation71_spill] sm:$0xff] %v5075_v3  ;;  %8326 = vst [vmem:[#allocation63_spill] sm:$0xff] %v5078_v45  ;;  %v1389_v42 = vadd.f32 %v8331_v19, %v997_v4  ;;  %v5093_v5 = vmul.f32 %v4435_v15, %v4941_v36  ;;  %v304_v63 = vmul.f32 %v4410_v21, %v4943_v39  ;;  %v8334_v4 = vld [vmem:[#allocation58_spill] sm:$0xff]  ;;  %v8336_v19 = vld [vmem:[#allocation93_spill] sm:$0xff]  ;;  %v5114_v36 = vpop.permute.xlu0 %1048 }
  0xdc   :  { %8329 = vst [vmem:[#allocation53_spill] sm:$0xff] %v5087_v11  ;;  %v306_v37 = vmul.f32 %v4413_v9, %v4943_v39  ;;  %v303_v14 = vmul.f32 %v4432_v38, %v4943_v39  ;;  %v305_v32 = vmul.f32 %v4435_v15, %v4943_v39  ;;  %v5104_v60 = vadd.f32 %v8332_v16, %v1387_v62  ;;  %v8338_v62 = vld [vmem:[#allocation11_spill] sm:$0xff] }
  0xdd   :  { %v5107_v55 = vadd.f32 %v8334_v4, %v1389_v42  ;;  %v5111_v28 = vmul.f32 %v8287_v6, %v8336_v19  ;;  %3988 = vset.pattern.permute.xlu1 %v8306_v13  ;;  %8337 = vst [vmem:[#allocation54_spill] sm:$0xff] %v5114_v36  ;;  %v824_v34 = vmul.f32 %v4338_v25, %v4986_v22  ;;  %v5128_v4 = vpop.permute.xlu1 %446  ;;  %v5152_v25 = vld [vmem:[%s7846_s1] sm:$0xff] }
  0xde   :  { %8333 = vst [vmem:[#allocation72_spill] sm:$0xff] %v5104_v60  ;;  %v826_v39 = vmul.f32 %v4348_v31, %v4986_v22  ;;  %v5122_v16 = vmul.f32 %v8338_v62, %v4773_v53  ;;  %v5126_v42 = vmul.f32 %v8291_v58, %v8336_v19  ;;  %8339 = vst [vmem:[#allocation58_spill] sm:$0xff] %v5128_v4  ;;  %1408 = vperm.xlu1 %3988, %v4228_v44  }
  0xdf   :  { %8335 = vst [vmem:[#allocation73_spill] sm:$0xff] %v5107_v55  ;;  %v1232_v55 = vmul.f32 %v8276_v41, %v5114_v36  ;;  %v1234_v45 = vmul.f32 %v8277_v40, %v5114_v36  ;;  %v1231_v3 = vmul.f32 %v8278_v18, %v5114_v36  ;;  %v1233_v50 = vmul.f32 %v8279_v52, %v5114_v36 }
  0xe0   :  { %v823_v43 = vmul.f32 %v4354_v35, %v4986_v22  ;;  %v825_v60 = vmul.f32 %v4398_v7, %v4986_v22  ;;  %v5144_v44 = vadd.f32 %v4988_v24, %v304_v63  ;;  %v5147_v31 = vadd.f32 %v4988_v24, %v306_v37 }
  0xe1   :  { %v1360_v62 = vadd.f32 %v1232_v55, %v4962_v54  ;;  %v1362_v36 = vadd.f32 %v1234_v45, %v4965_v59  ;;  %v1359_v35 = vadd.f32 %v1231_v3, %v4973_v56  ;;  %v1361_v11 = vadd.f32 %v1233_v50, %v4980_v49  ;;  %v8344_v54 = vld [vmem:[#allocation55_spill] sm:$0xff]  ;;  %v8345_v59 = vld [vmem:[#allocation56_spill] sm:$0xff]  ;;  %v8346_v56 = vld [vmem:[#allocation57_spill] sm:$0xff] }
  0xe2   :  { %8340 = vst [vmem:[#allocation93_spill] sm:$0xff] %v5144_v44  ;;  %8341 = vst [vmem:[#allocation122_spill] sm:$0xff] %v5147_v31  ;;  %v5158_v22 = vadd.f32 %v824_v34, %v560_v47  ;;  %v5161_v63 = vadd.f32 %v4988_v24, %v303_v14  ;;  %v5164_v37 = vadd.f32 %v4988_v24, %v305_v32  ;;  %3989 = vset.pattern.permute.xlu1 %v8205_v61  ;;  %v8347_v49 = vld [vmem:[#allocation60_spill] sm:$0xff]  ;;  %v5173_v47 = vpop.permute.xlu1 %1040 }
  0xe3   :  { %v280_v31 = vmul.f32 %v4410_v21, %v5020_v12  ;;  %v1752_v55 = vadd.f32 %v8344_v54, %v1360_v62  ;;  %v1754_v45 = vadd.f32 %v8345_v59, %v1362_v36  ;;  %v1751_v3 = vadd.f32 %v8346_v56, %v1359_v35  ;;  %8348 = vst [vmem:[#allocation55_spill] sm:$0xff] %v5173_v47 }
  0xe4   :  { %8342 = vst [vmem:[#allocation123_spill] sm:$0xff] %v5161_v63  ;;  %8343 = vst [vmem:[#allocation124_spill] sm:$0xff] %v5164_v37  ;;  %v1753_v34 = vadd.f32 %v8347_v49, %v1361_v11  ;;  %117 = vperm.xlu1 %3989, %v5152_v25   ;;  %v1224_v14 = vmul.f32 %v8276_v41, %v5026_v2  ;;  %v1226_v50 = vmul.f32 %v8277_v40, %v5026_v2  ;;  %v8357_v37 = vmov 2  }
  0xe5   :  { %v1223_v32 = vmul.f32 %v8278_v18, %v5026_v2  ;;  %v1225_v36 = vmul.f32 %v8279_v52, %v5026_v2  ;;  %v1880_v62 = vmax.f32 %v1752_v55, 0.0  ;;  %v1882_v35 = vmax.f32 %v1754_v45, 0.0 }
  0xe6   :  { %v1879_v54 = vmax.f32 %v1751_v3, 0.0  ;;  %v1881_v11 = vmax.f32 %v1753_v34, 0.0  ;;  %v5185_v59 = vadd.f32 %v826_v39, %v5042_v27  ;;  %v5188_v56 = vadd.f32 %v823_v43, %v5054_v23  ;;  %v5201_v27 = vpop.permute.xlu0 %1036 }
  0xe7   :  { %v5191_v49 = vadd.f32 %v825_v60, %v5057_v57  ;;  %v282_v24 = vmul.f32 %v4413_v9, %v5020_v12  ;;  %2029 = vmatprep.subr.mxu0 %v1880_v62  ;;  %2190 = vmatprep.subr.mxu1 %v1882_v35  ;;  %v552_v55 = vadd.f32 %v5128_v4, %v5068_v0  ;;  %v5207_v60 = vpop.permute.xlu1 %1436  ;;  %v8351_v0 = vld [vmem:[#allocation13_spill] sm:$0xff] }
  0xe8   :  { %v279_v45 = vmul.f32 %v4432_v38, %v5020_v12  ;;  %v281_v39 = vmul.f32 %v4435_v15, %v5020_v12  ;;  %8349 = vst [vmem:[#allocation56_spill] sm:$0xff] %v5201_v27  ;;  %3991 = vset.pattern.permute.xlu1 %v8220_v48  ;;  %2030 = vmatpush1.msra.mxu0 %v1879_v54  ;;  %8350 = vst [vmem:[#allocation57_spill] sm:$0xff] %v5207_v60  ;;  %v8356_v54 = vld [vmem:[#allocation99_spill] sm:$0xff] }
  0xe9   :  { %v1352_v23 = vadd.f32 %v1224_v14, %v5028_v51  ;;  %v1354_v57 = vadd.f32 %v1226_v50, %v5030_v46  ;;  %v1351_v43 = vadd.f32 %v1223_v32, %v5036_v10  ;;  %2191 = vmatpush1.msra.mxu1 %v1881_v11  ;;  %612 = vperm.xlu1 %3991, %v8351_v0   ;;  %v8353_v46 = vld [vmem:[#allocation36_spill] sm:$0xff]  ;;  %v8354_v10 = vld [vmem:[#allocation37_spill] sm:$0xff] }
  0xea   :  { %v1353_v3 = vadd.f32 %v1225_v36, %v5038_v20  ;;  %v554_v34 = vadd.f32 %v5128_v4, %v5072_v17  ;;  %v5214_v62 = vadd.f32 %v5051_v30, %v280_v31  ;;  %v1616_v51 = vmul.f32 %v4420_v26, %v5207_v60  ;;  %v8355_v32 = vld [vmem:[#allocation40_spill] sm:$0xff] }
  0xeb   :  { %v1618_v14 = vmul.f32 %v8353_v46, %v5207_v60  ;;  %v1615_v50 = vmul.f32 %v8354_v10, %v5207_v60  ;;  %v1617_v35 = vmul.f32 %v8355_v32, %v5207_v60  ;;  %v944_v20 = vadd.f32 %v8356_v54, %v552_v55  ;;  %v8359_v55 = vld [vmem:[#allocation17_spill] sm:$0xff]  ;;  %v5241_v2 = vpop.permute.xlu1 %441 }
  0xec   :  { %8352 = vst [vmem:[#allocation60_spill] sm:$0xff] %v5214_v62  ;;  %v1208_v17 = vmul.f32 %v8276_v41, %v5201_v27  ;;  %v551_v31 = vadd.f32 %v5128_v4, %v5084_v29  ;;  %v553_v36 = vadd.f32 %v5128_v4, %v5093_v5  ;;  %v1744_v11 = vadd.f32 %v1616_v51, %v1352_v23  ;;  %v8360_v29 = vld [vmem:[#allocation47_spill] sm:$0xff]  ;;  %v8371_v4 = vld [vmem:[#allocation12_spill] sm:$0xff] }
  0xed   :  { %v1746_v0 = vadd.f32 %v1618_v14, %v1354_v57  ;;  %v1743_v12 = vadd.f32 %v1615_v50, %v1351_v43  ;;  %v1745_v62 = vadd.f32 %v1617_v35, %v1353_v3  ;;  %3992 = vset.pattern.permute.xlu1 %v8357_v37  ;;  %v5233_v63 = vadd.f32 %v5051_v30, %v282_v24  ;;  %v8362_v3 = vld [vmem:[#allocation100_spill] sm:$0xff]  ;;  %v8364_v50 = vld [vmem:[#allocation102_spill] sm:$0xff]  ;;  %v99_v35 = vld [vmem:[%s7847_s2] sm:$0xff] }
  0xee   :  { %v596_v54 = vadd.f32 %v8359_v55, %v5111_v28  ;;  %v598_v44 = vadd.f32 %v8359_v55, %v5126_v42  ;;  %v387_v60 = vmul.f32 %v8360_v29, %v8336_v19  ;;  %8361 = vst [vmem:[#allocation99_spill] sm:$0xff] %v5241_v2  ;;  %1008 = vperm.xlu1 %3992, %v4815_v8   ;;  %v1872_v5 = vmax.f32 %v1744_v11, 0.0  ;;  %v8363_v28 = vld [vmem:[#allocation101_spill] sm:$0xff] }
  0xef   :  { %8358 = vst [vmem:[#allocation13_spill] sm:$0xff] %v5233_v63  ;;  %v1874_v23 = vmax.f32 %v1746_v0, 0.0  ;;  %v1871_v57 = vmax.f32 %v1743_v12, 0.0  ;;  %v1873_v43 = vmax.f32 %v1745_v62, 0.0  ;;  %v946_v24 = vadd.f32 %v8362_v3, %v554_v34 }
  0xf0   :  { %v1210_v51 = vmul.f32 %v8277_v40, %v5201_v27  ;;  %v943_v14 = vadd.f32 %v8363_v28, %v551_v31  ;;  %v945_v42 = vadd.f32 %v8364_v50, %v553_v36  ;;  %2031 = vmatprep.subr.mxu0 %v1872_v5  ;;  %v1336_v63 = vadd.f32 %v1208_v17, %v944_v20  ;;  %v5273_v5 = vpop.permute.xlu1 %640  ;;  %v8370_v28 = vld [vmem:[#allocation64_spill] sm:$0xff] }
  0xf1   :  { %2192 = vmatprep.subr.mxu1 %v1874_v23  ;;  %v1207_v12 = vmul.f32 %v8278_v18, %v5201_v27  ;;  %v1209_v34 = vmul.f32 %v8279_v52, %v5201_v27  ;;  %2032 = vmatpush1.msra.mxu0 %v1871_v57  ;;  %v336_v62 = vmul.f32 %v4410_v21, %v5080_v1  ;;  %v8369_v57 = vld [vmem:[#allocation28_spill] sm:$0xff] }
  0xf2   :  { %2193 = vmatpush1.msra.mxu1 %v1873_v43  ;;  %v5259_v31 = vadd.f32 %v5051_v30, %v279_v45  ;;  %v5262_v36 = vadd.f32 %v5051_v30, %v281_v39  ;;  %3993 = vset.pattern.permute.xlu1 %v8205_v61  ;;  %v1216_v20 = vmul.f32 %v8276_v41, %v5173_v47  ;;  %v8368_v39 = vld [vmem:[#allocation27_spill] sm:$0xff] }
  0xf3   :  { %v1218_v17 = vmul.f32 %v8277_v40, %v5173_v47  ;;  %v1215_v11 = vmul.f32 %v8278_v18, %v5173_v47  ;;  %v1217_v0 = vmul.f32 %v8279_v52, %v5173_v47  ;;  %8367 = vst [vmem:[#allocation101_spill] sm:$0xff] %v5273_v5  ;;  %401 = vperm.xlu1 %3993, %v99_v35  }
  0xf4   :  { %8365 = vst [vmem:[#allocation17_spill] sm:$0xff] %v5259_v31  ;;  %8366 = vst [vmem:[#allocation100_spill] sm:$0xff] %v5262_v36  ;;  %v338_v45 = vmul.f32 %v4413_v9, %v5080_v1  ;;  %v988_v23 = vadd.f32 %v8368_v39, %v596_v54  ;;  %v990_v43 = vadd.f32 %v8369_v57, %v598_v44  ;;  %v8372_v54 = vld [vmem:[#allocation41_spill] sm:$0xff] }
  0xf5   :  { %v595_v3 = vadd.f32 %v8359_v55, %v387_v60  ;;  %v5281_v50 = vadd.f32 %v8370_v28, %v1336_v63  ;;  %v1338_v30 = vadd.f32 %v1210_v51, %v946_v24  ;;  %v1335_v36 = vadd.f32 %v1207_v12, %v943_v14  ;;  %v5296_v14 = vpop.permute.xlu0 %1024  ;;  %v8376_v57 = vld [vmem:[#allocation29_spill] sm:$0xff] }
  0xf6   :  { %v1337_v31 = vadd.f32 %v1209_v34, %v945_v42  ;;  %v335_v27 = vmul.f32 %v4432_v38, %v5080_v1  ;;  %v337_v35 = vmul.f32 %v4435_v15, %v5080_v1  ;;  %v1646_v47 = vmul.f32 %v8371_v4, %v4773_v53  ;;  %8373 = vst [vmem:[#allocation102_spill] sm:$0xff] %v5296_v14  ;;  %v8374_v42 = vld [vmem:[#allocation113_spill] sm:$0xff]  ;;  %v8375_v34 = vld [vmem:[#allocation114_spill] sm:$0xff]  ;;  %v8377_v1 = vld [vmem:[#allocation51_spill] sm:$0xff] }
  0xf7   :  { %v1643_v44 = vmul.f32 %v8372_v54, %v4773_v53  ;;  %v1344_v60 = vadd.f32 %v1216_v20, %v5158_v22  ;;  %v1346_v63 = vadd.f32 %v1218_v17, %v5185_v59  ;;  %v1343_v24 = vadd.f32 %v1215_v11, %v5188_v56  ;;  %3994 = vset.pattern.permute.xlu1 %v8220_v48  ;;  %v5303_v22 = vpop.permute.xlu1 %1432  ;;  %v8379_v56 = vld [vmem:[#allocation65_spill] sm:$0xff]  ;;  %v8380_v48 = vld [vmem:[#allocation66_spill] sm:$0xff]  ;;  %v8381_v17 = vld [vmem:[#allocation68_spill] sm:$0xff] }
  0xf8   :  { %v1345_v51 = vadd.f32 %v1217_v0, %v5191_v49  ;;  %v1380_v12 = vadd.f32 %v8374_v42, %v988_v23  ;;  %v1382_v39 = vadd.f32 %v8375_v34, %v990_v43  ;;  %v987_v28 = vadd.f32 %v8376_v57, %v595_v3  ;;  %8378 = vst [vmem:[#allocation27_spill] sm:$0xff] %v5303_v22 }
  0xf9   :  { %v389_v15 = vmul.f32 %v8377_v1, %v8336_v19  ;;  %608 = vperm.xlu1 %3994, %v5152_v25   ;;  %v1856_v59 = vmax.f32 %v5281_v50, 0.0  ;;  %v1730_v49 = vadd.f32 %v8379_v56, %v1338_v30  ;;  %v1727_v20 = vadd.f32 %v8380_v48, %v1335_v36  ;;  %v8384_v36 = vld [vmem:[#allocation115_spill] sm:$0xff]  ;;  %v5325_v48 = vpop.permute.xlu0 %1012 }
  0xfa   :  { %v1729_v11 = vadd.f32 %v8381_v17, %v1337_v31  ;;  %v1608_v0 = vmul.f32 %v4420_v26, %v5303_v22  ;;  %v1610_v23 = vmul.f32 %v8353_v46, %v5303_v22  ;;  %v1607_v19 = vmul.f32 %v8354_v10, %v5303_v22  ;;  %8385 = vst [vmem:[#allocation41_spill] sm:$0xff] %v5325_v48 }
  0xfb   :  { %v1609_v43 = vmul.f32 %v8355_v32, %v5303_v22  ;;  %v5319_v3 = vadd.f32 %v5122_v16, %v1380_v12  ;;  %v5321_v30 = vadd.f32 %v1646_v47, %v1382_v39  ;;  %v1379_v50 = vadd.f32 %v8384_v36, %v987_v28  ;;  %v8387_v12 = vld [vmem:[#allocation30_spill] sm:$0xff] }
  0xfc   :  { %v597_v31 = vadd.f32 %v8359_v55, %v389_v15  ;;  %v1736_v42 = vadd.f32 %v1608_v0, %v1344_v60  ;;  %v1738_v34 = vadd.f32 %v1610_v23, %v1346_v63  ;;  %v1735_v57 = vadd.f32 %v1607_v19, %v1343_v24  ;;  %v5339_v55 = vpop.permute.xlu1 %147 }
  0xfd   :  { %8382 = vst [vmem:[#allocation28_spill] sm:$0xff] %v5319_v3  ;;  %8383 = vst [vmem:[#allocation64_spill] sm:$0xff] %v5321_v30  ;;  %v1737_v56 = vadd.f32 %v1609_v43, %v1345_v51  ;;  %3996 = vset.pattern.permute.xlu1 %v8306_v13  ;;  %v5330_v17 = vmul.f32 %v8276_v41, %v5296_v14  ;;  %v5334_v16 = vmul.f32 %v8277_v40, %v5296_v14  ;;  %v8390_v43 = vld [vmem:[#allocation43_spill] sm:$0xff] }
  0xfe   :  { %v5336_v47 = vadd.f32 %v1643_v44, %v1379_v50  ;;  %v989_v15 = vadd.f32 %v8387_v12, %v597_v31  ;;  %8388 = vst [vmem:[#allocation114_spill] sm:$0xff] %v5339_v55  ;;  %1400 = vperm.xlu1 %3996, %v4815_v8   ;;  %v1864_v60 = vmax.f32 %v1736_v42, 0.0  ;;  %v1866_v63 = vmax.f32 %v1738_v34, 0.0  ;;  %v8389_v8 = vld [vmem:[#allocation116_spill] sm:$0xff]  ;;  %v8391_v50 = vld [vmem:[#allocation95_spill] sm:$0xff]  ;;  %v5370_v31 = vpop.permute.xlu0 %1004 }
  0xff   :  { %v1863_v24 = vmax.f32 %v1735_v57, 0.0  ;;  %v1865_v51 = vmax.f32 %v1737_v56, 0.0  ;;  %v5343_v39 = vadd.f32 %v5241_v2, %v336_v62  ;;  %v5346_v28 = vadd.f32 %v5241_v2, %v338_v45  ;;  %8392 = vst [vmem:[#allocation29_spill] sm:$0xff] %v5370_v31  ;;  %v8395_v34 = vld [vmem:[#allocation96_spill] sm:$0xff] }
 0x100   :  { %8386 = vst [vmem:[#allocation113_spill] sm:$0xff] %v5336_v47  ;;  %v5349_v0 = vadd.f32 %v5241_v2, %v335_v27  ;;  %v5352_v44 = vadd.f32 %v5241_v2, %v337_v35  ;;  %2033 = vmatprep.subr.mxu0 %v1864_v60  ;;  %2194 = vmatprep.subr.mxu1 %v1866_v63  ;;  %v1858_v23 = vmax.f32 %v1730_v49, 0.0  ;;  %v1855_v45 = vmax.f32 %v1727_v20, 0.0  ;;  %v5379_v56 = vpop.permute.xlu1 %636  ;;  %v8409_v63 = vld [vmem:[#allocation11_spill] sm:$0xff] }
 0x101   :  { %v1381_v19 = vadd.f32 %v8389_v8, %v989_v15  ;;  %v1645_v36 = vmul.f32 %v8390_v43, %v4773_v53  ;;  %v380_v62 = vmul.f32 %v8287_v6, %v8391_v50  ;;  %2034 = vmatpush1.msra.mxu0 %v1863_v24  ;;  %2195 = vmatpush1.msra.mxu1 %v1865_v51  ;;  %v1857_v53 = vmax.f32 %v1729_v11, 0.0  ;;  %v8401_v51 = vld [vmem:[#allocation94_spill] sm:$0xff]  ;;  %v8408_v24 = vld [vmem:[#allocation20_spill] sm:$0xff] }
 0x102   :  { %v5361_v27 = vmul.f32 %v8278_v18, %v5296_v14  ;;  %v5365_v35 = vmul.f32 %v8279_v52, %v5296_v14  ;;  %v382_v49 = vmul.f32 %v8291_v58, %v8391_v50  ;;  %3997 = vset.pattern.permute.xlu1 %v8357_v37  ;;  %2035 = vmatprep.subr.mxu0 %v1856_v59 }
 0x103   :  { %v5374_v20 = vmul.f32 %v8276_v41, %v5325_v48  ;;  %v5376_v42 = vadd.f32 %v1645_v36, %v1381_v19  ;;  %v588_v57 = vadd.f32 %v8395_v34, %v380_v62  ;;  %2196 = vmatprep.subr.mxu1 %v1858_v23  ;;  %8396 = vst [vmem:[#allocation68_spill] sm:$0xff] %v5379_v56  ;;  %v8402_v23 = vld [vmem:[#allocation8_spill] sm:$0xff]  ;;  %v8403_v19 = vld [vmem:[#allocation103_spill] sm:$0xff] }
 0x104   :  { %1000 = vperm.xlu1 %3997, %v5152_v25   ;;  %v5384_v37 = vmul.f32 %v8277_v40, %v5325_v48  ;;  %v590_v11 = vadd.f32 %v8395_v34, %v382_v49  ;;  %v379_v12 = vmul.f32 %v8360_v29, %v8391_v50  ;;  %2036 = vmatpush1.msra.mxu0 %v1855_v45  ;;  %v8404_v62 = vld [vmem:[#allocation104_spill] sm:$0xff]  ;;  %v8405_v45 = vld [vmem:[#allocation9_spill] sm:$0xff]  ;;  %v8453_v29 = vld [vmem:[#allocation63_spill] sm:$0xff] }
 0x105   :  { %8393 = vst [vmem:[#allocation65_spill] sm:$0xff] %v5374_v20  ;;  %8394 = vst [vmem:[#allocation66_spill] sm:$0xff] %v5376_v42  ;;  %2197 = vmatpush1.msra.mxu1 %v1857_v53  ;;  %v5392_v15 = vmul.f32 %v8278_v18, %v5325_v48  ;;  %v5396_v60 = vmul.f32 %v8279_v52, %v5325_v48  ;;  %v1244_v8 = vmul.f32 %v8402_v23, %v8401_v51  ;;  %v5424_v42 = vpop.permute.xlu1 %1032 }
 0x106   :  { %8397 = vst [vmem:[#allocation115_spill] sm:$0xff] %v5384_v37  ;;  %v980_v36 = vadd.f32 %v8403_v19, %v588_v57  ;;  %v982_v49 = vadd.f32 %v8404_v62, %v590_v11  ;;  %v1246_v53 = vmul.f32 %v8405_v45, %v8401_v51  ;;  %v587_v59 = vadd.f32 %v8395_v34, %v379_v12  ;;  %v8411_v62 = vld [vmem:[#allocation106_spill] sm:$0xff] }
 0x107   :  { %8398 = vst [vmem:[#allocation30_spill] sm:$0xff] %v5392_v15  ;;  %8399 = vst [vmem:[#allocation116_spill] sm:$0xff] %v5396_v60  ;;  %v5408_v33 = vmul.f32 %v8276_v41, %v5370_v31  ;;  %v5412_v48 = vmul.f32 %v8277_v40, %v5370_v31  ;;  %v1636_v14 = vmul.f32 %v8409_v63, %v8408_v24 }
 0x108   :  { %v1638_v57 = vmul.f32 %v8371_v4, %v8408_v24  ;;  %3998 = vset.pattern.permute.xlu1 %v8306_v13  ;;  %v5421_v11 = vmul.f32 %v8278_v18, %v5370_v31  ;;  %v1372_v12 = vadd.f32 %v1244_v8, %v980_v36  ;;  %v1374_v19 = vadd.f32 %v1246_v53, %v982_v49  ;;  %v8415_v13 = vld [vmem:[#allocation42_spill] sm:$0xff]  ;;  %v8418_v53 = vld [vmem:[#allocation23_spill] sm:$0xff] }
 0x109   :  { %8406 = vst [vmem:[#allocation95_spill] sm:$0xff] %v5408_v33  ;;  %8407 = vst [vmem:[#allocation96_spill] sm:$0xff] %v5412_v48  ;;  %v979_v33 = vadd.f32 %v8411_v62, %v587_v59  ;;  %1392 = vperm.xlu1 %3998, %v5152_v25   ;;  %v5427_v48 = vpop.permute.xlu0 %1404  ;;  %v5431_v2 = vmul.f32 %v8279_v52, %v5370_v31  ;;  %v1243_v60 = vmul.f32 %v8415_v13, %v8401_v51  ;;  %v8416_v59 = vld [vmem:[#allocation19_spill] sm:$0xff]  ;;  %v8417_v25 = vld [vmem:[#allocation21_spill] sm:$0xff] }
 0x10a   :  { %8410 = vst [vmem:[#allocation94_spill] sm:$0xff] %v5421_v11  ;;  %8412 = vst [vmem:[#allocation8_spill] sm:$0xff] %v5424_v42  ;;  %v1635_v11 = vmul.f32 %v8372_v54, %v8408_v24  ;;  %v381_v8 = vmul.f32 %v8377_v1, %v8391_v50  ;;  %v808_v36 = vmul.f32 %v8416_v59, %v5273_v5 }
 0x10b   :  { %8413 = vst [vmem:[#allocation103_spill] sm:$0xff] %v5427_v48  ;;  %8414 = vst [vmem:[#allocation104_spill] sm:$0xff] %v5431_v2  ;;  %v810_v49 = vmul.f32 %v8417_v25, %v5273_v5  ;;  %v807_v62 = vmul.f32 %v8418_v53, %v5273_v5  ;;  %v809_v31 = vmul.f32 %v4398_v7, %v5273_v5 }
 0x10c   :  { %v5447_v2 = vadd.f32 %v1636_v14, %v1372_v12  ;;  %v5449_v15 = vadd.f32 %v1638_v57, %v1374_v19  ;;  %v1371_v37 = vadd.f32 %v1243_v60, %v979_v33  ;;  %v589_v20 = vadd.f32 %v8395_v34, %v381_v8  ;;  %v8427_v34 = vld [vmem:[#allocation48_spill] sm:$0xff]  ;;  %v5477_v19 = vpop.permute.xlu1 %142 }
 0x10d   :  { %v5454_v50 = vmul.f32 %v4420_v26, %v5427_v48  ;;  %v5458_v1 = vmul.f32 %v8353_v46, %v5427_v48  ;;  %v5462_v47 = vmul.f32 %v8354_v10, %v5427_v48  ;;  %v5466_v14 = vmul.f32 %v8355_v32, %v5427_v48  ;;  %v5468_v57 = vpop.permute.xlu0 %1396  ;;  %3999 = vset.pattern.permute.xlu1 %v8205_v61  ;;  %v8436_v48 = vld [vmem:[#allocation15_spill] sm:$0xff] }
 0x10e   :  { %8419 = vst [vmem:[#allocation9_spill] sm:$0xff] %v5447_v2  ;;  %8420 = vst [vmem:[#allocation20_spill] sm:$0xff] %v5449_v15  ;;  %v5470_v33 = vadd.f32 %v1635_v11, %v1371_v37  ;;  %v1245_v60 = vmul.f32 %v8427_v34, %v8401_v51  ;;  %v1637_v12 = vmul.f32 %v8390_v43, %v8408_v24  ;;  %v8011_v8 = vmov 0.0   ;;  %v8430_v2 = vld [vmem:[#allocation107_spill] sm:$0xff]  ;;  %v8431_v11 = vld [vmem:[#allocation88_spill] sm:$0xff] }
 0x10f   :  { %8421 = vst [vmem:[#allocation11_spill] sm:$0xff] %v5454_v50  ;;  %8422 = vst [vmem:[#allocation106_spill] sm:$0xff] %v5458_v1  ;;  %2087 = vmatprep.mubr.f32.mxu0 %v8011_v8  ;;  %2248 = vmatprep.mubr.f32.mxu1 %v8011_v8  ;;  %v981_v37 = vadd.f32 %v8430_v2, %v589_v20  ;;  %v8433_v51 = vld [vmem:[#allocation54_spill] sm:$0xff]  ;;  %v936_v24 = vadd.f32 %v808_v36, %v5343_v39  ;;  %v8435_v2 = vld [vmem:[#allocation44_spill] sm:$0xff] }
 0x110   :  { %8423 = vst [vmem:[#allocation125_spill] sm:$0xff] %v5462_v47  ;;  %8424 = vst [vmem:[#allocation126_spill] sm:$0xff] %v5466_v14  ;;  %v1236_v47 = vmul.f32 %v8402_v23, %v8433_v51  ;;  %v938_v61 = vadd.f32 %v810_v49, %v5346_v28  ;;  %v935_v1 = vadd.f32 %v807_v62, %v5349_v0  ;;  %v8438_v39 = vld [vmem:[#allocation89_spill] sm:$0xff]  ;;  %v5508_v36 = vpop.permute.xlu1 %431 }
 0x111   :  { %8425 = vst [vmem:[#allocation127_spill] sm:$0xff] %v5468_v57  ;;  %8426 = vst [vmem:[#allocation128_spill] sm:$0xff] %v5470_v33  ;;  %v8432_v33 = vld [vmem:[#allocation91_spill] sm:$0xff]  ;;  %v937_v5 = vadd.f32 %v809_v31, %v5352_v44  ;;  %v5493_v8 = vmul.f32 %v4420_v26, %v5468_v57  ;;  %v1373_v15 = vadd.f32 %v1245_v60, %v981_v37  ;;  %v8439_v44 = vld [vmem:[#allocation90_spill] sm:$0xff] }
 0x112   :  { %8428 = vst [vmem:[#allocation129_spill] sm:$0xff] %v5477_v19  ;;  %v580_v14 = vadd.f32 %v8432_v33, %v8431_v11  ;;  %v1628_v11 = vmul.f32 %v8409_v63, %v8436_v48  ;;  %v5500_v50 = vmul.f32 %v8353_v46, %v5468_v57  ;;  %v582_v28 = vadd.f32 %v8432_v33, %v8438_v39 }
 0x113   :  { %8434 = vst [vmem:[#allocation107_spill] sm:$0xff] %v5493_v8  ;;  %v1238_v0 = vmul.f32 %v8405_v45, %v8433_v51  ;;  %v579_v31 = vadd.f32 %v8432_v33, %v8439_v44  ;;  %8440 = vst [vmem:[#allocation91_spill] sm:$0xff] %v5508_v36  ;;  %v5512_v49 = vmul.f32 %v8354_v10, %v5468_v57 }
 0x114   :  { %v972_v20 = vadd.f32 %v8435_v2, %v580_v14  ;;  %8437 = vst [vmem:[#allocation88_spill] sm:$0xff] %v5500_v50  ;;  %v5514_v62 = vadd.f32 %v1637_v12, %v1373_v15  ;;  %v1235_v60 = vmul.f32 %v8415_v13, %v8433_v51  ;;  %v320_v37 = vmul.f32 %v4410_v21, %v5339_v55  ;;  %v8445_v12 = vld [vmem:[#allocation45_spill] sm:$0xff] }
 0x115   :  { %8441 = vst [vmem:[#allocation54_spill] sm:$0xff] %v5512_v49  ;;  %v322_v2 = vmul.f32 %v4413_v9, %v5339_v55  ;;  %v319_v39 = vmul.f32 %v4432_v38, %v5339_v55  ;;  %v5526_v44 = vmul.f32 %v8355_v32, %v5468_v57  ;;  %v800_v15 = vmul.f32 %v8416_v59, %v5379_v56  ;;  %v8454_v38 = vld [vmem:[#allocation109_spill] sm:$0xff] }
 0x116   :  { %8442 = vst [vmem:[#allocation44_spill] sm:$0xff] %v5514_v62  ;;  %v1364_v14 = vadd.f32 %v1236_v47, %v972_v20  ;;  %v974_v20 = vadd.f32 %v8445_v12, %v582_v28  ;;  %v8446_v62 = vld [vmem:[#allocation49_spill] sm:$0xff]  ;;  %v1200_v50 = vmul.f32 %v8276_v41, %v5424_v42  ;;  %v802_v8 = vmul.f32 %v8417_v25, %v5379_v56 }
 0x117   :  { %8443 = vst [vmem:[#allocation15_spill] sm:$0xff] %v5526_v44  ;;  %v971_v49 = vadd.f32 %v8446_v62, %v579_v31  ;;  %v799_v30 = vmul.f32 %v8418_v53, %v5379_v56  ;;  %v801_v57 = vmul.f32 %v4398_v7, %v5379_v56  ;;  %v5545_v31 = vpop.permute.xlu1 %1028  ;;  %v1199_v62 = vmul.f32 %v8278_v18, %v5424_v42  ;;  %v8448_v56 = vld [vmem:[#allocation39_spill] sm:$0xff] }
 0x118   :  { %v5530_v47 = vadd.f32 %v1628_v11, %v1364_v14  ;;  %v1202_v11 = vmul.f32 %v8277_v40, %v5424_v42  ;;  %v528_v14 = vadd.f32 %v5508_v36, %v320_v37  ;;  %v1366_v28 = vadd.f32 %v1238_v0, %v974_v20  ;;  %8447 = vst [vmem:[#allocation90_spill] sm:$0xff] %v5545_v31  ;;  %v8450_v20 = vld [vmem:[#allocation62_spill] sm:$0xff] }
 0x119   :  { %v1363_v12 = vadd.f32 %v1235_v60, %v971_v49  ;;  %v530_v44 = vadd.f32 %v5508_v36, %v322_v2  ;;  %v527_v53 = vadd.f32 %v5508_v36, %v319_v39  ;;  %v321_v7 = vmul.f32 %v8448_v56, %v5339_v55  ;;  %v8449_v49 = vld [vmem:[#allocation92_spill] sm:$0xff]  ;;  %v8452_v2 = vld [vmem:[#allocation71_spill] sm:$0xff] }
 0x11a   :  { %8444 = vst [vmem:[#allocation89_spill] sm:$0xff] %v5530_v47  ;;  %v1201_v47 = vmul.f32 %v8279_v52, %v5424_v42  ;;  %v1630_v37 = vmul.f32 %v8371_v4, %v8436_v48  ;;  %v1627_v0 = vmul.f32 %v8372_v54, %v8436_v48  ;;  %v581_v60 = vadd.f32 %v8432_v33, %v8449_v49  ;;  %v8451_v42 = vld [vmem:[#allocation52_spill] sm:$0xff]  ;;  %v8455_v49 = vld [vmem:[#allocation110_spill] sm:$0xff] }
 0x11b   :  { %v5562_v25 = vadd.f32 %v800_v15, %v8450_v20  ;;  %v5565_v59 = vadd.f32 %v802_v8, %v8451_v42  ;;  %v5568_v39 = vadd.f32 %v799_v30, %v8452_v2  ;;  %v5571_v55 = vadd.f32 %v801_v57, %v8453_v29  ;;  %v8456_v20 = vld [vmem:[#allocation111_spill] sm:$0xff]  ;;  %v5577_v42 = vpop.permute.xlu1 %1424  ;;  %v8460_v29 = vld [vmem:[#allocation50_spill] sm:$0xff] }
 0x11c   :  { %v1328_v58 = vadd.f32 %v1200_v50, %v936_v24  ;;  %v1330_v56 = vadd.f32 %v1202_v11, %v938_v61  ;;  %v920_v9 = vadd.f32 %v8454_v38, %v528_v14  ;;  %v529_v21 = vadd.f32 %v5508_v36, %v321_v7  ;;  %8457 = vst [vmem:[#allocation45_spill] sm:$0xff] %v5577_v42  ;;  %v8461_v24 = vld [vmem:[#allocation112_spill] sm:$0xff]  ;;  %v8466_v2 = vld [vmem:[#allocation6_spill] sm:$0xff] }
 0x11d   :  { %v1327_v19 = vadd.f32 %v1199_v62, %v935_v1  ;;  %v1329_v33 = vadd.f32 %v1201_v47, %v937_v5  ;;  %v922_v15 = vadd.f32 %v8455_v49, %v530_v44  ;;  %v919_v22 = vadd.f32 %v8456_v20, %v527_v53  ;;  %v8463_v62 = vld [vmem:[#allocation75_spill] sm:$0xff]  ;;  %v8467_v20 = vld [vmem:[#allocation82_spill] sm:$0xff] }
 0x11e   :  { %v5579_v8 = vadd.f32 %v1630_v37, %v1366_v28  ;;  %v5581_v30 = vadd.f32 %v1627_v0, %v1363_v12  ;;  %v973_v57 = vadd.f32 %v8460_v29, %v581_v60  ;;  %v1237_v50 = vmul.f32 %v8427_v34, %v8433_v51  ;;  %v8464_v37 = vld [vmem:[#allocation97_spill] sm:$0xff]  ;;  %v8465_v60 = vld [vmem:[#allocation108_spill] sm:$0xff] }
 0x11f   :  { %v1592_v7 = vmul.f32 %v4420_v26, %v5577_v42  ;;  %v1594_v38 = vmul.f32 %v8353_v46, %v5577_v42  ;;  %v1591_v1 = vmul.f32 %v8354_v10, %v5577_v42  ;;  %v1593_v5 = vmul.f32 %v8355_v32, %v5577_v42 }
 0x120   :  { %8458 = vst [vmem:[#allocation49_spill] sm:$0xff] %v5579_v8  ;;  %8459 = vst [vmem:[#allocation92_spill] sm:$0xff] %v5581_v30  ;;  %v1312_v53 = vadd.f32 %v5330_v17, %v920_v9  ;;  %v921_v61 = vadd.f32 %v8461_v24, %v529_v21  ;;  %v1365_v44 = vadd.f32 %v1237_v50, %v973_v57  ;;  %v5606_v21 = vpop.permute.xlu1 %426 }
 0x121   :  { %v1629_v51 = vmul.f32 %v8390_v43, %v8436_v48  ;;  %v1720_v47 = vadd.f32 %v1592_v7, %v1328_v58  ;;  %v1722_v11 = vadd.f32 %v1594_v38, %v1330_v56  ;;  %v1719_v14 = vadd.f32 %v1591_v1, %v1327_v19  ;;  %8468 = vst [vmem:[#allocation52_spill] sm:$0xff] %v5606_v21  ;;  %v8479_v38 = vld [vmem:[#allocation84_spill] sm:$0xff] }
 0x122   :  { %v1721_v28 = vadd.f32 %v1593_v5, %v1329_v33  ;;  %v572_v0 = vadd.f32 %v8464_v37, %v8463_v62  ;;  %v836_v49 = vmul.f32 %v8466_v2, %v8465_v60  ;;  %v1228_v9 = vmul.f32 %v8402_v23, %v8467_v20  ;;  %v8470_v5 = vld [vmem:[#allocation57_spill] sm:$0xff] }
 0x123   :  { %v5598_v12 = vadd.f32 %v1629_v51, %v1365_v44  ;;  %v1848_v17 = vmax.f32 %v1720_v47, 0.0  ;;  %v1850_v29 = vmax.f32 %v1722_v11, 0.0  ;;  %v1847_v48 = vmax.f32 %v1719_v14, 0.0  ;;  %v8471_v51 = vld [vmem:[#allocation76_spill] sm:$0xff]  ;;  %v8473_v14 = vld [vmem:[#allocation86_spill] sm:$0xff]  ;;  %v8474_v62 = vld [vmem:[#allocation25_spill] sm:$0xff] }
 0x124   :  { %v1849_v58 = vmax.f32 %v1721_v28, 0.0  ;;  %v1192_v56 = vmul.f32 %v8276_v41, %v5545_v31  ;;  %v1194_v19 = vmul.f32 %v8277_v40, %v5545_v31  ;;  %v1314_v33 = vadd.f32 %v5334_v16, %v922_v15  ;;  %v8478_v44 = vld [vmem:[#allocation83_spill] sm:$0xff] }
 0x125   :  { %8462 = vst [vmem:[#allocation62_spill] sm:$0xff] %v5598_v12  ;;  %v1311_v57 = vadd.f32 %v5361_v27, %v919_v22  ;;  %2037 = vmatprep.subr.mxu0 %v1848_v17  ;;  %2198 = vmatprep.subr.mxu1 %v1850_v29  ;;  %v1191_v50 = vmul.f32 %v8278_v18, %v5545_v31  ;;  %v8472_v22 = vld [vmem:[#allocation7_spill] sm:$0xff] }
 0x126   :  { %v964_v1 = vadd.f32 %v836_v49, %v572_v0  ;;  %v1620_v24 = vmul.f32 %v8409_v63, %v8470_v5  ;;  %2038 = vmatpush1.msra.mxu0 %v1847_v48  ;;  %2199 = vmatpush1.msra.mxu1 %v1849_v58  ;;  %v574_v16 = vadd.f32 %v8464_v37, %v8471_v51  ;;  %v5632_v49 = vpop.permute.xlu1 %628  ;;  %v8476_v48 = vld [vmem:[#allocation121_spill] sm:$0xff] }
 0x127   :  { %v838_v27 = vmul.f32 %v8472_v22, %v8465_v60  ;;  %v1230_v15 = vmul.f32 %v8405_v45, %v8467_v20  ;;  %v1622_v11 = vmul.f32 %v8371_v4, %v8470_v5  ;;  %v571_v28 = vadd.f32 %v8464_v37, %v8473_v14  ;;  %8475 = vst [vmem:[#allocation71_spill] sm:$0xff] %v5632_v49 }
 0x128   :  { %v1356_v47 = vadd.f32 %v1228_v9, %v964_v1  ;;  %v835_v0 = vmul.f32 %v8474_v62, %v8465_v60  ;;  %v1227_v29 = vmul.f32 %v8415_v13, %v8467_v20  ;;  %v573_v58 = vadd.f32 %v8464_v37, %v8476_v48  ;;  %v8477_v9 = vld [vmem:[#allocation26_spill] sm:$0xff]  ;;  %v8481_v48 = vld [vmem:[#allocation85_spill] sm:$0xff] }
 0x129   :  { %v966_v17 = vadd.f32 %v838_v27, %v574_v16  ;;  %v837_v1 = vmul.f32 %v8477_v9, %v8465_v60  ;;  %v1193_v51 = vmul.f32 %v8279_v52, %v5545_v31  ;;  %v1704_v14 = vadd.f32 %v8478_v44, %v1312_v53 }
 0x12a   :  { %v1706_v3 = vadd.f32 %v8479_v38, %v1314_v33  ;;  %v1313_v7 = vadd.f32 %v5365_v35, %v921_v61  ;;  %v5645_v12 = vadd.f32 %v1620_v24, %v1356_v47  ;;  %v963_v27 = vadd.f32 %v835_v0, %v571_v28  ;;  %v5657_v61 = vpop.permute.xlu1 %1420 }
 0x12b   :  { %v1358_v16 = vadd.f32 %v1230_v15, %v966_v17  ;;  %v965_v30 = vadd.f32 %v837_v1, %v573_v58  ;;  %v1320_v8 = vadd.f32 %v1192_v56, %v5562_v25  ;;  %v1322_v37 = vadd.f32 %v1194_v19, %v5565_v59  ;;  %8483 = vst [vmem:[#allocation110_spill] sm:$0xff] %v5657_v61  ;;  %v8484_v25 = vld [vmem:[#allocation98_spill] sm:$0xff]  ;;  %v8485_v19 = vld [vmem:[#allocation79_spill] sm:$0xff]  ;;  %v8487_v15 = vld [vmem:[#allocation105_spill] sm:$0xff] }
 0x12c   :  { %8480 = vst [vmem:[#allocation63_spill] sm:$0xff] %v5645_v12  ;;  %v1703_v60 = vadd.f32 %v8481_v48, %v1311_v57  ;;  %v1619_v36 = vmul.f32 %v8372_v54, %v8470_v5  ;;  %v1319_v53 = vadd.f32 %v1191_v50, %v5568_v39  ;;  %v1355_v33 = vadd.f32 %v1227_v29, %v963_v27  ;;  %v8489_v1 = vld [vmem:[#allocation87_spill] sm:$0xff]  ;;  %v8494_v12 = vld [vmem:[#allocation33_spill] sm:$0xff] }
 0x12d   :  { %v5653_v44 = vadd.f32 %v1622_v11, %v1358_v16  ;;  %v1229_v35 = vmul.f32 %v8427_v34, %v8467_v20  ;;  %v1321_v38 = vadd.f32 %v1193_v51, %v5571_v55  ;;  %v1621_v59 = vmul.f32 %v8390_v43, %v8470_v5  ;;  %v8488_v11 = vld [vmem:[#allocation55_spill] sm:$0xff] }
 0x12e   :  { %v356_v56 = vmul.f32 %v8287_v6, %v8484_v25  ;;  %v828_v57 = vmul.f32 %v8466_v2, %v8485_v19  ;;  %v1584_v39 = vmul.f32 %v4420_v26, %v5657_v61  ;;  %v1586_v50 = vmul.f32 %v8353_v46, %v5657_v61  ;;  %v8491_v48 = vld [vmem:[#allocation27_spill] sm:$0xff] }
 0x12f   :  { %8482 = vst [vmem:[#allocation109_spill] sm:$0xff] %v5653_v44  ;;  %v1583_v20 = vmul.f32 %v8354_v10, %v5657_v61  ;;  %v1585_v55 = vmul.f32 %v8355_v32, %v5657_v61  ;;  %v5674_v24 = vadd.f32 %v1619_v36, %v1355_v33  ;;  %v1357_v5 = vadd.f32 %v1229_v35, %v965_v30  ;;  %v5684_v36 = vpop.permute.xlu1 %132 }
 0x130   :  { %v564_v47 = vadd.f32 %v8487_v15, %v356_v56  ;;  %v1220_v28 = vmul.f32 %v8402_v23, %v8488_v11  ;;  %v1712_v0 = vadd.f32 %v1584_v39, %v1320_v8  ;;  %v1714_v17 = vadd.f32 %v1586_v50, %v1322_v37  ;;  %8492 = vst [vmem:[#allocation112_spill] sm:$0xff] %v5684_v36  ;;  %v8495_v37 = vld [vmem:[#allocation34_spill] sm:$0xff] }
 0x131   :  { %8486 = vst [vmem:[#allocation111_spill] sm:$0xff] %v5674_v24  ;;  %v1711_v29 = vadd.f32 %v1583_v20, %v1319_v53  ;;  %v1713_v58 = vadd.f32 %v1585_v55, %v1321_v38  ;;  %v1705_v51 = vadd.f32 %v8489_v1, %v1313_v7  ;;  %v5680_v16 = vadd.f32 %v1621_v59, %v1357_v5  ;;  %v8493_v24 = vld [vmem:[#allocation129_spill] sm:$0xff]  ;;  %v8496_v7 = vld [vmem:[#allocation38_spill] sm:$0xff]  ;;  %v8497_v59 = vld [vmem:[#allocation39_spill] sm:$0xff] }
 0x132   :  { %v956_v27 = vadd.f32 %v828_v57, %v564_v47  ;;  %v1612_v44 = vmul.f32 %v8409_v63, %v8491_v48  ;;  %v1840_v30 = vmax.f32 %v1712_v0, 0.0  ;;  %v1842_v33 = vmax.f32 %v1714_v17, 0.0  ;;  %v8498_v55 = vld [vmem:[#allocation10_spill] sm:$0xff] }
 0x133   :  { %8490 = vst [vmem:[#allocation50_spill] sm:$0xff] %v5680_v16  ;;  %v1839_v35 = vmax.f32 %v1711_v29, 0.0  ;;  %v1841_v56 = vmax.f32 %v1713_v58, 0.0  ;;  %v312_v8 = vmul.f32 %v8494_v12, %v8493_v24  ;;  %v314_v53 = vmul.f32 %v8495_v37, %v8493_v24  ;;  %v8499_v29 = vld [vmem:[#allocation47_spill] sm:$0xff] }
 0x134   :  { %v311_v38 = vmul.f32 %v8496_v7, %v8493_v24  ;;  %v313_v57 = vmul.f32 %v8497_v59, %v8493_v24  ;;  %2039 = vmatprep.subr.mxu0 %v1840_v30  ;;  %2200 = vmatprep.subr.mxu1 %v1842_v33  ;;  %v1832_v39 = vmax.f32 %v1704_v14, 0.0  ;;  %v1834_v50 = vmax.f32 %v1706_v3, 0.0 }
 0x135   :  { %v1348_v20 = vadd.f32 %v1220_v28, %v956_v27  ;;  %v358_v5 = vmul.f32 %v8498_v55, %v8484_v25  ;;  %2040 = vmatpush1.msra.mxu0 %v1839_v35  ;;  %2201 = vmatpush1.msra.mxu1 %v1841_v56  ;;  %v1831_v47 = vmax.f32 %v1703_v60, 0.0  ;;  %v1833_v0 = vmax.f32 %v1705_v51, 0.0  ;;  %v5706_v27 = vpop.permute.xlu1 %624 }
 0x136   :  { %v830_v17 = vmul.f32 %v8472_v22, %v8485_v19  ;;  %v355_v58 = vmul.f32 %v8499_v29, %v8484_v25  ;;  %2041 = vmatprep.subr.mxu0 %v1832_v39  ;;  %2202 = vmatprep.subr.mxu1 %v1834_v50  ;;  %v827_v28 = vmul.f32 %v8474_v62, %v8485_v19  ;;  %v8504_v39 = vld [vmem:[#allocation19_spill] sm:$0xff] }
 0x137   :  { %v5701_v14 = vadd.f32 %v1612_v44, %v1348_v20  ;;  %v566_v3 = vadd.f32 %v8487_v15, %v358_v5  ;;  %8502 = vst [vmem:[#allocation97_spill] sm:$0xff] %v5706_v27  ;;  %2042 = vmatpush1.msra.mxu0 %v1831_v47  ;;  %2203 = vmatpush1.msra.mxu1 %v1833_v0  ;;  %v8505_v5 = vld [vmem:[#allocation21_spill] sm:$0xff]  ;;  %v8506_v0 = vld [vmem:[#allocation23_spill] sm:$0xff] }
 0x138   :  { %v1222_v33 = vmul.f32 %v8405_v45, %v8488_v11  ;;  %v563_v35 = vadd.f32 %v8487_v15, %v355_v58  ;;  %v1219_v44 = vmul.f32 %v8415_v13, %v8488_v11  ;;  %v520_v56 = vadd.f32 %v5606_v21, %v312_v8  ;;  %v8507_v58 = vld [vmem:[#allocation51_spill] sm:$0xff] }
 0x139   :  { %8501 = vst [vmem:[#allocation75_spill] sm:$0xff] %v5701_v14  ;;  %v784_v50 = vmul.f32 %v8504_v39, %v5632_v49  ;;  %v522_v20 = vadd.f32 %v5606_v21, %v314_v53  ;;  %v786_v47 = vmul.f32 %v8505_v5, %v5632_v49  ;;  %v783_v51 = vmul.f32 %v8506_v0, %v5632_v49  ;;  %v8508_v8 = vld [vmem:[#allocation31_spill] sm:$0xff] }
 0x13a   :  { %v958_v30 = vadd.f32 %v830_v17, %v566_v3  ;;  %v955_v60 = vadd.f32 %v827_v28, %v563_v35  ;;  %v357_v14 = vmul.f32 %v8507_v58, %v8484_v25  ;;  %v519_v16 = vadd.f32 %v5606_v21, %v311_v38  ;;  %v5734_v3 = vpop.permute.xlu1 %1020  ;;  %v8510_v28 = vld [vmem:[#allocation77_spill] sm:$0xff] }
 0x13b   :  { %v785_v1 = vmul.f32 %v8508_v8, %v5632_v49  ;;  %v1614_v24 = vmul.f32 %v8371_v4, %v8491_v48  ;;  %v1611_v53 = vmul.f32 %v8372_v54, %v8491_v48  ;;  %v829_v17 = vmul.f32 %v8477_v9, %v8485_v19  ;;  %8509 = vst [vmem:[#allocation108_spill] sm:$0xff] %v5734_v3  ;;  %v8511_v49 = vld [vmem:[#allocation46_spill] sm:$0xff] }
 0x13c   :  { %v1350_v61 = vadd.f32 %v1222_v33, %v958_v30  ;;  %v1347_v31 = vadd.f32 %v1219_v44, %v955_v60  ;;  %v565_v42 = vadd.f32 %v8487_v15, %v357_v14  ;;  %v521_v25 = vadd.f32 %v5606_v21, %v313_v57  ;;  %v8514_v44 = vld [vmem:[#allocation58_spill] sm:$0xff] }
 0x13d   :  { %v1221_v38 = vmul.f32 %v8427_v34, %v8488_v11  ;;  %v348_v35 = vmul.f32 %v8287_v6, %v8510_v28  ;;  %v820_v32 = vmul.f32 %v8466_v2, %v8511_v49  ;;  %v912_v30 = vadd.f32 %v784_v50, %v520_v56  ;;  %v8517_v50 = vld [vmem:[#allocation16_spill] sm:$0xff] }
 0x13e   :  { %v914_v60 = vadd.f32 %v786_v47, %v522_v20  ;;  %v911_v33 = vadd.f32 %v783_v51, %v519_v16  ;;  %v776_v15 = vmul.f32 %v8504_v39, %v5706_v27  ;;  %v5745_v19 = vadd.f32 %v1614_v24, %v1350_v61  ;;  %v5760_v24 = vpop.permute.xlu1 %127 }
 0x13f   :  { %v5747_v14 = vadd.f32 %v1611_v53, %v1347_v31  ;;  %v957_v57 = vadd.f32 %v829_v17, %v565_v42  ;;  %v556_v21 = vadd.f32 %v8514_v44, %v348_v35  ;;  %v913_v11 = vadd.f32 %v785_v1, %v521_v25  ;;  %8515 = vst [vmem:[#allocation76_spill] sm:$0xff] %v5760_v24  ;;  %v8516_v1 = vld [vmem:[#allocation56_spill] sm:$0xff]  ;;  %v8518_v53 = vld [vmem:[#allocation93_spill] sm:$0xff] }
 0x140   :  { %8512 = vst [vmem:[#allocation82_spill] sm:$0xff] %v5745_v19  ;;  %v296_v6 = vmul.f32 %v8494_v12, %v5684_v36  ;;  %v298_v2 = vmul.f32 %v8495_v37, %v5684_v36  ;;  %v1613_v16 = vmul.f32 %v8390_v43, %v8491_v48  ;;  %v295_v51 = vmul.f32 %v8496_v7, %v5684_v36 }
 0x141   :  { %8513 = vst [vmem:[#allocation57_spill] sm:$0xff] %v5747_v14  ;;  %v297_v31 = vmul.f32 %v8497_v59, %v5684_v36  ;;  %v1349_v61 = vadd.f32 %v1221_v38, %v957_v57  ;;  %v948_v42 = vadd.f32 %v820_v32, %v556_v21  ;;  %v1212_v56 = vmul.f32 %v8402_v23, %v8516_v1 }
 0x142   :  { %v1604_v20 = vmul.f32 %v8409_v63, %v8517_v50  ;;  %v350_v47 = vmul.f32 %v8498_v55, %v8510_v28  ;;  %v822_v48 = vmul.f32 %v8472_v22, %v8511_v49  ;;  %v5771_v17 = vadd.f32 %v776_v15, %v8518_v53 }
 0x143   :  { %v778_v32 = vmul.f32 %v8505_v5, %v5706_v27  ;;  %v775_v21 = vmul.f32 %v8506_v0, %v5706_v27  ;;  %v777_v25 = vmul.f32 %v8508_v8, %v5706_v27  ;;  %v5779_v38 = vadd.f32 %v1613_v16, %v1349_v61  ;;  %v5792_v16 = vpop.permute.xlu1 %416 }
 0x144   :  { %v1340_v35 = vadd.f32 %v1212_v56, %v948_v42  ;;  %v558_v57 = vadd.f32 %v8514_v44, %v350_v47  ;;  %v1214_v36 = vmul.f32 %v8405_v45, %v8516_v1  ;;  %v1176_v15 = vmul.f32 %v8276_v41, %v5734_v3  ;;  %8520 = vst [vmem:[#allocation86_spill] sm:$0xff] %v5792_v16 }
 0x145   :  { %8519 = vst [vmem:[#allocation7_spill] sm:$0xff] %v5779_v38  ;;  %v1178_v53 = vmul.f32 %v8277_v40, %v5734_v3  ;;  %v1175_v14 = vmul.f32 %v8278_v18, %v5734_v3  ;;  %v1606_v19 = vmul.f32 %v8371_v4, %v8517_v50  ;;  %v347_v56 = vmul.f32 %v8499_v29, %v8510_v28 }
 0x146   :  { %v5794_v61 = vadd.f32 %v1604_v20, %v1340_v35  ;;  %v950_v42 = vadd.f32 %v822_v48, %v558_v57  ;;  %v819_v47 = vmul.f32 %v8474_v62, %v8511_v49  ;;  %v504_v38 = vadd.f32 %v5792_v16, %v296_v6  ;;  %v8522_v20 = vld [vmem:[#allocation122_spill] sm:$0xff]  ;;  %v8524_v62 = vld [vmem:[#allocation124_spill] sm:$0xff] }
 0x147   :  { %v506_v27 = vadd.f32 %v5792_v16, %v298_v2  ;;  %v503_v8 = vadd.f32 %v5792_v16, %v295_v51  ;;  %v505_v0 = vadd.f32 %v5792_v16, %v297_v31  ;;  %v1177_v5 = vmul.f32 %v8279_v52, %v5734_v3  ;;  %v8525_v2 = vld [vmem:[#allocation118_spill] sm:$0xff]  ;;  %v8526_v31 = vld [vmem:[#allocation119_spill] sm:$0xff]  ;;  %v8527_v3 = vld [vmem:[#allocation120_spill] sm:$0xff] }
 0x148   :  { %8521 = vst [vmem:[#allocation121_spill] sm:$0xff] %v5794_v61  ;;  %v5807_v35 = vadd.f32 %v778_v32, %v8522_v20  ;;  %v1342_v48 = vadd.f32 %v1214_v36, %v950_v42  ;;  %v555_v57 = vadd.f32 %v8514_v44, %v347_v56  ;;  %v8523_v61 = vld [vmem:[#allocation123_spill] sm:$0xff]  ;;  %v5814_v6 = vadd.f32 %v777_v25, %v8524_v62  ;;  %v5823_v42 = vpop.permute.xlu1 %1016  ;;  %v8530_v20 = vld [vmem:[#allocation78_spill] sm:$0xff] }
 0x149   :  { %v5811_v39 = vadd.f32 %v775_v21, %v8523_v61  ;;  %v896_v29 = vadd.f32 %v8525_v2, %v504_v38  ;;  %v349_v51 = vmul.f32 %v8507_v58, %v8510_v28  ;;  %v898_v16 = vadd.f32 %v8526_v31, %v506_v27  ;;  %8529 = vst [vmem:[#allocation83_spill] sm:$0xff] %v5823_v42 }
 0x14a   :  { %v895_v4 = vadd.f32 %v8527_v3, %v503_v8  ;;  %v5821_v32 = vadd.f32 %v1606_v19, %v1342_v48  ;;  %v947_v36 = vadd.f32 %v819_v47, %v555_v57  ;;  %v1304_v56 = vadd.f32 %v1176_v15, %v912_v30  ;;  %v8531_v30 = vld [vmem:[#allocation65_spill] sm:$0xff]  ;;  %v8533_v19 = vld [vmem:[#allocation30_spill] sm:$0xff]  ;;  %v8534_v47 = vld [vmem:[#allocation116_spill] sm:$0xff] }
 0x14b   :  { %v1306_v21 = vadd.f32 %v1178_v53, %v914_v60  ;;  %v1303_v61 = vadd.f32 %v1175_v14, %v911_v33  ;;  %v897_v62 = vadd.f32 %v8530_v20, %v505_v0  ;;  %v1305_v25 = vadd.f32 %v1177_v5, %v913_v11  ;;  %v8532_v33 = vld [vmem:[#allocation115_spill] sm:$0xff] }
 0x14c   :  { %8528 = vst [vmem:[#allocation26_spill] sm:$0xff] %v5821_v32  ;;  %v1211_v38 = vmul.f32 %v8415_v13, %v8516_v1  ;;  %v557_v28 = vadd.f32 %v8514_v44, %v349_v51  ;;  %v821_v27 = vmul.f32 %v8477_v9, %v8511_v49  ;;  %v5833_v8 = vmul.f32 %v8494_v12, %v5760_v24  ;;  %v5859_v57 = vpop.permute.xlu1 %1412  ;;  %v1942_v51 = vld [vmem:[%s7849_s4 + $0x78] sm:$0xff] }
 0x14d   :  { %v5837_v3 = vmul.f32 %v8495_v37, %v5760_v24  ;;  %v5841_v0 = vmul.f32 %v8496_v7, %v5760_v24  ;;  %v5845_v5 = vmul.f32 %v8497_v59, %v5760_v24  ;;  %v1288_v60 = vadd.f32 %v8531_v30, %v896_v29  ;;  %8535 = vst [vmem:[#allocation84_spill] sm:$0xff] %v5859_v57  ;;  %v8536_v30 = vld [vmem:[#allocation40_spill] sm:$0xff]  ;;  %v1941_v24 = vld [vmem:[%s7849_s4 + $0x70] sm:$0xff]  ;;  %v8544_v59 = vld [vmem:[#allocation6_spill] sm:$0xff] }
 0x14e   :  { %v1290_v49 = vadd.f32 %v8532_v33, %v898_v16  ;;  %v1287_v14 = vadd.f32 %v8533_v19, %v895_v4  ;;  %v1603_v44 = vmul.f32 %v8372_v54, %v8517_v50  ;;  %v1168_v11 = vmul.f32 %v8276_v41, %v5823_v42  ;;  %2020 = vperm.xlu1 %3999, %v1942_v51   ;;  %v8539_v33 = vld [vmem:[#allocation5_spill] sm:$0xff] }
 0x14f   :  { %v1170_v15 = vmul.f32 %v8277_v40, %v5823_v42  ;;  %v1167_v53 = vmul.f32 %v8278_v18, %v5823_v42  ;;  %v1289_v48 = vadd.f32 %v8534_v47, %v897_v62  ;;  %v1169_v29 = vmul.f32 %v8279_v52, %v5823_v42  ;;  %v1940_v47 = vld [vmem:[%s7849_s4 + $0x68] sm:$0xff]  ;;  %2015 = vperm.xlu0 %4000, %v1941_v24  }
 0x150   :  { %v1339_v4 = vadd.f32 %v1211_v38, %v947_v36  ;;  %v949_v16 = vadd.f32 %v821_v27, %v557_v28  ;;  %v1213_v2 = vmul.f32 %v8427_v34, %v8516_v1  ;;  %v1568_v31 = vmul.f32 %v4420_v26, %v5859_v57  ;;  %v8538_v27 = vld [vmem:[#allocation67_spill] sm:$0xff]  ;;  %v5896_v37 = vpop.permute.xlu1 %411  ;;  %v8546_v24 = vld [vmem:[#allocation106_spill] sm:$0xff] }
 0x151   :  { %v1570_v20 = vmul.f32 %v8353_v46, %v5859_v57  ;;  %v1567_v62 = vmul.f32 %v8354_v10, %v5859_v57  ;;  %v1569_v36 = vmul.f32 %v8536_v30, %v5859_v57  ;;  %v1605_v28 = vmul.f32 %v8390_v43, %v8517_v50  ;;  %v8543_v57 = vld [vmem:[#allocation101_spill] sm:$0xff]  ;;  %8545 = vst [vmem:[#allocation79_spill] sm:$0xff] %v5896_v37 }
 0x152   :  { %v5876_v38 = vadd.f32 %v1603_v44, %v1339_v4  ;;  %v1341_v1 = vadd.f32 %v1213_v2, %v949_v16  ;;  %v340_v19 = vmul.f32 %v8539_v33, %v8538_v27  ;;  %v1696_v32 = vadd.f32 %v1568_v31, %v1304_v56  ;;  %v8540_v4 = vld [vmem:[#allocation11_spill] sm:$0xff]  ;;  %2010 = vperm.xlu1 %3999, %v1940_v47   ;;  %v8548_v31 = vld [vmem:[#allocation126_spill] sm:$0xff] }
 0x153   :  { %v1698_v42 = vadd.f32 %v1570_v20, %v1306_v21  ;;  %v1695_v51 = vadd.f32 %v1567_v62, %v1303_v61  ;;  %v1697_v44 = vadd.f32 %v1569_v36, %v1305_v25  ;;  %v5889_v16 = vadd.f32 %v8540_v4, %v1288_v60  ;;  %v8542_v2 = vld [vmem:[#allocation99_spill] sm:$0xff]  ;;  %v8547_v25 = vld [vmem:[#allocation125_spill] sm:$0xff] }
 0x154   :  { %8537 = vst [vmem:[#allocation85_spill] sm:$0xff] %v5876_v38  ;;  %v5891_v50 = vadd.f32 %v1605_v28, %v1341_v1  ;;  %v548_v38 = vadd.f32 %v8542_v2, %v340_v19  ;;  %v812_v7 = vmul.f32 %v8544_v59, %v8543_v57  ;;  %v1824_v52 = vmax.f32 %v1696_v32, 0.0  ;;  %v1939_v32 = vld [vmem:[%s7849_s4 + $0x60] sm:$0xff] }
 0x155   :  { %v1826_v18 = vmax.f32 %v1698_v42, 0.0  ;;  %v1823_v40 = vmax.f32 %v1695_v51, 0.0  ;;  %v1825_v56 = vmax.f32 %v1697_v44, 0.0  ;;  %v5899_v21 = vadd.f32 %v1168_v11, %v5771_v17  ;;  %v8550_v17 = vld [vmem:[#allocation8_spill] sm:$0xff]  ;;  %v5932_v44 = vpop.permute.xlu1 %616  ;;  %v8564_v42 = vld [vmem:[#allocation74_spill] sm:$0xff] }
 0x156   :  { %8541 = vst [vmem:[#allocation98_spill] sm:$0xff] %v5891_v50  ;;  %v5902_v61 = vadd.f32 %v8546_v24, %v1290_v49  ;;  %v5905_v60 = vadd.f32 %v8547_v25, %v1287_v14  ;;  %v5908_v20 = vadd.f32 %v8548_v31, %v1289_v48  ;;  %2043 = vmatprep.subr.mxu0 %v1824_v52  ;;  %v8551_v49 = vld [vmem:[#allocation45_spill] sm:$0xff]  ;;  %v1938_v14 = vld [vmem:[%s7849_s4 + $0x58] sm:$0xff]  ;;  %8554 = vst [vmem:[#allocation105_spill] sm:$0xff] %v5932_v44 }
 0x157   :  { %2204 = vmatprep.subr.mxu1 %v1826_v18  ;;  %v940_v36 = vadd.f32 %v812_v7, %v548_v38  ;;  %v1204_v11 = vmul.f32 %v8402_v23, %v8550_v17  ;;  %v1596_v1 = vmul.f32 %v8409_v63, %v8551_v49  ;;  %2044 = vmatpush1.msra.mxu0 %v1823_v40  ;;  %v8553_v51 = vld [vmem:[#allocation12_spill] sm:$0xff] }
 0x158   :  { %2205 = vmatpush1.msra.mxu1 %v1825_v56  ;;  %v1298_v48 = vadd.f32 %v1170_v15, %v5807_v35  ;;  %v342_v18 = vmul.f32 %v8498_v55, %v8538_v27  ;;  %v814_v7 = vmul.f32 %v8472_v22, %v8543_v57  ;;  %v1295_v38 = vadd.f32 %v1167_v53, %v5811_v39  ;;  %v8555_v15 = vld [vmem:[#allocation47_spill] sm:$0xff]  ;;  %v8556_v56 = vld [vmem:[#allocation25_spill] sm:$0xff] }
 0x159   :  { %v1332_v19 = vadd.f32 %v1204_v11, %v940_v36  ;;  %v1206_v47 = vmul.f32 %v8405_v45, %v8550_v17  ;;  %v1598_v40 = vmul.f32 %v8553_v51, %v8551_v49  ;;  %2005 = vperm.xlu1 %3999, %v1939_v32   ;;  %v339_v4 = vmul.f32 %v8555_v15, %v8538_v27  ;;  %v1937_v53 = vld [vmem:[%s7849_s4 + $0x50] sm:$0xff]  ;;  %v1936_v11 = vld [vmem:[%s7849_s4 + $0x48] sm:$0xff] }
 0x15a   :  { %v550_v35 = vadd.f32 %v8542_v2, %v342_v18  ;;  %v811_v24 = vmul.f32 %v8556_v56, %v8543_v57  ;;  %v1595_v39 = vmul.f32 %v8372_v54, %v8551_v49  ;;  %2000 = vperm.xlu0 %4000, %v1938_v14   ;;  %v1297_v25 = vadd.f32 %v1169_v29, %v5814_v6  ;;  %v8558_v6 = vld [vmem:[#allocation19_spill] sm:$0xff] }
 0x15b   :  { %v496_v36 = vadd.f32 %v5896_v37, %v5833_v8  ;;  %v5952_v18 = vadd.f32 %v1596_v1, %v1332_v19  ;;  %v547_v62 = vadd.f32 %v8542_v2, %v339_v4  ;;  %v341_v14 = vmul.f32 %v8507_v58, %v8538_v27  ;;  %v8559_v8 = vld [vmem:[#allocation21_spill] sm:$0xff] }
 0x15c   :  { %v942_v52 = vadd.f32 %v814_v7, %v550_v35  ;;  %v760_v29 = vmul.f32 %v8558_v6, %v5932_v44  ;;  %v498_v32 = vadd.f32 %v5896_v37, %v5837_v3  ;;  %v762_v31 = vmul.f32 %v8559_v8, %v5932_v44  ;;  %v1935_v35 = vld [vmem:[%s7849_s4 + $0x40] sm:$0xff]  ;;  %v5971_v3 = vpop.permute.xlu1 %1408 }
 0x15d   :  { %8557 = vst [vmem:[#allocation55_spill] sm:$0xff] %v5952_v18  ;;  %v1203_v50 = vmul.f32 %v8415_v13, %v8550_v17  ;;  %1995 = vperm.xlu1 %3999, %v1937_v53   ;;  %v939_v7 = vadd.f32 %v811_v24, %v547_v62  ;;  %v549_v19 = vadd.f32 %v8542_v2, %v341_v14  ;;  %8560 = vst [vmem:[#allocation87_spill] sm:$0xff] %v5971_v3  ;;  %v8562_v2 = vld [vmem:[#allocation68_spill] sm:$0xff] }
 0x15e   :  { %v1334_v1 = vadd.f32 %v1206_v47, %v942_v52  ;;  %v813_v27 = vmul.f32 %v8477_v9, %v8543_v57  ;;  %1990 = vperm.xlu0 %4000, %v1936_v11   ;;  %v1205_v4 = vmul.f32 %v8427_v34, %v8550_v17  ;;  %v1597_v53 = vmul.f32 %v8390_v43, %v8551_v49  ;;  %v8561_v52 = vld [vmem:[#allocation117_spill] sm:$0xff]  ;;  %v1934_v57 = vld [vmem:[%s7849_s4 + $0x38] sm:$0xff] }
 0x15f   :  { %v332_v62 = vmul.f32 %v8539_v33, %v8561_v52  ;;  %v804_v47 = vmul.f32 %v8544_v59, %v8562_v2  ;;  %v1560_v24 = vmul.f32 %v4420_v26, %v5971_v3  ;;  %v1562_v11 = vmul.f32 %v8353_v46, %v5971_v3  ;;  %v1933_v46 = vld [vmem:[%s7849_s4 + $0x30] sm:$0xff] }
 0x160   :  { %v1559_v17 = vmul.f32 %v8354_v10, %v5971_v3  ;;  %v1561_v49 = vmul.f32 %v8536_v30, %v5971_v3  ;;  %v5992_v14 = vadd.f32 %v1598_v40, %v1334_v1  ;;  %v1331_v18 = vadd.f32 %v1203_v50, %v939_v7  ;;  %v8565_v10 = vld [vmem:[#allocation23_spill] sm:$0xff]  ;;  %v6003_v7 = vpop.permute.xlu1 %117 }
 0x161   :  { %v941_v28 = vadd.f32 %v813_v27, %v549_v19  ;;  %v540_v59 = vadd.f32 %v8564_v42, %v332_v62  ;;  %1985 = vperm.xlu1 %3999, %v1935_v35   ;;  %v1688_v33 = vadd.f32 %v1560_v24, %v5899_v21  ;;  %v1690_v43 = vadd.f32 %v1562_v11, %v1298_v48  ;;  %v8568_v62 = vld [vmem:[#allocation31_spill] sm:$0xff]  ;;  %v8581_v24 = vld [vmem:[#allocation100_spill] sm:$0xff] }
 0x162   :  { %8563 = vst [vmem:[#allocation27_spill] sm:$0xff] %v5992_v14  ;;  %v1687_v26 = vadd.f32 %v1559_v17, %v1295_v38  ;;  %v1689_v34 = vadd.f32 %v1561_v49, %v1297_v25  ;;  %1980 = vperm.xlu0 %4000, %v1934_v57   ;;  %v759_v3 = vmul.f32 %v8565_v10, %v5932_v44  ;;  %8567 = vst [vmem:[#allocation10_spill] sm:$0xff] %v6003_v7 }
 0x163   :  { %v6001_v40 = vadd.f32 %v1595_v39, %v1331_v18  ;;  %v1333_v50 = vadd.f32 %v1205_v4, %v941_v28  ;;  %v932_v1 = vadd.f32 %v804_v47, %v540_v59  ;;  %v1816_v19 = vmax.f32 %v1688_v33, 0.0  ;;  %v1932_v47 = vld [vmem:[%s7849_s4 + $0x28] sm:$0xff] }
 0x164   :  { %v1818_v27 = vmax.f32 %v1690_v43, 0.0  ;;  %v1815_v21 = vmax.f32 %v1687_v26, 0.0  ;;  %v1817_v48 = vmax.f32 %v1689_v34, 0.0  ;;  %v6005_v38 = vadd.f32 %v760_v29, %v496_v36  ;;  %v8570_v43 = vld [vmem:[#allocation90_spill] sm:$0xff]  ;;  %v6042_v57 = vpop.permute.xlu1 %612 }
 0x165   :  { %8566 = vst [vmem:[#allocation33_spill] sm:$0xff] %v6001_v40  ;;  %v495_v25 = vadd.f32 %v5896_v37, %v5841_v0  ;;  %v497_v35 = vadd.f32 %v5896_v37, %v5845_v5  ;;  %v761_v39 = vmul.f32 %v8568_v62, %v5932_v44  ;;  %1975 = vperm.xlu1 %3999, %v1933_v46   ;;  %v1807_v59 = vmax.f32 %v5905_v60, 0.0  ;;  %v8571_v5 = vld [vmem:[#allocation110_spill] sm:$0xff]  ;;  %v8596_v44 = vld [vmem:[#allocation15_spill] sm:$0xff] }
 0x166   :  { %2045 = vmatprep.subr.mxu0 %v1816_v19  ;;  %2206 = vmatprep.subr.mxu1 %v1818_v27  ;;  %v6014_v33 = vadd.f32 %v762_v31, %v498_v32  ;;  %v6016_v26 = vadd.f32 %v1597_v53, %v1333_v50  ;;  %v1196_v34 = vmul.f32 %v8402_v23, %v8570_v43  ;;  %v1809_v0 = vmax.f32 %v5908_v20, 0.0  ;;  %v1931_v31 = vld [vmem:[%s7849_s4 + $0x20] sm:$0xff] }
 0x167   :  { %2046 = vmatpush1.msra.mxu0 %v1815_v21  ;;  %2207 = vmatpush1.msra.mxu1 %v1817_v48  ;;  %v1588_v28 = vmul.f32 %v8409_v63, %v8571_v5  ;;  %v334_v46 = vmul.f32 %v8498_v55, %v8561_v52  ;;  %v806_v60 = vmul.f32 %v8472_v22, %v8562_v2  ;;  %v8572_v32 = vmax.f32 %v5889_v16, 0.0 }
 0x168   :  { %8569 = vst [vmem:[#allocation77_spill] sm:$0xff] %v6016_v26  ;;  %v8573_v36 = vmax.f32 %v5902_v61, 0.0  ;;  %v6034_v20 = vadd.f32 %v759_v3, %v495_v25  ;;  %v1324_v4 = vadd.f32 %v1196_v34, %v932_v1  ;;  %v331_v53 = vmul.f32 %v8555_v15, %v8561_v52  ;;  %8575 = vst [vmem:[#allocation46_spill] sm:$0xff] %v6042_v57  ;;  %v1929_v25 = vld [vmem:[%s7849_s4 + $0x10] sm:$0xff] }
 0x169   :  { %2047 = vmatprep.subr.mxu0 %v8572_v32  ;;  %v542_v61 = vadd.f32 %v8564_v42, %v334_v46  ;;  %v1198_v3 = vmul.f32 %v8405_v45, %v8570_v43  ;;  %v803_v11 = vmul.f32 %v8556_v56, %v8562_v2  ;;  %v752_v17 = vmul.f32 %v8558_v6, %v6042_v57  ;;  %v8580_v32 = vld [vmem:[#allocation17_spill] sm:$0xff] }
 0x16a   :  { %2208 = vmatprep.subr.mxu1 %v8573_v36  ;;  %2048 = vmatpush1.msra.mxu0 %v1807_v59  ;;  %v754_v49 = vmul.f32 %v8559_v8, %v6042_v57  ;;  %v751_v50 = vmul.f32 %v8565_v10, %v6042_v57  ;;  %v753_v1 = vmul.f32 %v8568_v62, %v6042_v57  ;;  %v8578_v59 = vld [vmem:[#allocation60_spill] sm:$0xff]  ;;  %v8594_v57 = vld [vmem:[#allocation39_spill] sm:$0xff] }
 0x16b   :  { %2209 = vmatpush1.msra.mxu1 %v1809_v0  ;;  %1965 = vperm.xlu1 %3999, %v1931_v31   ;;  %v889_v19 = vadd.f32 %v761_v39, %v497_v35  ;;  %v6058_v27 = vadd.f32 %v1588_v28, %v1324_v4  ;;  %v934_v21 = vadd.f32 %v806_v60, %v542_v61  ;;  %v8579_v0 = vld [vmem:[#allocation13_spill] sm:$0xff]  ;;  %v1930_v35 = vld [vmem:[%s7849_s4 + $0x18] sm:$0xff]  ;;  %v6075_v4 = vpop.permute.xlu1 %1008 }
 0x16c   :  { %v539_v48 = vadd.f32 %v8564_v42, %v331_v53  ;;  %1970 = vperm.xlu0 %4000, %v1932_v47   ;;  %v880_v34 = vadd.f32 %v752_v17, %v8578_v59  ;;  %v882_v46 = vadd.f32 %v754_v49, %v8579_v0  ;;  %v879_v36 = vadd.f32 %v751_v50, %v8580_v32  ;;  %v8583_v53 = vld [vmem:[#allocation95_spill] sm:$0xff]  ;;  %v8584_v61 = vld [vmem:[#allocation96_spill] sm:$0xff]  ;;  %v8585_v49 = vld [vmem:[#allocation94_spill] sm:$0xff] }
 0x16d   :  { %8577 = vst [vmem:[#allocation58_spill] sm:$0xff] %v6058_v27  ;;  %v881_v29 = vadd.f32 %v753_v1, %v8581_v24  ;;  %v272_v39 = vmul.f32 %v8494_v12, %v6003_v7  ;;  %v1326_v28 = vadd.f32 %v1198_v3, %v934_v21  ;;  %v1590_v60 = vmul.f32 %v8553_v51, %v8571_v5  ;;  %v8586_v50 = vld [vmem:[#allocation104_spill] sm:$0xff]  ;;  %v8587_v12 = vld [vmem:[#allocation22_spill] sm:$0xff] }
 0x16e   :  { %v931_v31 = vadd.f32 %v803_v11, %v539_v48  ;;  %8582 = vst [vmem:[#allocation56_spill] sm:$0xff] %v6075_v4  ;;  %v1272_v47 = vadd.f32 %v8583_v53, %v880_v34  ;;  %v1274_v17 = vadd.f32 %v8584_v61, %v882_v46  ;;  %v1271_v24 = vadd.f32 %v8585_v49, %v879_v36  ;;  %v1927_v48 = vld [vmem:[%s7849_s4] sm:$0xff]  ;;  %v8589_v34 = vld [vmem:[#allocation32_spill] sm:$0xff]  ;;  %v8590_v46 = vld [vmem:[#allocation107_spill] sm:$0xff] }
 0x16f   :  { %v1273_v1 = vadd.f32 %v8586_v50, %v881_v29  ;;  %1955 = vperm.xlu1 %3999, %v1929_v25   ;;  %v1152_v59 = vmul.f32 %v8276_v41, %v6075_v4  ;;  %v1154_v3 = vmul.f32 %v8587_v12, %v6075_v4  ;;  %v1195_v11 = vmul.f32 %v8415_v13, %v8570_v43  ;;  %v8588_v29 = vld [vmem:[#allocation24_spill] sm:$0xff]  ;;  %v8593_v49 = vld [vmem:[#allocation38_spill] sm:$0xff] }
 0x170   :  { %v333_v21 = vmul.f32 %v8507_v58, %v8561_v52  ;;  %1960 = vperm.xlu0 %4000, %v1930_v35   ;;  %v1151_v25 = vmul.f32 %v8588_v29, %v6075_v4  ;;  %v1153_v0 = vmul.f32 %v8589_v34, %v6075_v4  ;;  %v6097_v32 = vadd.f32 %v8590_v46, %v1272_v47  ;;  %v8591_v36 = vld [vmem:[#allocation88_spill] sm:$0xff]  ;;  %v1928_v52 = vld [vmem:[%s7849_s4 + $0x8] sm:$0xff] }
 0x171   :  { %v6100_v53 = vadd.f32 %v8591_v36, %v1274_v17  ;;  %v8592_v35 = vld [vmem:[#allocation34_spill] sm:$0xff]  ;;  %v271_v50 = vmul.f32 %v8593_v49, %v6003_v7  ;;  %v273_v37 = vmul.f32 %v8594_v57, %v6003_v7  ;;  %v1587_v47 = vmul.f32 %v8372_v54, %v8571_v5 }
 0x172   :  { %v274_v61 = vmul.f32 %v8592_v35, %v6003_v7  ;;  %v1280_v46 = vadd.f32 %v1152_v59, %v6005_v38  ;;  %v1282_v17 = vadd.f32 %v1154_v3, %v6014_v33  ;;  %v8595_v36 = vld [vmem:[#allocation54_spill] sm:$0xff]  ;;  %v6119_v27 = vadd.f32 %v8596_v44, %v1273_v1  ;;  %v6121_v35 = vpop.permute.xlu1 %401 }
 0x173   :  { %v6116_v4 = vadd.f32 %v8595_v36, %v1271_v24  ;;  %1945 = vperm.xlu1 %3999, %v1927_v48   ;;  %8597 = vst [vmem:[#allocation16_spill] sm:$0xff] %v6121_v35  ;;  %v6123_v49 = vadd.f32 %v1590_v60, %v1326_v28  ;;  %v1323_v26 = vadd.f32 %v1195_v11, %v931_v31  ;;  %v8600_v60 = vld [vmem:[#allocation48_spill] sm:$0xff]  ;;  %v8602_v11 = vld [vmem:[#allocation114_spill] sm:$0xff] }
 0x174   :  { %v541_v57 = vadd.f32 %v8564_v42, %v333_v21  ;;  %v805_v7 = vmul.f32 %v8477_v9, %v8562_v2  ;;  %1950 = vperm.xlu0 %4000, %v1928_v52   ;;  %v1279_v38 = vadd.f32 %v1151_v25, %v6034_v20  ;;  %v1281_v33 = vadd.f32 %v1153_v0, %v889_v19  ;;  %v8601_v2 = vld [vmem:[#allocation43_spill] sm:$0xff]  ;;  %v8603_v20 = vld [vmem:[#allocation5_spill] sm:$0xff]  ;;  %v8605_v48 = vld [vmem:[#allocation6_spill] sm:$0xff] }
 0x175   :  { %8598 = vst [vmem:[#allocation93_spill] sm:$0xff] %v6123_v49  ;;  %v480_v1 = vadd.f32 %v6121_v35, %v272_v39  ;;  %v6132_v59 = vadd.f32 %v1587_v47, %v1323_v26  ;;  %v1197_v31 = vmul.f32 %v8600_v60, %v8570_v43  ;;  %v482_v42 = vadd.f32 %v6121_v35, %v274_v61  ;;  %v8604_v21 = vld [vmem:[#allocation59_spill] sm:$0xff]  ;;  %v8609_v36 = vld [vmem:[#allocation18_spill] sm:$0xff] }
 0x176   :  { %v933_v28 = vadd.f32 %v805_v7, %v541_v57  ;;  %v1589_v3 = vmul.f32 %v8601_v2, %v8571_v5  ;;  %v324_v19 = vmul.f32 %v8603_v20, %v8602_v11  ;;  %v796_v25 = vmul.f32 %v8605_v48, %v8604_v21  ;;  %v8606_v7 = vld [vmem:[#allocation102_spill] sm:$0xff]  ;;  %v6147_v43 = vpop.permute.xlu1 %608  ;;  %v8608_v61 = vld [vmem:[#allocation91_spill] sm:$0xff] }
 0x177   :  { %8599 = vst [vmem:[#allocation122_spill] sm:$0xff] %v6132_v59  ;;  %v479_v0 = vadd.f32 %v6121_v35, %v271_v50  ;;  %v481_v26 = vadd.f32 %v6121_v35, %v273_v37  ;;  %v1188_v52 = vmul.f32 %v8402_v23, %v8606_v7  ;;  %8607 = vst [vmem:[#allocation123_spill] sm:$0xff] %v6147_v43 }
 0x178   :  { %v1325_v39 = vadd.f32 %v1197_v31, %v933_v28  ;;  %v532_v47 = vadd.f32 %v8608_v61, %v324_v19  ;;  %v1580_v5 = vmul.f32 %v8409_v63, %v8609_v36  ;;  %v326_v57 = vmul.f32 %v8498_v55, %v8602_v11 }
 0x179   :  { %v798_v44 = vmul.f32 %v8472_v22, %v8604_v21  ;;  %v744_v37 = vmul.f32 %v8558_v6, %v6147_v43  ;;  %v746_v50 = vmul.f32 %v8559_v8, %v6147_v43  ;;  %v743_v28 = vmul.f32 %v8565_v10, %v6147_v43 }
 0x17a   :  { %v745_v31 = vmul.f32 %v8568_v62, %v6147_v43  ;;  %v6164_v19 = vadd.f32 %v1589_v3, %v1325_v39  ;;  %v924_v24 = vadd.f32 %v796_v25, %v532_v47  ;;  %v534_v35 = vadd.f32 %v8608_v61, %v326_v57  ;;  %v6174_v3 = vpop.permute.xlu1 %1400  ;;  %v8612_v47 = vld [vmem:[#allocation35_spill] sm:$0xff] }
 0x17b   :  { %v323_v59 = vmul.f32 %v8555_v15, %v8602_v11  ;;  %v872_v49 = vadd.f32 %v744_v37, %v480_v1  ;;  %v874_v40 = vadd.f32 %v746_v50, %v482_v42  ;;  %v1190_v6 = vmul.f32 %v8405_v45, %v8606_v7  ;;  %8611 = vst [vmem:[#allocation118_spill] sm:$0xff] %v6174_v3 }
 0x17c   :  { %8610 = vst [vmem:[#allocation124_spill] sm:$0xff] %v6164_v19  ;;  %v1582_v8 = vmul.f32 %v8553_v51, %v8609_v36  ;;  %v871_v10 = vadd.f32 %v743_v28, %v479_v0  ;;  %v1316_v14 = vadd.f32 %v1188_v52, %v924_v24  ;;  %v926_v16 = vadd.f32 %v798_v44, %v534_v35  ;;  %v8613_v24 = vld [vmem:[#allocation36_spill] sm:$0xff]  ;;  %v8614_v44 = vld [vmem:[#allocation37_spill] sm:$0xff] }
 0x17d   :  { %v531_v62 = vadd.f32 %v8608_v61, %v323_v59  ;;  %v873_v25 = vadd.f32 %v745_v31, %v481_v26  ;;  %v795_v39 = vmul.f32 %v8556_v56, %v8604_v21  ;;  %v1187_v1 = vmul.f32 %v8415_v13, %v8606_v7 }
 0x17e   :  { %v325_v42 = vmul.f32 %v8507_v58, %v8602_v11  ;;  %v1544_v57 = vmul.f32 %v8612_v47, %v6174_v3  ;;  %v1546_v35 = vmul.f32 %v8613_v24, %v6174_v3  ;;  %v1543_v59 = vmul.f32 %v8614_v44, %v6174_v3 }
 0x17f   :  { %v1545_v0 = vmul.f32 %v8536_v30, %v6174_v3  ;;  %v6190_v26 = vadd.f32 %v1580_v5, %v1316_v14  ;;  %v1318_v52 = vadd.f32 %v1190_v6, %v926_v16  ;;  %v923_v37 = vadd.f32 %v795_v39, %v531_v62  ;;  %v6199_v3 = vpop.permute.xlu1 %1000 }
 0x180   :  { %v533_v50 = vadd.f32 %v8608_v61, %v325_v42  ;;  %v1672_v28 = vadd.f32 %v1544_v57, %v1280_v46  ;;  %v1674_v11 = vadd.f32 %v1546_v35, %v1282_v17  ;;  %v1671_v31 = vadd.f32 %v1543_v59, %v1279_v38  ;;  %8615 = vst [vmem:[#allocation119_spill] sm:$0xff] %v6199_v3  ;;  %v8622_v42 = vld [vmem:[#allocation71_spill] sm:$0xff]  ;;  %v8623_v57 = vld [vmem:[#allocation108_spill] sm:$0xff] }
 0x181   :  { %v1673_v43 = vadd.f32 %v1545_v0, %v1281_v33  ;;  %v6193_v19 = vadd.f32 %v1582_v8, %v1318_v52  ;;  %v1315_v18 = vadd.f32 %v1187_v1, %v923_v37  ;;  %v1579_v58 = vmul.f32 %v8372_v54, %v8609_v36  ;;  %v8621_v1 = vld [vmem:[#allocation129_spill] sm:$0xff] }
 0x182   :  { %v797_v13 = vmul.f32 %v8477_v9, %v8604_v21  ;;  %v1800_v14 = vmax.f32 %v1672_v28, 0.0  ;;  %v1802_v16 = vmax.f32 %v1674_v11, 0.0  ;;  %v1799_v5 = vmax.f32 %v1671_v31, 0.0  ;;  %v2811_v52 = vld [vmem:[%s7851_s6] sm:$0xff]  ;;  %v8625_v11 = vld [vmem:[#allocation84_spill] sm:$0xff] }
 0x183   :  { %v1801_v6 = vmax.f32 %v1673_v43, 0.0  ;;  %v1136_v46 = vmul.f32 %v8276_v41, %v6199_v3  ;;  %v1138_v17 = vmul.f32 %v8587_v12, %v6199_v3  ;;  %v1135_v38 = vmul.f32 %v8588_v29, %v6199_v3  ;;  %2829 = vperm.xlu0 %4000, %v2811_v52   ;;  %v8631_v52 = vld [vmem:[#allocation63_spill] sm:$0xff] }
 0x184   :  { %v1137_v33 = vmul.f32 %v8589_v34, %v6199_v3  ;;  %2049 = vmatprep.subr.mxu0 %v1800_v14  ;;  %2210 = vmatprep.subr.mxu1 %v1802_v16  ;;  %v1791_v21 = vmax.f32 %v6116_v4, 0.0  ;;  %v6210_v61 = vadd.f32 %v1579_v58, %v1315_v18  ;;  %v925_v8 = vadd.f32 %v797_v13, %v533_v50  ;;  %v2812_v34 = vld [vmem:[%s7851_s6 + $0x8] sm:$0xff]  ;;  %v8618_v18 = vld [vmem:[#allocation44_spill] sm:$0xff] }
 0x185   :  { %v1189_v43 = vmul.f32 %v8600_v60, %v8606_v7  ;;  %2050 = vmatpush1.msra.mxu0 %v1799_v5  ;;  %2211 = vmatpush1.msra.mxu1 %v1801_v6  ;;  %v1793_v41 = vmax.f32 %v6119_v27, 0.0  ;;  %v1264_v12 = vadd.f32 %v1136_v46, %v872_v49  ;;  %v1266_v62 = vadd.f32 %v1138_v17, %v874_v40  ;;  %v6225_v49 = vpop.permute.xlu1 %1392  ;;  %v8620_v40 = vld [vmem:[#allocation89_spill] sm:$0xff]  ;;  %v8624_v50 = vld [vmem:[#allocation52_spill] sm:$0xff]  ;;  %v8660_v6 = vld [vmem:[#allocation82_spill] sm:$0xff] }
 0x186   :  { %v1263_v29 = vadd.f32 %v1135_v38, %v871_v10  ;;  %v8616_v39 = vmax.f32 %v6097_v32, 0.0  ;;  %v8617_v58 = vmax.f32 %v6100_v53, 0.0  ;;  %v1265_v13 = vadd.f32 %v1137_v33, %v873_v25  ;;  %8619 = vst [vmem:[#allocation120_spill] sm:$0xff] %v6225_v49  ;;  %2834 = vperm.xlu1 %3999, %v2812_v34   ;;  %v8626_v5 = vld [vmem:[#allocation49_spill] sm:$0xff] }
 0x187   :  { %v1317_v7 = vadd.f32 %v1189_v43, %v925_v8  ;;  %v1581_v27 = vmul.f32 %v8601_v2, %v8609_v36  ;;  %v316_v32 = vmul.f32 %v8603_v20, %v8621_v1  ;;  %v788_v53 = vmul.f32 %v8605_v48, %v8622_v42 }
 0x188   :  { %2051 = vmatprep.subr.mxu0 %v8616_v39  ;;  %2212 = vmatprep.subr.mxu1 %v8617_v58  ;;  %v1180_v25 = vmul.f32 %v8402_v23, %v8623_v57  ;;  %v1528_v35 = vmul.f32 %v8612_v47, %v6225_v49  ;;  %v1530_v36 = vmul.f32 %v8613_v24, %v6225_v49  ;;  %v8628_v58 = vld [vmem:[#allocation92_spill] sm:$0xff]  ;;  %v1870_v10 = vmax.f32 %v8660_v6, 0.0  ;;  %v8662_v6 = vld [vmem:[#allocation9_spill] sm:$0xff] }
 0x189   :  { %2052 = vmatpush1.msra.mxu0 %v1791_v21  ;;  %2213 = vmatpush1.msra.mxu1 %v1793_v41  ;;  %v1527_v59 = vmul.f32 %v8614_v44, %v6225_v49  ;;  %v1529_v0 = vmul.f32 %v8536_v30, %v6225_v49  ;;  %v6245_v37 = vadd.f32 %v1581_v27, %v1317_v7  ;;  %v2814_v30 = vld [vmem:[%s7851_s6 + $0x18] sm:$0xff]  ;;  %v2813_v41 = vld [vmem:[%s7851_s6 + $0x10] sm:$0xff] }
 0x18a   :  { %v524_v28 = vadd.f32 %v8624_v50, %v316_v32  ;;  %v1572_v47 = vmul.f32 %v8409_v63, %v8625_v11  ;;  %v318_v24 = vmul.f32 %v8498_v55, %v8621_v1  ;;  %v1656_v44 = vadd.f32 %v1528_v35, %v1264_v12  ;;  %2844 = vperm.xlu1 %3999, %v2814_v30   ;;  %v6265_v12 = vld [vmem:[%s7848_s3] sm:$0xff]  ;;  %v8629_v32 = vld [vmem:[#allocation42_spill] sm:$0xff]  ;;  %v8632_v30 = vld [vmem:[#allocation51_spill] sm:$0xff] }
 0x18b   :  { %v1658_v31 = vadd.f32 %v1530_v36, %v1266_v62  ;;  %v1655_v14 = vadd.f32 %v1527_v59, %v1263_v29  ;;  %v1657_v16 = vadd.f32 %v1529_v0, %v1265_v13  ;;  %v790_v38 = vmul.f32 %v8472_v22, %v8622_v42  ;;  %8627 = vst [vmem:[#allocation78_spill] sm:$0xff] %v6265_v12  ;;  %v8658_v35 = vld [vmem:[#allocation66_spill] sm:$0xff] }
 0x18c   :  { %v916_v46 = vadd.f32 %v788_v53, %v524_v28  ;;  %v526_v17 = vadd.f32 %v8624_v50, %v318_v24  ;;  %v1784_v33 = vmax.f32 %v1656_v44, 0.0  ;;  %v1182_v34 = vmul.f32 %v8405_v45, %v8623_v57  ;;  %2839 = vperm.xlu0 %4000, %v2813_v41  }
 0x18d   :  { %v1786_v21 = vmax.f32 %v1658_v31, 0.0  ;;  %v1783_v8 = vmax.f32 %v1655_v14, 0.0  ;;  %v1785_v43 = vmax.f32 %v1657_v16, 0.0  ;;  %v1574_v39 = vmul.f32 %v8553_v51, %v8625_v11  ;;  %v8635_v16 = vld [vmem:[#allocation53_spill] sm:$0xff] }
 0x18e   :  { %v1308_v62 = vadd.f32 %v1180_v25, %v916_v46  ;;  %v918_v29 = vadd.f32 %v790_v38, %v526_v17  ;;  %2053 = vmatprep.subr.mxu0 %v1784_v33  ;;  %v315_v7 = vmul.f32 %v8555_v15, %v8621_v1  ;;  %v787_v27 = vmul.f32 %v8556_v56, %v8622_v42  ;;  %v8630_v25 = vld [vmem:[#allocation62_spill] sm:$0xff]  ;;  %v8637_v17 = vld [vmem:[#allocation109_spill] sm:$0xff] }
 0x18f   :  { %2214 = vmatprep.subr.mxu1 %v1786_v21  ;;  %v1179_v53 = vmul.f32 %v8629_v32, %v8623_v57  ;;  %2054 = vmatpush1.msra.mxu0 %v1783_v8  ;;  %v1571_v0 = vmul.f32 %v8372_v54, %v8625_v11  ;;  %v317_v44 = vmul.f32 %v8632_v30, %v8621_v1  ;;  %v8636_v46 = vmax.f32 %v8635_v16, 0.0  ;;  %v8639_v1 = vld [vmem:[#allocation72_spill] sm:$0xff] }
 0x190   :  { %2215 = vmatpush1.msra.mxu1 %v1785_v43  ;;  %v6279_v36 = vadd.f32 %v1572_v47, %v1308_v62  ;;  %v1310_v59 = vadd.f32 %v1182_v34, %v918_v29  ;;  %2088 = vmatmul.mubr.f32.vlgmr.msra.gmra.mxu0 %v6265_v12  ;;  %v523_v24 = vadd.f32 %v8624_v50, %v315_v7  ;;  %v8633_v47 = vld [vmem:[#allocation61_spill] sm:$0xff]  ;;  %v8640_v43 = vmax.f32 %v8639_v1, 0.0  ;;  %v8643_v62 = vld [vmem:[#allocation111_spill] sm:$0xff]  ;;  %v8655_v29 = vld [vmem:[#allocation80_spill] sm:$0xff] }
 0x191   :  { %2249 = vmatmul.mubr.f32.vlgmr.msra.gmra.mxu1 %v6265_v12  ;;  %v789_v31 = vmul.f32 %v8477_v9, %v8622_v42  ;;  %v8634_v14 = vmax.f32 %v8633_v47, 0.0  ;;  %2506 = vmatprep.subr.mxu1 %v8636_v46  ;;  %v1181_v21 = vmul.f32 %v8600_v60, %v8623_v57  ;;  %v1573_v8 = vmul.f32 %v8601_v2, %v8625_v11  ;;  %v8641_v42 = vld [vmem:[#allocation73_spill] sm:$0xff]  ;;  %v8647_v57 = vld [vmem:[#allocation64_spill] sm:$0xff]  ;;  %v6317_v11 = vld [vmem:[%s7848_s3 + $0x8] sm:$0xff] }
 0x192   :  { %v6296_v33 = vadd.f32 %v1574_v39, %v1310_v59  ;;  %v8642_v41 = vmax.f32 %v8641_v42, 0.0  ;;  %v915_v34 = vadd.f32 %v787_v27, %v523_v24  ;;  %v525_v7 = vadd.f32 %v8624_v50, %v317_v44  ;;  %v8644_v47 = vld [vmem:[#allocation81_spill] sm:$0xff]  ;;  %v8645_v59 = vld [vmem:[#allocation28_spill] sm:$0xff]  ;;  %v8649_v46 = vld [vmem:[#allocation50_spill] sm:$0xff] }
 0x193   :  { %2345 = vmatprep.subr.mxu0 %v8634_v14  ;;  %v308_v39 = vmul.f32 %v8603_v20, %v8644_v47  ;;  %v8646_v14 = vmax.f32 %v8645_v59, 0.0  ;;  %v8648_v16 = vmax.f32 %v8647_v57, 0.0  ;;  %v8651_v50 = vld [vmem:[#allocation83_spill] sm:$0xff]  ;;  %v8656_v1 = vld [vmem:[#allocation113_spill] sm:$0xff]  ;;  %v8659_v13 = vmax.f32 %v8658_v35, 0.0 }
 0x194   :  { %8638 = vst [vmem:[#allocation65_spill] sm:$0xff] %v6296_v33  ;;  %2346 = vmatpush1.msra.mxu0 %v8640_v43  ;;  %2507 = vmatpush1.msra.mxu1 %v8642_v41  ;;  %v8650_v43 = vld [vmem:[#allocation97_spill] sm:$0xff]  ;;  %v1172_v24 = vmul.f32 %v8402_v23, %v8651_v50  ;;  %v8652_v44 = vld [vmem:[#allocation87_spill] sm:$0xff]  ;;  %v8653_v41 = vmov 0.0   ;;  %v1307_v57 = vadd.f32 %v1179_v53, %v915_v34  ;;  %v8657_v28 = vmax.f32 %v8656_v1, 0.0 }
 0x195   :  { %2347 = vmatprep.subr.mxu0 %v8646_v14  ;;  %2508 = vmatprep.subr.mxu1 %v8648_v16  ;;  %v780_v27 = vmul.f32 %v8605_v48, %v8650_v43  ;;  %v1564_v42 = vmul.f32 %v8409_v63, %v8652_v44  ;;  %v8654_v59 = vld [vmem:[#allocation75_spill] sm:$0xff]  ;;  %v917_v16 = vadd.f32 %v789_v31, %v525_v7  ;;  %v8661_v31 = vld [vmem:[#allocation57_spill] sm:$0xff]  ;;  %v8663_v7 = vmax.f32 %v8662_v6, 0.0 }
 0x196   :  { %2093 = vmatprep.mubr.f32.mxu0 %v8653_v41  ;;  %2254 = vmatprep.mubr.f32.mxu1 %v8653_v41  ;;  %v516_v38 = vadd.f32 %v8655_v29, %v308_v39  ;;  %v310_v4 = vmul.f32 %v8498_v55, %v8644_v47  ;;  %v782_v12 = vmul.f32 %v8472_v22, %v8650_v43  ;;  %v8664_v39 = vld [vmem:[#allocation20_spill] sm:$0xff]  ;;  %v8666_v14 = vld [vmem:[#allocation7_spill] sm:$0xff] }
 0x197   :  { %2348 = vmatpush1.msra.mxu0 %v8657_v28  ;;  %2509 = vmatpush1.msra.mxu1 %v8659_v13  ;;  %v1174_v53 = vmul.f32 %v8405_v45, %v8651_v50  ;;  %v6344_v34 = vadd.f32 %v1571_v0, %v1307_v57  ;;  %v1309_v13 = vadd.f32 %v1181_v21, %v917_v16  ;;  %v8665_v1 = vmax.f32 %v8664_v39, 0.0  ;;  %v8667_v0 = vld [vmem:[#allocation128_spill] sm:$0xff]  ;;  %v8670_v21 = vld [vmem:[#allocation121_spill] sm:$0xff]  ;;  %v6372_v39 = vld [vmem:[%s7848_s3 + $0x10] sm:$0xff] }
 0x198   :  { %2094 = vmatmul.mubr.f32.gmra.mxu0 %v6317_v11  ;;  %2255 = vmatmul.mubr.f32.gmra.mxu1 %v6317_v11  ;;  %v908_v35 = vadd.f32 %v780_v27, %v516_v38  ;;  %v1869_v49 = vmax.f32 %v8666_v14, 0.0  ;;  %v518_v3 = vadd.f32 %v8655_v29, %v310_v4  ;;  %v1566_v33 = vmul.f32 %v8553_v51, %v8652_v44 }
 0x199   :  { %2349 = vmatprep.subr.mxu0 %v8663_v7  ;;  %2510 = vmatprep.subr.mxu1 %v8665_v1  ;;  %v307_v28 = vmul.f32 %v8555_v15, %v8644_v47  ;;  %v8668_v57 = vmax.f32 %v8667_v0, 0.0  ;;  %v8669_v38 = vmax.f32 %v8618_v18, 0.0  ;;  %v1860_v27 = vmax.f32 %v8670_v21, 0.0  ;;  %v8673_v18 = vld [vmem:[#allocation26_spill] sm:$0xff] }
 0x19a   :  { %v6361_v16 = vadd.f32 %v1573_v8, %v1309_v13  ;;  %v1300_v6 = vadd.f32 %v1172_v24, %v908_v35  ;;  %v779_v4 = vmul.f32 %v8556_v56, %v8650_v43  ;;  %v8671_v14 = vmax.f32 %v8620_v40, 0.0  ;;  %2099 = vmatprep.mubr.f32.mxu0 %v8653_v41  ;;  %2260 = vmatprep.mubr.f32.mxu1 %v8653_v41  ;;  %v8674_v40 = vld [vmem:[#allocation85_spill] sm:$0xff] }
 0x19b   :  { %2350 = vmatpush1.msra.mxu0 %v8668_v57  ;;  %2511 = vmatpush1.msra.mxu1 %v8669_v38  ;;  %v8672_v7 = vmax.f32 %v8626_v5, 0.0  ;;  %v1862_v1 = vmax.f32 %v8673_v18, 0.0  ;;  %v910_v0 = vadd.f32 %v782_v12, %v518_v3  ;;  %v515_v8 = vadd.f32 %v8655_v29, %v307_v28  ;;  %v8677_v28 = vld [vmem:[#allocation98_spill] sm:$0xff] }
 0x19c   :  { %2351 = vmatprep.subr.mxu0 %v8671_v14  ;;  %v1171_v24 = vmul.f32 %v8629_v32, %v8651_v50  ;;  %v1859_v5 = vmax.f32 %v8674_v40, 0.0  ;;  %v6381_v13 = vadd.f32 %v1564_v42, %v1300_v6  ;;  %v1563_v35 = vmul.f32 %v8372_v54, %v8652_v44  ;;  %2100 = vmatmul.mubr.f32.gmra.mxu0 %v6372_v39  ;;  %v8678_v6 = vld [vmem:[#allocation55_spill] sm:$0xff] }
 0x19d   :  { %2512 = vmatprep.subr.mxu1 %v8672_v7  ;;  %v309_v57 = vmul.f32 %v8632_v30, %v8644_v47  ;;  %v8675_v3 = vmax.f32 %v8628_v58, 0.0  ;;  %v8676_v12 = vmax.f32 %v8630_v25, 0.0  ;;  %v1861_v38 = vmax.f32 %v8677_v28, 0.0  ;;  %2261 = vmatmul.mubr.f32.gmra.mxu1 %v6372_v39  ;;  %v8686_v28 = vld [vmem:[#allocation69_spill] sm:$0xff] }
 0x19e   :  { %v1302_v14 = vadd.f32 %v1174_v53, %v910_v0  ;;  %v907_v7 = vadd.f32 %v779_v4, %v515_v8  ;;  %v781_v42 = vmul.f32 %v8477_v9, %v8650_v43  ;;  %v1852_v18 = vmax.f32 %v8678_v6, 0.0  ;;  %v8681_v43 = vld [vmem:[#allocation27_spill] sm:$0xff]  ;;  %v8687_v6 = vld [vmem:[#allocation41_spill] sm:$0xff]  ;;  %2105 = vmatprep.mubr.f32.mxu0 %v8653_v41  ;;  %2266 = vmatprep.mubr.f32.mxu1 %v8653_v41 }
 0x19f   :  { %2352 = vmatpush1.msra.mxu0 %v8675_v3  ;;  %2513 = vmatpush1.msra.mxu1 %v8676_v12  ;;  %v517_v47 = vadd.f32 %v8655_v29, %v309_v57  ;;  %v1173_v58 = vmul.f32 %v8600_v60, %v8651_v50  ;;  %v1565_v25 = vmul.f32 %v8601_v2, %v8652_v44  ;;  %v8679_v53 = vmax.f32 %v8631_v52, 0.0  ;;  %v8682_v3 = vld [vmem:[#allocation112_spill] sm:$0xff]  ;;  %v8685_v44 = vld [vmem:[#allocation33_spill] sm:$0xff] }
 0x1a0   :  { %v8680_v4 = vmax.f32 %v8637_v17, 0.0  ;;  %v1854_v0 = vmax.f32 %v8681_v43, 0.0  ;;  %v6407_v8 = vadd.f32 %v1566_v33, %v1302_v14  ;;  %v1299_v40 = vadd.f32 %v1171_v24, %v907_v7 }
 0x1a1   :  { %2353 = vmatprep.subr.mxu0 %v8679_v53  ;;  %v300_v29 = vmul.f32 %v8603_v20, %v8682_v3  ;;  %v8683_v57 = vmax.f32 %v8643_v62, 0.0  ;;  %v8684_v50 = vmax.f32 %v8649_v46, 0.0  ;;  %v1851_v52 = vmax.f32 %v8685_v44, 0.0  ;;  %v6425_v62 = vld [vmem:[%s7848_s3 + $0x18] sm:$0xff]  ;;  %v8689_v46 = vld [vmem:[#allocation77_spill] sm:$0xff]  ;;  %v8691_v53 = vld [vmem:[#allocation103_spill] sm:$0xff] }
 0x1a2   :  { %2514 = vmatprep.subr.mxu1 %v8680_v4  ;;  %v909_v12 = vadd.f32 %v781_v42, %v517_v47  ;;  %v772_v17 = vmul.f32 %v8605_v48, %v8686_v28  ;;  %v1164_v33 = vmul.f32 %v8402_v23, %v8687_v6  ;;  %v8688_v24 = vmax.f32 %v8654_v59, 0.0  ;;  %v8690_v42 = vld [vmem:[#allocation86_spill] sm:$0xff]  ;;  %2106 = vmatmul.mubr.f32.gmra.mxu0 %v6425_v62 }
 0x1a3   :  { %2354 = vmatpush1.msra.mxu0 %v8683_v57  ;;  %2515 = vmatpush1.msra.mxu1 %v8684_v50  ;;  %v1853_v14 = vmax.f32 %v8689_v46, 0.0  ;;  %v6428_v7 = vadd.f32 %v1563_v35, %v1299_v40  ;;  %v508_v47 = vadd.f32 %v8690_v42, %v300_v29  ;;  %v1556_v4 = vmul.f32 %v8409_v63, %v8691_v53  ;;  %v8692_v59 = vld [vmem:[#allocation58_spill] sm:$0xff]  ;;  %v8694_v40 = vld [vmem:[#allocation93_spill] sm:$0xff] }
 0x1a4   :  { %2355 = vmatprep.subr.mxu0 %v8688_v24  ;;  %2516 = vmatprep.subr.mxu1 %v1870_v10  ;;  %v1844_v10 = vmax.f32 %v8692_v59, 0.0  ;;  %v1301_v43 = vadd.f32 %v1173_v58, %v909_v12  ;;  %v302_v57 = vmul.f32 %v8498_v55, %v8682_v3  ;;  %v774_v50 = vmul.f32 %v8472_v22, %v8686_v28  ;;  %v8695_v58 = vld [vmem:[#allocation122_spill] sm:$0xff] }
 0x1a5   :  { %v8693_v35 = vmax.f32 %v8661_v31, 0.0  ;;  %2517 = vmatpush1.msra.mxu1 %v1869_v49  ;;  %v1846_v29 = vmax.f32 %v8694_v40, 0.0  ;;  %v900_v44 = vadd.f32 %v772_v17, %v508_v47  ;;  %v1166_v24 = vmul.f32 %v8405_v45, %v8687_v6  ;;  %v8696_v17 = vld [vmem:[#allocation124_spill] sm:$0xff]  ;;  %2111 = vmatprep.mubr.f32.mxu0 %v8653_v41 }
 0x1a6   :  { %v1558_v46 = vmul.f32 %v8553_v51, %v8691_v53  ;;  %2267 = vmatmul.mubr.f32.gmra.mxu1 %v6425_v62  ;;  %v1843_v12 = vmax.f32 %v8695_v58, 0.0  ;;  %v6450_v59 = vadd.f32 %v1565_v25, %v1301_v43  ;;  %v510_v31 = vadd.f32 %v8690_v42, %v302_v57  ;;  %2518 = vmatprep.subr.mxu1 %v1862_v1 }
 0x1a7   :  { %2356 = vmatpush1.msra.mxu0 %v8693_v35  ;;  %v299_v49 = vmul.f32 %v8555_v15, %v8682_v3  ;;  %v1845_v47 = vmax.f32 %v8696_v17, 0.0  ;;  %v1292_v35 = vadd.f32 %v1164_v33, %v900_v44  ;;  %v771_v40 = vmul.f32 %v8556_v56, %v8686_v28  ;;  %2519 = vmatpush1.msra.mxu1 %v1861_v38  ;;  %v8701_v17 = vld [vmem:[#allocation56_spill] sm:$0xff] }
 0x1a8   :  { %2357 = vmatprep.subr.mxu0 %v1860_v27  ;;  %v1163_v58 = vmul.f32 %v8629_v32, %v8687_v6  ;;  %v1836_v25 = vmax.f32 %v6190_v26, 0.0  ;;  %v902_v43 = vadd.f32 %v774_v50, %v510_v31  ;;  %v1555_v21 = vmul.f32 %v8372_v54, %v8691_v53  ;;  %2520 = vmatprep.subr.mxu1 %v1854_v0  ;;  %v6469_v27 = vld [vmem:[%s7848_s3 + $0x20] sm:$0xff]  ;;  %v8700_v31 = vld [vmem:[#allocation79_spill] sm:$0xff] }
 0x1a9   :  { %2358 = vmatpush1.msra.mxu0 %v1859_v5  ;;  %v507_v57 = vadd.f32 %v8690_v42, %v299_v49  ;;  %v1838_v1 = vmax.f32 %v6193_v19, 0.0  ;;  %v6472_v33 = vadd.f32 %v1556_v4, %v1292_v35  ;;  %v301_v26 = vmul.f32 %v8632_v30, %v8682_v3  ;;  %2272 = vmatprep.mubr.f32.mxu1 %v8653_v41  ;;  %v8697_v4 = vld [vmem:[#allocation76_spill] sm:$0xff] }
 0x1aa   :  { %2359 = vmatprep.subr.mxu0 %v1852_v18  ;;  %v773_v5 = vmul.f32 %v8477_v9, %v8686_v28  ;;  %v1835_v38 = vmax.f32 %v6210_v61, 0.0  ;;  %v1294_v18 = vadd.f32 %v1166_v24, %v902_v43  ;;  %v1165_v50 = vmul.f32 %v8600_v60, %v8687_v6  ;;  %2521 = vmatpush1.msra.mxu1 %v1853_v14  ;;  %v8698_v6 = vld [vmem:[#allocation105_spill] sm:$0xff] }
 0x1ab   :  { %v899_v0 = vadd.f32 %v771_v40, %v507_v57  ;;  %2360 = vmatpush1.msra.mxu0 %v1851_v52  ;;  %v1837_v19 = vmax.f32 %v6245_v37, 0.0  ;;  %v509_v3 = vadd.f32 %v8690_v42, %v301_v26  ;;  %v1557_v28 = vmul.f32 %v8601_v2, %v8691_v53  ;;  %2273 = vmatmul.mubr.f32.gmra.mxu1 %v6469_v27  ;;  %v8699_v14 = vld [vmem:[#allocation65_spill] sm:$0xff]  ;;  %v8702_v40 = vld [vmem:[#allocation118_spill] sm:$0xff] }
 0x1ac   :  { %v292_v44 = vmul.f32 %v8603_v20, %v8697_v4  ;;  %2112 = vmatmul.mubr.f32.gmra.mxu0 %v6469_v27  ;;  %v1828_v61 = vmax.f32 %v6279_v36, 0.0  ;;  %v6492_v24 = vadd.f32 %v1558_v46, %v1294_v18  ;;  %v764_v37 = vmul.f32 %v8605_v48, %v8698_v6  ;;  %2361 = vmatprep.subr.mxu0 %v1844_v10 }
 0x1ad   :  { %v1291_v52 = vadd.f32 %v1163_v58, %v899_v0  ;;  %2522 = vmatprep.subr.mxu1 %v1846_v29  ;;  %v1830_v42 = vmax.f32 %v8699_v14, 0.0  ;;  %v901_v53 = vadd.f32 %v773_v5, %v509_v3  ;;  %v1156_v35 = vmul.f32 %v8402_v23, %v8701_v17  ;;  %2362 = vmatpush1.msra.mxu0 %v1843_v12  ;;  %v6510_v29 = vld [vmem:[%s7848_s3 + $0x28] sm:$0xff] }
 0x1ae   :  { %v500_v49 = vadd.f32 %v8700_v31, %v292_v44  ;;  %2523 = vmatpush1.msra.mxu1 %v1845_v47  ;;  %v1827_v36 = vmax.f32 %v6344_v34, 0.0  ;;  %v1548_v58 = vmul.f32 %v8409_v63, %v8702_v40  ;;  %v294_v10 = vmul.f32 %v8498_v55, %v8697_v4  ;;  %2363 = vmatprep.subr.mxu0 %v1836_v25 }
 0x1af   :  { %v6501_v46 = vadd.f32 %v1555_v21, %v1291_v52  ;;  %2524 = vmatprep.subr.mxu1 %v1838_v1  ;;  %v1829_v12 = vmax.f32 %v6361_v16, 0.0  ;;  %v1293_v47 = vadd.f32 %v1165_v50, %v901_v53  ;;  %v766_v34 = vmul.f32 %v8472_v22, %v8698_v6  ;;  %2117 = vmatprep.mubr.f32.mxu0 %v8653_v41 }
 0x1b0   :  { %v892_v43 = vadd.f32 %v764_v37, %v500_v49  ;;  %2278 = vmatprep.mubr.f32.mxu1 %v8653_v41  ;;  %v1820_v57 = vmax.f32 %v6381_v13, 0.0  ;;  %v502_v25 = vadd.f32 %v8700_v31, %v294_v10  ;;  %v1158_v21 = vmul.f32 %v8405_v45, %v8701_v17  ;;  %2364 = vmatpush1.msra.mxu0 %v1835_v38  ;;  %v8703_v49 = vld [vmem:[#allocation14_spill] sm:$0xff] }
 0x1b1   :  { %v1550_v1 = vmul.f32 %v8553_v51, %v8702_v40  ;;  %2525 = vmatpush1.msra.mxu1 %v1837_v19  ;;  %v1822_v16 = vmax.f32 %v6407_v8, 0.0  ;;  %v1685_v26 = vadd.f32 %v1557_v28, %v1293_v47  ;;  %v291_v18 = vmul.f32 %v8555_v15, %v8697_v4  ;;  %2118 = vmatmul.mubr.f32.gmra.mxu0 %v6510_v29 }
 0x1b2   :  { %v1284_v5 = vadd.f32 %v1156_v35, %v892_v43  ;;  %2279 = vmatmul.mubr.f32.gmra.mxu1 %v6510_v29  ;;  %v1819_v13 = vmax.f32 %v6428_v7, 0.0  ;;  %v894_v0 = vadd.f32 %v766_v34, %v502_v25  ;;  %v763_v50 = vmul.f32 %v8556_v56, %v8698_v6  ;;  %2365 = vmatprep.subr.mxu0 %v1828_v61  ;;  %v8707_v43 = vld [vmem:[#allocation127_spill] sm:$0xff] }
 0x1b3   :  { %v1155_v38 = vmul.f32 %v8629_v32, %v8701_v17  ;;  %2526 = vmatprep.subr.mxu1 %v1830_v42  ;;  %v1821_v8 = vmax.f32 %v6450_v59, 0.0  ;;  %v499_v3 = vadd.f32 %v8700_v31, %v291_v18  ;;  %v1547_v28 = vmul.f32 %v8372_v54, %v8702_v40  ;;  %2366 = vmatpush1.msra.mxu0 %v1827_v36  ;;  %v6545_v59 = vld [vmem:[%s7848_s3 + $0x30] sm:$0xff] }
 0x1b4   :  { %v1676_v19 = vadd.f32 %v1548_v58, %v1284_v5  ;;  %2527 = vmatpush1.msra.mxu1 %v1829_v12  ;;  %v1812_v7 = vmax.f32 %v6472_v33, 0.0  ;;  %v1286_v44 = vadd.f32 %v1158_v21, %v894_v0  ;;  %v293_v52 = vmul.f32 %v8632_v30, %v8697_v4  ;;  %2367 = vmatprep.subr.mxu0 %v1820_v57 }
 0x1b5   :  { %v765_v61 = vmul.f32 %v8477_v9, %v8698_v6  ;;  %2528 = vmatprep.subr.mxu1 %v1822_v16  ;;  %v1814_v37 = vmax.f32 %v6492_v24, 0.0  ;;  %v891_v14 = vadd.f32 %v763_v50, %v499_v3  ;;  %v1157_v33 = vmul.f32 %v8600_v60, %v8701_v17  ;;  %2123 = vmatprep.mubr.f32.mxu0 %v8653_v41  ;;  %v8704_v17 = vld [vmem:[#allocation46_spill] sm:$0xff] }
 0x1b6   :  { %v1549_v42 = vmul.f32 %v8601_v2, %v8702_v40  ;;  %2284 = vmatprep.mubr.f32.mxu1 %v8653_v41  ;;  %v1811_v4 = vmax.f32 %v6501_v46, 0.0  ;;  %v1678_v6 = vadd.f32 %v1550_v1, %v1286_v44  ;;  %v501_v53 = vadd.f32 %v8700_v31, %v293_v52  ;;  %2368 = vmatpush1.msra.mxu0 %v1819_v13  ;;  %v8705_v40 = vld [vmem:[#allocation29_spill] sm:$0xff]  ;;  %v8706_v31 = vld [vmem:[#allocation70_spill] sm:$0xff] }
 0x1b7   :  { %v284_v35 = vmul.f32 %v8603_v20, %v8703_v49  ;;  %2529 = vmatpush1.msra.mxu1 %v1821_v8  ;;  %v1813_v24 = vmax.f32 %v1685_v26, 0.0  ;;  %v1283_v36 = vadd.f32 %v1155_v38, %v891_v14  ;;  %v756_v58 = vmul.f32 %v8605_v48, %v8704_v17  ;;  %2124 = vmatmul.mubr.f32.gmra.mxu0 %v6545_v59  ;;  %v6574_v26 = vld [vmem:[%s7848_s3 + $0x38] sm:$0xff]  ;;  %v2816_v52 = vld [vmem:[%s7851_s6 + $0x28] sm:$0xff] }
 0x1b8   :  { %v1148_v10 = vmul.f32 %v8402_v23, %v8705_v40  ;;  %2285 = vmatmul.mubr.f32.gmra.mxu1 %v6545_v59  ;;  %v1804_v46 = vmax.f32 %v1676_v19, 0.0  ;;  %v893_v12 = vadd.f32 %v765_v61, %v501_v53  ;;  %v1540_v34 = vmul.f32 %v8409_v63, %v8707_v43  ;;  %2369 = vmatprep.subr.mxu0 %v1812_v7 }
 0x1b9   :  { %v492_v47 = vadd.f32 %v8706_v31, %v284_v35  ;;  %2530 = vmatprep.subr.mxu1 %v1814_v37  ;;  %v1806_v57 = vmax.f32 %v1678_v6, 0.0  ;;  %v1675_v25 = vadd.f32 %v1547_v28, %v1283_v36  ;;  %v286_v21 = vmul.f32 %v8498_v55, %v8703_v49  ;;  %2370 = vmatpush1.msra.mxu0 %v1811_v4  ;;  %v8708_v36 = vld [vmem:[#allocation10_spill] sm:$0xff] }
 0x1ba   :  { %v758_v1 = vmul.f32 %v8472_v22, %v8704_v17  ;;  %2531 = vmatpush1.msra.mxu1 %v1813_v24  ;;  %v1285_v16 = vadd.f32 %v1157_v33, %v893_v12  ;;  %v1150_v18 = vmul.f32 %v8405_v45, %v8705_v40  ;;  %2371 = vmatprep.subr.mxu0 %v1804_v46  ;;  %v6601_v33 = vld [vmem:[%s7848_s3 + $0x40] sm:$0xff] }
 0x1bb   :  { %v884_v5 = vadd.f32 %v756_v58, %v492_v47  ;;  %2532 = vmatprep.subr.mxu1 %v1806_v57  ;;  %v1803_v13 = vmax.f32 %v1675_v25, 0.0  ;;  %v494_v0 = vadd.f32 %v8706_v31, %v286_v21  ;;  %v1542_v50 = vmul.f32 %v8553_v51, %v8707_v43  ;;  %2129 = vmatprep.mubr.f32.mxu0 %v8653_v41  ;;  %v8709_v47 = vld [vmem:[#allocation123_spill] sm:$0xff]  ;;  %v6626_v21 = vld [vmem:[%s7848_s3 + $0x48] sm:$0xff] }
 0x1bc   :  { %v283_v38 = vmul.f32 %v8555_v15, %v8703_v49  ;;  %2290 = vmatprep.mubr.f32.mxu1 %v8653_v41  ;;  %v1677_v8 = vadd.f32 %v1549_v42, %v1285_v16  ;;  %v755_v3 = vmul.f32 %v8556_v56, %v8704_v17  ;;  %v1147_v44 = vmul.f32 %v8629_v32, %v8705_v40  ;;  %v8711_v25 = vld [vmem:[#allocation119_spill] sm:$0xff] }
 0x1bd   :  { %v1276_v19 = vadd.f32 %v1148_v10, %v884_v5  ;;  %2372 = vmatpush1.msra.mxu0 %v1803_v13  ;;  %2291 = vmatmul.mubr.f32.gmra.mxu1 %v6574_v26  ;;  %v886_v28 = vadd.f32 %v758_v1, %v494_v0  ;;  %v285_v14 = vmul.f32 %v8632_v30, %v8703_v49 }
 0x1be   :  { %v491_v7 = vadd.f32 %v8706_v31, %v283_v38  ;;  %v1805_v61 = vmax.f32 %v1677_v8, 0.0  ;;  %2130 = vmatmul.mubr.f32.gmra.mxu0 %v6574_v26  ;;  %2296 = vmatprep.mubr.f32.mxu1 %v8653_v41  ;;  %v1539_v6 = vmul.f32 %v8372_v54, %v8707_v43  ;;  %v757_v53 = vmul.f32 %v8477_v9, %v8704_v17  ;;  %v2815_v38 = vld [vmem:[%s7851_s6 + $0x20] sm:$0xff] }
 0x1bf   :  { %v1668_v37 = vadd.f32 %v1540_v34, %v1276_v19  ;;  %v1278_v42 = vadd.f32 %v1150_v18, %v886_v28  ;;  %2135 = vmatprep.mubr.f32.mxu0 %v8653_v41  ;;  %v493_v49 = vadd.f32 %v8706_v31, %v285_v14  ;;  %v1149_v24 = vmul.f32 %v8600_v60, %v8705_v40  ;;  %v8710_v31 = vld [vmem:[#allocation16_spill] sm:$0xff] }
 0x1c0   :  { %v883_v4 = vadd.f32 %v755_v3, %v491_v7  ;;  %2533 = vmatpush1.msra.mxu1 %v1805_v61  ;;  %v276_v58 = vmul.f32 %v8603_v20, %v8708_v36  ;;  %2854 = vperm.xlu1 %3999, %v2816_v52   ;;  %v1541_v12 = vmul.f32 %v8601_v2, %v8707_v43  ;;  %v2818_v61 = vld [vmem:[%s7851_s6 + $0x38] sm:$0xff] }
 0x1c1   :  { %v1796_v35 = vmax.f32 %v1668_v37, 0.0  ;;  %v1670_v10 = vadd.f32 %v1542_v50, %v1278_v42  ;;  %v748_v17 = vmul.f32 %v8605_v48, %v8709_v47  ;;  %2297 = vmatmul.mubr.f32.gmra.mxu1 %v6601_v33  ;;  %v885_v34 = vadd.f32 %v757_v53, %v493_v49  ;;  %v8712_v48 = vld [vmem:[#allocation120_spill] sm:$0xff]  ;;  %2849 = vperm.xlu0 %4000, %v2815_v38   ;;  %v2820_v49 = vld [vmem:[%s7851_s6 + $0x48] sm:$0xff] }
 0x1c2   :  { %v1275_v46 = vadd.f32 %v1147_v44, %v883_v4  ;;  %v484_v57 = vadd.f32 %v8710_v31, %v276_v58  ;;  %v1140_v40 = vmul.f32 %v8402_v23, %v8711_v25  ;;  %v278_v20 = vmul.f32 %v8498_v55, %v8708_v36  ;;  %2136 = vmatmul.mubr.f32.gmra.mxu0 %v6601_v33  ;;  %v6676_v42 = vld [vmem:[%s7848_s3 + $0x58] sm:$0xff] }
 0x1c3   :  { %2373 = vmatprep.subr.mxu0 %v1796_v35  ;;  %v1798_v43 = vmax.f32 %v1670_v10, 0.0  ;;  %v1532_v16 = vmul.f32 %v8409_v63, %v8712_v48  ;;  %v750_v5 = vmul.f32 %v8472_v22, %v8709_v47  ;;  %2302 = vmatprep.mubr.f32.mxu1 %v8653_v41  ;;  %v1277_v23 = vadd.f32 %v1149_v24, %v885_v34  ;;  %v2817_v35 = vld [vmem:[%s7851_s6 + $0x30] sm:$0xff]  ;;  %v6693_v10 = vld [vmem:[%s7848_s3 + $0x60] sm:$0xff] }
 0x1c4   :  { %v1667_v1 = vadd.f32 %v1539_v6, %v1275_v46  ;;  %v876_v18 = vadd.f32 %v748_v17, %v484_v57  ;;  %v486_v55 = vadd.f32 %v8710_v31, %v278_v20  ;;  %v1142_v13 = vmul.f32 %v8405_v45, %v8711_v25  ;;  %2141 = vmatprep.mubr.f32.mxu0 %v8653_v41  ;;  %v6708_v17 = vld [vmem:[%s7848_s3 + $0x68] sm:$0xff]  ;;  %v2821_v34 = vld [vmem:[%s7851_s6 + $0x50] sm:$0xff]  ;;  %v6738_v20 = vld [vmem:[%s7848_s3 + $0x78] sm:$0xff] }
 0x1c5   :  { %2534 = vmatprep.subr.mxu1 %v1798_v43  ;;  %v275_v63 = vmul.f32 %v8555_v15, %v8708_v36  ;;  %v747_v22 = vmul.f32 %v8556_v56, %v8709_v47  ;;  %v1139_v50 = vmul.f32 %v8629_v32, %v8711_v25  ;;  %2303 = vmatmul.mubr.f32.gmra.mxu1 %v6626_v21  ;;  %v6654_v15 = vld [vmem:[%s7848_s3 + $0x50] sm:$0xff] }
 0x1c6   :  { %v1795_v0 = vmax.f32 %v1667_v1, 0.0  ;;  %v1669_v45 = vadd.f32 %v1541_v12, %v1277_v23  ;;  %v1268_v8 = vadd.f32 %v1140_v40, %v876_v18  ;;  %v878_v19 = vadd.f32 %v750_v5, %v486_v55  ;;  %2308 = vmatprep.mubr.f32.mxu1 %v8653_v41  ;;  %2142 = vmatmul.mubr.f32.gmra.mxu0 %v6626_v21  ;;  %v2819_v12 = vld [vmem:[%s7851_s6 + $0x40] sm:$0xff]  ;;  %v6723_v57 = vld [vmem:[%s7848_s3 + $0x70] sm:$0xff]  ;;  %v2826_v40 = vld [vmem:[%s7851_s6 + $0x78] sm:$0xff] }
 0x1c7   :  { %v1534_v3 = vmul.f32 %v8553_v51, %v8712_v48  ;;  %v483_v56 = vadd.f32 %v8710_v31, %v275_v63  ;;  %v277_v32 = vmul.f32 %v8632_v30, %v8708_v36  ;;  %v749_v28 = vmul.f32 %v8477_v9, %v8709_v47  ;;  %2147 = vmatprep.mubr.f32.mxu0 %v8653_v41  ;;  %v2822_v47 = vld [vmem:[%s7851_s6 + $0x58] sm:$0xff]  ;;  %v2825_v43 = vld [vmem:[%s7851_s6 + $0x70] sm:$0xff]  ;;  %v8713_v1 = vld [vmem:[#allocation78_spill] sm:$0xff] }
 0x1c8   :  { %2374 = vmatpush1.msra.mxu0 %v1795_v0  ;;  %v1141_v7 = vmul.f32 %v8600_v60, %v8711_v25  ;;  %v1797_v51 = vmax.f32 %v1669_v45, 0.0  ;;  %v1660_v44 = vadd.f32 %v1532_v16, %v1268_v8  ;;  %v1270_v52 = vadd.f32 %v1142_v13, %v878_v19  ;;  %2864 = vperm.xlu1 %3999, %v2818_v61   ;;  %v2823_v25 = vld [vmem:[%s7851_s6 + $0x60] sm:$0xff] }
 0x1c9   :  { %v875_v37 = vadd.f32 %v747_v22, %v483_v56  ;;  %v1531_v30 = vmul.f32 %v8372_v54, %v8712_v48  ;;  %v485_v14 = vadd.f32 %v8710_v31, %v277_v32  ;;  %2309 = vmatmul.mubr.f32.gmra.mxu1 %v6654_v15  ;;  %v1533_v54 = vmul.f32 %v8601_v2, %v8712_v48  ;;  %v2824_v31 = vld [vmem:[%s7851_s6 + $0x68] sm:$0xff] }
 0x1ca   :  { %2535 = vmatpush1.msra.mxu1 %v1797_v51  ;;  %v1788_v9 = vmax.f32 %v1660_v44, 0.0  ;;  %v1662_v60 = vadd.f32 %v1534_v3, %v1270_v52  ;;  %2314 = vmatprep.mubr.f32.mxu1 %v8653_v41 }
 0x1cb   :  { %v1267_v4 = vadd.f32 %v1139_v50, %v875_v37  ;;  %v877_v6 = vadd.f32 %v749_v28, %v485_v14  ;;  %2148 = vmatmul.mubr.f32.gmra.mxu0 %v6654_v15  ;;  %2859 = vperm.xlu0 %4000, %v2817_v35  }
 0x1cc   :  { %2375 = vmatprep.subr.mxu0 %v1788_v9  ;;  %v1790_v53 = vmax.f32 %v1662_v60, 0.0  ;;  %2153 = vmatprep.mubr.f32.mxu0 %v8653_v41 }
 0x1cd   :  { %v1659_v24 = vadd.f32 %v1531_v30, %v1267_v4  ;;  %v1269_v36 = vadd.f32 %v1141_v7, %v877_v6  ;;  %2315 = vmatmul.mubr.f32.gmra.mxu1 %v6676_v42  ;;  %2874 = vperm.xlu1 %3999, %v2820_v49   ;;  %v6895_v6 = vpop.permute.xlu1 %2020 }
 0x1ce   :  { %2536 = vmatprep.subr.mxu1 %v1790_v53  ;;  %2320 = vmatprep.mubr.f32.mxu1 %v8653_v41  ;;  %8734 = vst [vmem:[#allocation74_spill] sm:$0xff] %v6895_v6 }
 0x1cf   :  { %v1787_v2 = vmax.f32 %v1659_v24, 0.0  ;;  %v1661_v58 = vadd.f32 %v1533_v54, %v1269_v36  ;;  %2154 = vmatmul.mubr.f32.gmra.mxu0 %v6676_v42  ;;  %2869 = vperm.xlu0 %4000, %v2819_v12  }
 0x1d0   :  { %2159 = vmatprep.mubr.f32.mxu0 %v8653_v41 }
 0x1d1   :  { %2376 = vmatpush1.msra.mxu0 %v1787_v2  ;;  %v1789_v46 = vmax.f32 %v1661_v58, 0.0  ;;  %2321 = vmatmul.mubr.f32.gmra.mxu1 %v6693_v10  ;;  %v6905_v2 = vpop.permute.xlu1 %2010 }
 0x1d2   :  { %2326 = vmatprep.mubr.f32.mxu1 %v8653_v41  ;;  %2884 = vperm.xlu1 %3999, %v2822_v47   ;;  %v6909_v47 = vpop.permute.xlu0 %2015 }
 0x1d3   :  { %2537 = vmatpush1.msra.mxu1 %v1789_v46  ;;  %2160 = vmatmul.mubr.f32.gmra.mxu0 %v6693_v10 }
 0x1d4   :  { %2165 = vmatprep.mubr.f32.mxu0 %v8653_v41  ;;  %2879 = vperm.xlu0 %4000, %v2821_v34  }
 0x1d5   :  { %2327 = vmatmul.mubr.f32.gmra.mxu1 %v6708_v17 }
 0x1d6   :  { %2332 = vmatprep.mubr.f32.mxu1 %v8653_v41  ;;  %2894 = vperm.xlu1 %3999, %v2824_v31   ;;  %v6911_v31 = vpop.permute.xlu1 %2005 }
 0x1d7   :  { %2166 = vmatmul.mubr.f32.gmra.mxu0 %v6708_v17 }
 0x1d8   :  { %2171 = vmatprep.mubr.f32.mxu0 %v8653_v41  ;;  %2889 = vperm.xlu0 %4000, %v2823_v25  }
 0x1d9   :  { %2333 = vmatmul.mubr.f32.gmra.mxu1 %v6723_v57 }
 0x1da   :  { %2338 = vmatprep.mubr.f32.mxu1 %v8653_v41  ;;  %2904 = vperm.xlu1 %3999, %v2826_v40  }
 0x1db   :  { %2172 = vmatmul.mubr.f32.gmra.mxu0 %v6723_v57 }
 0x1dc   :  { %2177 = vmatprep.mubr.f32.mxu0 %v8653_v41  ;;  %2899 = vperm.xlu0 %4000, %v2825_v43   ;;  %v6913_v43 = vpop.permute.xlu0 %2000 }
 0x1dd   :  { %2339 = vmatmul.mubr.f32.gmra.mxu1 %v6738_v20 }
 0x1de   :  { %2570 = vmatprep.mubr.f32.mxu1 %v8653_v41 }
 0x1df   :  { %2178 = vmatmul.mubr.f32.gmra.mxu0 %v6738_v20 }
 0x1e0   :  { %2409 = vmatprep.mubr.f32.mxu0 %v8653_v41 }
 0x1e1   :  { %2571 = vmatmul.mubr.f32.vlgmr.msra.gmra.mxu1 %v8713_v1 }
 0x1e2   :  { %2576 = vmatprep.mubr.f32.mxu1 %v8653_v41 }
 0x1e3   :  { %2410 = vmatmul.mubr.f32.vlgmr.msra.gmra.mxu0 %v8713_v1 }
 0x1e4   :  { %2415 = vmatprep.mubr.f32.mxu0 %v8653_v41 }
 0x1e5   :  { %2577 = vmatmul.mubr.f32.gmra.mxu1 %v6317_v11 }
 0x1e6   :  { %2582 = vmatprep.mubr.f32.mxu1 %v8653_v41 }
 0x1e7   :  { %2416 = vmatmul.mubr.f32.gmra.mxu0 %v6317_v11 }
 0x1e8   :  { %2421 = vmatprep.mubr.f32.mxu0 %v8653_v41 }
 0x1e9   :  { %2583 = vmatmul.mubr.f32.gmra.mxu1 %v6372_v39 }
 0x1ea   :  { %2588 = vmatprep.mubr.f32.mxu1 %v8653_v41 }
 0x1eb   :  { %2422 = vmatmul.mubr.f32.gmra.mxu0 %v6372_v39 }
 0x1ec   :  { %2427 = vmatprep.mubr.f32.mxu0 %v8653_v41 }
 0x1ed   :  { %2589 = vmatmul.mubr.f32.gmra.mxu1 %v6425_v62 }
 0x1ee   :  { %2594 = vmatprep.mubr.f32.mxu1 %v8653_v41 }
 0x1ef   :  { %2428 = vmatmul.mubr.f32.gmra.mxu0 %v6425_v62 }
 0x1f0   :  { %2433 = vmatprep.mubr.f32.mxu0 %v8653_v41 }
 0x1f1   :  { %2595 = vmatmul.mubr.f32.gmra.mxu1 %v6469_v27 }
 0x1f2   :  { %2600 = vmatprep.mubr.f32.mxu1 %v8653_v41 }
 0x1f3   :  { %2434 = vmatmul.mubr.f32.gmra.mxu0 %v6469_v27 }
 0x1f4   :  { %2439 = vmatprep.mubr.f32.mxu0 %v8653_v41 }
 0x1f5   :  { %2601 = vmatmul.mubr.f32.gmra.mxu1 %v6510_v29 }
 0x1f6   :  { %2606 = vmatprep.mubr.f32.mxu1 %v8653_v41 }
 0x1f7   :  { %2440 = vmatmul.mubr.f32.gmra.mxu0 %v6510_v29 }
 0x1f8   :  { %2445 = vmatprep.mubr.f32.mxu0 %v8653_v41 }
 0x1f9   :  { %2607 = vmatmul.mubr.f32.gmra.mxu1 %v6545_v59 }
 0x1fa   :  { %2612 = vmatprep.mubr.f32.mxu1 %v8653_v41 }
 0x1fb   :  { %2446 = vmatmul.mubr.f32.gmra.mxu0 %v6545_v59 }
 0x1fc   :  { %2451 = vmatprep.mubr.f32.mxu0 %v8653_v41 }
 0x1fd   :  { %2613 = vmatmul.mubr.f32.gmra.mxu1 %v6574_v26 }
 0x1fe   :  { %2618 = vmatprep.mubr.f32.mxu1 %v8653_v41 }
 0x1ff   :  { %2452 = vmatmul.mubr.f32.gmra.mxu0 %v6574_v26 }
 0x200   :  { %2457 = vmatprep.mubr.f32.mxu0 %v8653_v41 }
 0x201   :  { %2619 = vmatmul.mubr.f32.gmra.mxu1 %v6601_v33 }
 0x202   :  { %2624 = vmatprep.mubr.f32.mxu1 %v8653_v41 }
 0x203   :  { %2458 = vmatmul.mubr.f32.gmra.mxu0 %v6601_v33 }
 0x204   :  { %2463 = vmatprep.mubr.f32.mxu0 %v8653_v41 }
 0x205   :  { %2625 = vmatmul.mubr.f32.gmra.mxu1 %v6626_v21 }
 0x206   :  { %2630 = vmatprep.mubr.f32.mxu1 %v8653_v41 }
 0x207   :  { %2464 = vmatmul.mubr.f32.gmra.mxu0 %v6626_v21 }
 0x208   :  { %2469 = vmatprep.mubr.f32.mxu0 %v8653_v41 }
 0x209   :  { %2631 = vmatmul.mubr.f32.gmra.mxu1 %v6654_v15 }
 0x20a   :  { %2636 = vmatprep.mubr.f32.mxu1 %v8653_v41 }
 0x20b   :  { %2470 = vmatmul.mubr.f32.gmra.mxu0 %v6654_v15 }
 0x20c   :  { %2475 = vmatprep.mubr.f32.mxu0 %v8653_v41 }
 0x20d   :  { %2637 = vmatmul.mubr.f32.gmra.mxu1 %v6676_v42 }
 0x20e   :  { %2642 = vmatprep.mubr.f32.mxu1 %v8653_v41 }
 0x20f   :  { %2476 = vmatmul.mubr.f32.gmra.mxu0 %v6676_v42 }
 0x210   :  { %2481 = vmatprep.mubr.f32.mxu0 %v8653_v41 }
 0x211   :  { %2643 = vmatmul.mubr.f32.gmra.mxu1 %v6693_v10 }
 0x212   :  { %2648 = vmatprep.mubr.f32.mxu1 %v8653_v41 }
 0x213   :  { %2482 = vmatmul.mubr.f32.gmra.mxu0 %v6693_v10 }
 0x214   :  { %2487 = vmatprep.mubr.f32.mxu0 %v8653_v41 }
 0x215   :  { %2649 = vmatmul.mubr.f32.gmra.mxu1 %v6708_v17 }
 0x216   :  { %2654 = vmatprep.mubr.f32.mxu1 %v8653_v41 }
 0x217   :  { %2488 = vmatmul.mubr.f32.gmra.mxu0 %v6708_v17 }
 0x218   :  { %2493 = vmatprep.mubr.f32.mxu0 %v8653_v41 }
 0x219   :  { %2655 = vmatmul.mubr.f32.gmra.mxu1 %v6723_v57 }
 0x21a   :  { %2660 = vmatprep.mubr.f32.mxu1 %v8653_v41 }
 0x21b   :  { %2494 = vmatmul.mubr.f32.gmra.mxu0 %v6723_v57 }
 0x21c   :  { %2499 = vmatprep.mubr.f32.mxu0 %v8653_v41 }
 0x21d   :  { %2661 = vmatmul.mubr.f32.gmra.mxu1 %v6738_v20 }
 0x21e   :  { %3132 = vmatprep.mubr.f32.mxu1 %v8653_v41 }
 0x21f   :  { %2500 = vmatmul.mubr.f32.gmra.mxu0 %v6738_v20 }
 0x220   :  { %2971 = vmatprep.mubr.f32.mxu0 %v8653_v41 }
 0x250   :  { %v6813_v11 = vpop.f32.mrf.mxu0 }
 0x251   :  { %8714 = vst [vmem:[#allocation115_spill] sm:$0xff] %v6813_v11  ;;  %v6815_v39 = vpop.f32.mrf.mxu1  ;;  %v6915_v11 = vpop.permute.xlu1 %1995 }
 0x252   :  { %8715 = vst [vmem:[#allocation30_spill] sm:$0xff] %v6815_v39  ;;  %v6817_v62 = vpop.f32.mrf.mxu0 }
 0x253   :  { %8716 = vst [vmem:[#allocation116_spill] sm:$0xff] %v6817_v62  ;;  %v6819_v27 = vpop.f32.mrf.mxu1 }
 0x254   :  { %8717 = vst [vmem:[#allocation40_spill] sm:$0xff] %v6819_v27 }
 0x258   :  { %v6821_v29 = vpop.f32.mrf.mxu0  ;;  %v6823_v59 = vpop.f32.mrf.mxu1 }
 0x259   :  { %8718 = vst [vmem:[#allocation67_spill] sm:$0xff] %v6821_v29  ;;  %8719 = vst [vmem:[#allocation11_spill] sm:$0xff] %v6823_v59 }
 0x25a   :  { %v6825_v26 = vpop.f32.mrf.mxu0  ;;  %v6827_v33 = vpop.f32.mrf.mxu1 }
 0x25b   :  { %8720 = vst [vmem:[#allocation99_spill] sm:$0xff] %v6825_v26  ;;  %8721 = vst [vmem:[#allocation101_spill] sm:$0xff] %v6827_v33 }
 0x25c   :  { %v6829_v21 = vpop.f32.mrf.mxu0 }
 0x25d   :  { %8722 = vst [vmem:[#allocation106_spill] sm:$0xff] %v6829_v21  ;;  %v6831_v48 = vpop.f32.mrf.mxu1  ;;  %v6918_v21 = vpop.permute.xlu0 %1990 }
 0x25e   :  { %8723 = vst [vmem:[#allocation125_spill] sm:$0xff] %v6831_v48  ;;  %v6833_v16 = vpop.f32.mrf.mxu0 }
 0x25f   :  { %8724 = vst [vmem:[#allocation126_spill] sm:$0xff] %v6833_v16  ;;  %v6835_v5 = vpop.f32.mrf.mxu1 }
 0x260   :  { %8725 = vst [vmem:[#allocation8_spill] sm:$0xff] %v6835_v5  ;;  %v6926_v5 = vpop.permute.xlu1 %1985 }
 0x262   :  { %v6837_v23 = vpop.f32.mrf.mxu0 }
 0x263   :  { %8726 = vst [vmem:[#allocation45_spill] sm:$0xff] %v6837_v23 }
 0x264   :  { %v6841_v55 = vpop.f32.mrf.mxu0 }
 0x265   :  { %8728 = vst [vmem:[#allocation47_spill] sm:$0xff] %v6841_v55 }
 0x266   :  { %v6839_v18 = vpop.f32.mrf.mxu1 }
 0x267   :  { %8727 = vst [vmem:[#allocation12_spill] sm:$0xff] %v6839_v18 }
 0x268   :  { %v6843_v13 = vpop.f32.mrf.mxu1 }
 0x269   :  { %8729 = vst [vmem:[#allocation25_spill] sm:$0xff] %v6843_v13 }
 0x26b   :  { %v6847_v63 = vpop.f32.mrf.mxu1 }
 0x26c   :  { %v6845_v0 = vpop.f32.mrf.mxu0  ;;  %8731 = vst [vmem:[#allocation21_spill] sm:$0xff] %v6847_v63 }
 0x26d   :  { %8730 = vst [vmem:[#allocation19_spill] sm:$0xff] %v6845_v0  ;;  %v6851_v50 = vpop.f32.mrf.mxu1 }
 0x26e   :  { %v6849_v22 = vpop.f32.mrf.mxu0 }
 0x26f   :  { %8732 = vst [vmem:[#allocation117_spill] sm:$0xff] %v6849_v22 }
 0x271   :  { %v6853_v38 = vpop.f32.mrf.mxu0 }
 0x272   :  { %8733 = vst [vmem:[#allocation68_spill] sm:$0xff] %v6853_v38  ;;  %v6855_v45 = vpop.f32.mrf.mxu1 }
 0x273   :  { %v6857_v8 = vpop.f32.mrf.mxu0 }
 0x274   :  { %v6859_v19 = vpop.f32.mrf.mxu1 }
 0x277   :  { %v6861_v3 = vpop.f32.mrf.mxu0 }
 0x278   :  { %v6863_v15 = vpop.f32.mrf.mxu1 }
 0x279   :  { %v6865_v56 = vpop.f32.mrf.mxu0 }
 0x27a   :  { %v6867_v32 = vpop.f32.mrf.mxu1 }
 0x27d   :  { %v6869_v28 = vpop.f32.mrf.mxu1 }
 0x27e   :  { %v6871_v7 = vpop.f32.mrf.mxu0 }
 0x27f   :  { %v6873_v51 = vpop.f32.mrf.mxu1 }
 0x280   :  { %v6875_v44 = vpop.f32.mrf.mxu0 }
 0x281   :  { %v6877_v52 = vpop.f32.mrf.mxu1 }
 0x282   :  { %v6879_v61 = vpop.f32.mrf.mxu0 }
 0x283   :  { %v6881_v37 = vpop.f32.mrf.mxu1 }
 0x284   :  { %v6883_v30 = vpop.f32.mrf.mxu0 }
 0x285   :  { %v6885_v14 = vpop.f32.mrf.mxu1 }
 0x286   :  { %v6889_v60 = vpop.f32.mrf.mxu0 }
 0x287   :  { %v6887_v9 = vpop.f32.mrf.mxu1 }
 0x288   :  { %v6893_v4 = vpop.f32.mrf.mxu0 }
 0x289   :  { %v6891_v42 = vpop.f32.mrf.mxu1 }
 0x28b   :  { %v6897_v54 = vpop.f32.mrf.mxu1  ;;  %v6899_v53 = vpop.f32.mrf.mxu0 }
 0x28d   :  { %v2316_v35 = vpop.f32.mrf.mxu1  ;;  %v6901_v49 = vpop.f32.mrf.mxu0 }
 0x28f   :  { %v2318_v24 = vpop.f32.mrf.mxu1  ;;  %v6903_v36 = vpop.f32.mrf.mxu0 }
 0x291   :  { %v6907_v58 = vpop.f32.mrf.mxu0  ;;  %v2322_v10 = vpop.f32.mrf.mxu1 }
 0x293   :  { %v2161_v46 = vpop.f32.mrf.mxu0  ;;  %v2324_v12 = vpop.f32.mrf.mxu1 }
 0x295   :  { %v2163_v17 = vpop.f32.mrf.mxu0  ;;  %v2328_v34 = vpop.f32.mrf.mxu1 }
 0x297   :  { %v2167_v57 = vpop.f32.mrf.mxu0  ;;  %v2330_v25 = vpop.f32.mrf.mxu1 }
 0x298   :  { %v2331_v0 = vadd.f32 %v2330_v25, %v6905_v2 }
 0x299   :  { %v2169_v40 = vpop.f32.mrf.mxu0  ;;  %v2334_v20 = vpop.f32.mrf.mxu1 }
 0x29a   :  { %v2335_v33 = vadd.f32 %v2334_v20, %v6909_v47  ;;  %v2170_v38 = vadd.f32 %v2169_v40, %v6905_v2  ;;  %v2164_v40 = vadd.f32 %v2163_v17, %v6911_v31  ;;  %v2156_v17 = vadd.f32 %v6903_v36, %v6913_v43 }
 0x29b   :  { %v2173_v1 = vpop.f32.mrf.mxu0  ;;  %v2336_v41 = vpop.f32.mrf.mxu1  ;;  %v2150_v36 = vadd.f32 %v6899_v53, %v6915_v11  ;;  %v2299_v53 = vadd.f32 %v6877_v52, %v6926_v5 }
 0x29c   :  { %v2337_v59 = vadd.f32 %v2336_v41, %v6909_v47  ;;  %v2329_v41 = vadd.f32 %v2328_v34, %v6905_v2 }
 0x29d   :  { %v2175_v62 = vpop.f32.mrf.mxu0  ;;  %v2340_v29 = vpop.f32.mrf.mxu1 }
 0x29e   :  { %v2341_v26 = vadd.f32 %v2340_v29, %v6895_v6  ;;  %v2176_v29 = vadd.f32 %v2175_v62, %v6909_v47  ;;  %v2782_v63 = vmax.f32 %v2337_v59, 0.0  ;;  %v2323_v62 = vadd.f32 %v2322_v10, %v6911_v31 }
 0x29f   :  { %v2179_v39 = vpop.f32.mrf.mxu0  ;;  %v2342_v27 = vpop.f32.mrf.mxu1  ;;  %v2774_v59 = vmax.f32 %v2331_v0, 0.0  ;;  %v2313_v0 = vadd.f32 %v6897_v54, %v6915_v11 }
 0x2a0   :  { %v2343_v16 = vadd.f32 %v2342_v27, %v6895_v6  ;;  %v2180_v23 = vadd.f32 %v2179_v39, %v6895_v6  ;;  %v2174_v27 = vadd.f32 %v2173_v1, %v6909_v47  ;;  %v2789_v13 = vmax.f32 %v2341_v26, 0.0  ;;  %v6945_v1 = vpop.permute.xlu0 %1980 }
 0x2a1   :  { %v2181_v48 = vpop.f32.mrf.mxu0  ;;  %v6924_v55 = vpop.f32.mrf.mxu1 }
 0x2a2   :  { %8735 = vst [vmem:[#allocation23_spill] sm:$0xff] %v6924_v55  ;;  %v2182_v18 = vadd.f32 %v2181_v48, %v6895_v6  ;;  %v2790_v22 = vmax.f32 %v2343_v16, 0.0  ;;  %v2325_v55 = vadd.f32 %v2324_v12, %v6911_v31  ;;  %v2168_v48 = vadd.f32 %v2167_v57, %v6905_v2 }
 0x2a3   :  { %v6933_v20 = vpop.f32.mrf.mxu0  ;;  %v6935_v39 = vpop.f32.mrf.mxu1  ;;  %v2781_v16 = vmax.f32 %v2335_v33, 0.0  ;;  %v2787_v34 = vmax.f32 %v2180_v23, 0.0  ;;  %v2319_v12 = vadd.f32 %v2318_v24, %v6913_v43  ;;  %v2162_v33 = vadd.f32 %v2161_v46, %v6911_v31 }
 0x2a4   :  { %8736 = vst [vmem:[#allocation31_spill] sm:$0xff] %v6933_v20  ;;  %8737 = vst [vmem:[#allocation90_spill] sm:$0xff] %v6935_v39  ;;  %v2788_v25 = vmax.f32 %v2182_v18, 0.0  ;;  %3068 = vmatprep.subr.mxu1 %v2790_v22  ;;  %v2780_v18 = vmax.f32 %v2176_v29, 0.0  ;;  %v2317_v22 = vadd.f32 %v2316_v35, %v6913_v43  ;;  %v2773_v23 = vmax.f32 %v2329_v41, 0.0  ;;  %v6955_v20 = vpop.permute.xlu1 %1975 }
 0x2a5   :  { %v6941_v6 = vpop.f32.mrf.mxu0  ;;  %v6943_v26 = vpop.f32.mrf.mxu1  ;;  %3069 = vmatpush1.msra.mxu1 %v2789_v13  ;;  %v2779_v10 = vmax.f32 %v2174_v27, 0.0  ;;  %v2766_v24 = vmax.f32 %v2325_v55, 0.0  ;;  %v2772_v35 = vmax.f32 %v2170_v38, 0.0  ;;  %v2311_v46 = vadd.f32 %v6891_v42, %v6915_v11 }
 0x2a6   :  { %8738 = vst [vmem:[#allocation110_spill] sm:$0xff] %v6941_v6  ;;  %8739 = vst [vmem:[#allocation60_spill] sm:$0xff] %v6943_v26  ;;  %2907 = vmatprep.subr.mxu0 %v2788_v25  ;;  %3070 = vmatprep.subr.mxu1 %v2782_v63  ;;  %v2158_v63 = vadd.f32 %v6907_v58, %v6913_v43  ;;  %v2765_v29 = vmax.f32 %v2323_v62, 0.0  ;;  %v2771_v41 = vmax.f32 %v2168_v48, 0.0  ;;  %v2758_v54 = vmax.f32 %v2319_v12, 0.0 }
 0x2a7   :  { %v6951_v57 = vpop.f32.mrf.mxu0  ;;  %2908 = vmatpush1.msra.mxu0 %v2787_v34  ;;  %v6953_v13 = vpop.f32.mrf.mxu1  ;;  %3071 = vmatpush1.msra.mxu1 %v2781_v16  ;;  %v2307_v55 = vadd.f32 %v6887_v9, %v6918_v21  ;;  %v2152_v38 = vadd.f32 %v6901_v49, %v6915_v11  ;;  %v2764_v58 = vmax.f32 %v2164_v40, 0.0  ;;  %v2305_v42 = vadd.f32 %v6885_v14, %v6918_v21 }
 0x2a8   :  { %8740 = vst [vmem:[#allocation13_spill] sm:$0xff] %v6951_v57  ;;  %8741 = vst [vmem:[#allocation17_spill] sm:$0xff] %v6953_v13  ;;  %2909 = vmatprep.subr.mxu0 %v2780_v18  ;;  %3072 = vmatprep.subr.mxu1 %v2774_v59  ;;  %v2757_v62 = vmax.f32 %v2317_v22, 0.0  ;;  %v2763_v48 = vmax.f32 %v2162_v33, 0.0  ;;  %v6981_v9 = vpop.permute.xlu0 %1970  ;;  %v2301_v49 = vadd.f32 %v6881_v37, %v6926_v5  ;;  %v2750_v14 = vmax.f32 %v2313_v0, 0.0  ;;  %v6995_v37 = vpop.permute.xlu1 %1965  ;;  %v7193_v13 = vld [vmem:[%s7850_s5 + $0x28] sm:$0xff] }
 0x2a9   :  { %v6965_v27 = vpop.f32.mrf.mxu0  ;;  %2910 = vmatpush1.msra.mxu0 %v2779_v10  ;;  %v6967_v25 = vpop.f32.mrf.mxu1  ;;  %3073 = vmatpush1.msra.mxu1 %v2773_v23  ;;  %v2146_v12 = vadd.f32 %v6893_v4, %v6918_v21  ;;  %v2756_v40 = vmax.f32 %v2158_v63, 0.0  ;;  %v2144_v59 = vadd.f32 %v6889_v60, %v6918_v21  ;;  %v2749_v18 = vmax.f32 %v2311_v46, 0.0  ;;  %8748 = vst [vmem:[#allocation24_spill] sm:$0xff] %v6995_v37 }
 0x2aa   :  { %8742 = vst [vmem:[#allocation100_spill] sm:$0xff] %v6965_v27  ;;  %8743 = vst [vmem:[#allocation95_spill] sm:$0xff] %v6967_v25  ;;  %2911 = vmatprep.subr.mxu0 %v2772_v35  ;;  %3074 = vmatprep.subr.mxu1 %v2766_v24  ;;  %v2755_v22 = vmax.f32 %v2156_v17, 0.0  ;;  %v2295_v4 = vadd.f32 %v6873_v51, %v6945_v1  ;;  %v2140_v10 = vadd.f32 %v6883_v30, %v6926_v5 }
 0x2ab   :  { %v6977_v16 = vpop.f32.mrf.mxu0  ;;  %2912 = vmatpush1.msra.mxu0 %v2771_v41  ;;  %v6979_v34 = vpop.f32.mrf.mxu1  ;;  %3075 = vmatpush1.msra.mxu1 %v2765_v29  ;;  %v2742_v52 = vmax.f32 %v2307_v55, 0.0  ;;  %v2748_v0 = vmax.f32 %v2152_v38, 0.0  ;;  %v2293_v60 = vadd.f32 %v6869_v28, %v6945_v1  ;;  %v2138_v63 = vadd.f32 %v6879_v61, %v6926_v5  ;;  %8789 = vst [vmem:[#allocation37_spill] sm:$0xff] %v7193_v13 }
 0x2ac   :  { %8744 = vst [vmem:[#allocation96_spill] sm:$0xff] %v6977_v16  ;;  %8745 = vst [vmem:[#allocation94_spill] sm:$0xff] %v6979_v34  ;;  %2913 = vmatprep.subr.mxu0 %v2764_v58  ;;  %3076 = vmatprep.subr.mxu1 %v2758_v54  ;;  %v2741_v24 = vmax.f32 %v2305_v42, 0.0  ;;  %v2747_v35 = vmax.f32 %v2150_v36, 0.0  ;;  %v2289_v51 = vadd.f32 %v6867_v32, %v6955_v20  ;;  %v2734_v29 = vmax.f32 %v2301_v49, 0.0  ;;  %v7021_v32 = vpop.permute.xlu0 %1960  ;;  %v7202_v16 = vld [vmem:[%s7850_s5 + $0x30] sm:$0xff] }
 0x2ad   :  { %v6991_v33 = vpop.f32.mrf.mxu0  ;;  %2914 = vmatpush1.msra.mxu0 %v2763_v48  ;;  %v6993_v23 = vpop.f32.mrf.mxu1  ;;  %3077 = vmatpush1.msra.mxu1 %v2757_v62  ;;  %v2134_v30 = vadd.f32 %v6875_v44, %v6945_v1  ;;  %v2740_v41 = vmax.f32 %v2146_v12, 0.0  ;;  %v2287_v28 = vadd.f32 %v6863_v15, %v6955_v20  ;;  %v2132_v61 = vadd.f32 %v6871_v7, %v6945_v1 }
 0x2ae   :  { %8746 = vst [vmem:[#allocation104_spill] sm:$0xff] %v6991_v33  ;;  %8747 = vst [vmem:[#allocation22_spill] sm:$0xff] %v6993_v23  ;;  %2915 = vmatprep.subr.mxu0 %v2756_v40  ;;  %3078 = vmatprep.subr.mxu1 %v2750_v14  ;;  %v2733_v55 = vmax.f32 %v2299_v53, 0.0  ;;  %v2739_v38 = vmax.f32 %v2144_v59, 0.0  ;;  %v2283_v44 = vadd.f32 %v6859_v19, %v6981_v9  ;;  %v2726_v15 = vmax.f32 %v2295_v4, 0.0  ;;  %v7035_v19 = vpop.permute.xlu1 %1955  ;;  %v7211_v23 = vld [vmem:[%s7850_s5 + $0x38] sm:$0xff] }
 0x2af   :  { %v7005_v46 = vpop.f32.mrf.mxu0  ;;  %2916 = vmatpush1.msra.mxu0 %v2755_v22  ;;  %v7007_v17 = vpop.f32.mrf.mxu1  ;;  %3079 = vmatpush1.msra.mxu1 %v2749_v18  ;;  %8753 = vst [vmem:[#allocation38_spill] sm:$0xff] %v7021_v32  ;;  %v2128_v42 = vadd.f32 %v6865_v56, %v6955_v20  ;;  %v2732_v36 = vmax.f32 %v2140_v10, 0.0  ;;  %v2281_v7 = vadd.f32 %v6855_v45, %v6981_v9  ;;  %v2725_v48 = vmax.f32 %v2293_v60, 0.0  ;;  %v8758_v18 = vld [vmem:[#allocation68_spill] sm:$0xff]  ;;  %v8762_v60 = vld [vmem:[#allocation117_spill] sm:$0xff] }
 0x2b0   :  { %8749 = vst [vmem:[#allocation32_spill] sm:$0xff] %v7005_v46  ;;  %8750 = vst [vmem:[#allocation107_spill] sm:$0xff] %v7007_v17  ;;  %2917 = vmatprep.subr.mxu0 %v2748_v0  ;;  %3080 = vmatprep.subr.mxu1 %v2742_v52  ;;  %v2126_v62 = vadd.f32 %v6861_v3, %v6955_v20  ;;  %v2731_v49 = vmax.f32 %v2138_v63, 0.0  ;;  %v2277_v56 = vadd.f32 %v6851_v50, %v6995_v37  ;;  %v8757_v3 = vld [vmem:[#allocation21_spill] sm:$0xff]  ;;  %v8791_v17 = vld [vmem:[#allocation74_spill] sm:$0xff] }
 0x2b1   :  { %v7017_v54 = vpop.f32.mrf.mxu0  ;;  %2918 = vmatpush1.msra.mxu0 %v2747_v35  ;;  %v7019_v58 = vpop.f32.mrf.mxu1  ;;  %3081 = vmatpush1.msra.mxu1 %v2741_v24  ;;  %8756 = vst [vmem:[#allocation15_spill] sm:$0xff] %v7035_v19  ;;  %v2122_v40 = vadd.f32 %v6857_v8, %v6981_v9  ;;  %v2718_v45 = vmax.f32 %v2289_v51, 0.0  ;;  %v2724_v53 = vmax.f32 %v2134_v30, 0.0  ;;  %v2275_v59 = vadd.f32 %v8757_v3, %v6995_v37  ;;  %v8761_v50 = vld [vmem:[#allocation25_spill] sm:$0xff]  ;;  %v8763_v51 = vld [vmem:[#allocation12_spill] sm:$0xff] }
 0x2b2   :  { %8751 = vst [vmem:[#allocation88_spill] sm:$0xff] %v7017_v54  ;;  %8752 = vst [vmem:[#allocation34_spill] sm:$0xff] %v7019_v58  ;;  %2919 = vmatprep.subr.mxu0 %v2740_v41  ;;  %3082 = vmatprep.subr.mxu1 %v2734_v29  ;;  %v2120_v22 = vadd.f32 %v8758_v18, %v6981_v9  ;;  %v2717_v4 = vmax.f32 %v2287_v28, 0.0  ;;  %v2723_v10 = vmax.f32 %v2132_v61, 0.0  ;;  %v2710_v24 = vmax.f32 %v2283_v44, 0.0  ;;  %v8764_v29 = vld [vmem:[#allocation19_spill] sm:$0xff] }
 0x2b3   :  { %v7031_v12 = vpop.f32.mrf.mxu0  ;;  %2920 = vmatpush1.msra.mxu0 %v2739_v38  ;;  %v7033_v14 = vpop.f32.mrf.mxu1  ;;  %3083 = vmatpush1.msra.mxu1 %v2733_v55  ;;  %v2271_v8 = vadd.f32 %v8761_v50, %v7021_v32  ;;  %v2116_v63 = vadd.f32 %v8762_v60, %v6995_v37  ;;  %v2716_v35 = vmax.f32 %v2128_v42, 0.0  ;;  %v2269_v30 = vadd.f32 %v8763_v51, %v7021_v32  ;;  %v8768_v44 = vld [vmem:[#allocation8_spill] sm:$0xff] }
 0x2b4   :  { %8754 = vst [vmem:[#allocation39_spill] sm:$0xff] %v7031_v12  ;;  %8755 = vst [vmem:[#allocation54_spill] sm:$0xff] %v7033_v14  ;;  %2921 = vmatprep.subr.mxu0 %v2732_v36  ;;  %3084 = vmatprep.subr.mxu1 %v2726_v15  ;;  %v2114_v41 = vadd.f32 %v8764_v29, %v6995_v37  ;;  %v2709_v28 = vmax.f32 %v2281_v7, 0.0  ;;  %v2715_v61 = vmax.f32 %v2126_v62, 0.0  ;;  %v7061_v15 = vpop.permute.xlu0 %1950  ;;  %v8769_v36 = vld [vmem:[#allocation47_spill] sm:$0xff]  ;;  %v8770_v7 = vld [vmem:[#allocation125_spill] sm:$0xff]  ;;  %v7075_v60 = vpop.permute.xlu1 %1945 }
 0x2b5   :  { %v7045_v52 = vpop.f32.mrf.mxu0  ;;  %2922 = vmatpush1.msra.mxu0 %v2731_v49  ;;  %v7047_v0 = vpop.f32.mrf.mxu1  ;;  %3085 = vmatpush1.msra.mxu1 %v2725_v48  ;;  %8767 = vst [vmem:[#allocation59_spill] sm:$0xff] %v7061_v15  ;;  %v2265_v42 = vadd.f32 %v8768_v44, %v7035_v19  ;;  %v2110_v48 = vadd.f32 %v8769_v36, %v7021_v32  ;;  %v2702_v49 = vmax.f32 %v2277_v56, 0.0  ;;  %v2701_v18 = vmax.f32 %v2275_v59, 0.0  ;;  %v8773_v56 = vld [vmem:[#allocation101_spill] sm:$0xff]  ;;  %v8775_v59 = vld [vmem:[#allocation11_spill] sm:$0xff] }
 0x2b6   :  { %8759 = vst [vmem:[#allocation48_spill] sm:$0xff] %v7045_v52  ;;  %8760 = vst [vmem:[#allocation43_spill] sm:$0xff] %v7047_v0  ;;  %2923 = vmatprep.subr.mxu0 %v2724_v53  ;;  %3086 = vmatprep.subr.mxu1 %v2718_v45  ;;  %v2708_v45 = vmax.f32 %v2122_v40, 0.0  ;;  %v2263_v62 = vadd.f32 %v8770_v7, %v7035_v19  ;;  %v8771_v53 = vld [vmem:[#allocation45_spill] sm:$0xff]  ;;  %v2259_v40 = vadd.f32 %v8773_v56, %v7061_v15  ;;  %v8777_v56 = vld [vmem:[#allocation40_spill] sm:$0xff] }
 0x2b7   :  { %v7057_v55 = vpop.f32.mrf.mxu0  ;;  %2924 = vmatpush1.msra.mxu0 %v2723_v10  ;;  %v7059_v38 = vpop.f32.mrf.mxu1  ;;  %3087 = vmatpush1.msra.mxu1 %v2717_v4  ;;  %v2108_v3 = vadd.f32 %v8771_v53, %v7021_v32  ;;  %v2707_v4 = vmax.f32 %v2120_v22, 0.0  ;;  %8772 = vst [vmem:[#allocation6_spill] sm:$0xff] %v7075_v60  ;;  %v2694_v51 = vmax.f32 %v2271_v8, 0.0  ;;  %v2700_v29 = vmax.f32 %v2116_v63, 0.0  ;;  %v8778_v63 = vld [vmem:[#allocation99_spill] sm:$0xff]  ;;  %8790 = vst [vmem:[#allocation44_spill] sm:$0xff] %v7202_v16 }
 0x2b8   :  { %8765 = vst [vmem:[#allocation114_spill] sm:$0xff] %v7057_v55  ;;  %8766 = vst [vmem:[#allocation5_spill] sm:$0xff] %v7059_v38  ;;  %2925 = vmatprep.subr.mxu0 %v2716_v35  ;;  %3088 = vmatprep.subr.mxu1 %v2710_v24  ;;  %v8774_v24 = vld [vmem:[#allocation126_spill] sm:$0xff]  ;;  %v2257_v22 = vadd.f32 %v8775_v59, %v7061_v15  ;;  %v2693_v36 = vmax.f32 %v2269_v30, 0.0  ;;  %v2253_v8 = vadd.f32 %v8777_v56, %v7075_v60  ;;  %v8781_v56 = vld [vmem:[#allocation116_spill] sm:$0xff] }
 0x2b9   :  { %v7071_v10 = vpop.f32.mrf.mxu0  ;;  %2926 = vmatpush1.msra.mxu0 %v2715_v61  ;;  %v7073_v50 = vpop.f32.mrf.mxu1  ;;  %3089 = vmatpush1.msra.mxu1 %v2709_v28  ;;  %v2104_v35 = vadd.f32 %v8774_v24, %v7035_v19  ;;  %v8776_v61 = vld [vmem:[#allocation106_spill] sm:$0xff]  ;;  %v2699_v28 = vmax.f32 %v2114_v41, 0.0  ;;  %v2692_v24 = vmax.f32 %v2110_v48, 0.0  ;;  %v8780_v41 = vld [vmem:[#allocation67_spill] sm:$0xff]  ;;  %v2691_v39 = vmax.f32 %v2108_v3, 0.0 }
 0x2ba   :  { %2927 = vmatprep.subr.mxu0 %v2708_v45  ;;  %3090 = vmatprep.subr.mxu1 %v2702_v49  ;;  %v2102_v44 = vadd.f32 %v8776_v61, %v7035_v19  ;;  %v2098_v49 = vadd.f32 %v8778_v63, %v7061_v15  ;;  %v2686_v45 = vmax.f32 %v2265_v42, 0.0  ;;  %v8779_v59 = vld [vmem:[#allocation30_spill] sm:$0xff]  ;;  %v2096_v61 = vadd.f32 %v8780_v41, %v7061_v15 }
 0x2bb   :  { %v7085_v7 = vpop.f32.mrf.mxu0  ;;  %2928 = vmatpush1.msra.mxu0 %v2707_v4  ;;  %v7087_v53 = vpop.f32.mrf.mxu1  ;;  %3091 = vmatpush1.msra.mxu1 %v2701_v18  ;;  %v2251_v30 = vadd.f32 %v8779_v59, %v7075_v60  ;;  %v2685_v4 = vmax.f32 %v2263_v62, 0.0  ;;  %v2092_v42 = vadd.f32 %v8781_v56, %v7075_v60  ;;  %v2678_v48 = vmax.f32 %v2259_v40, 0.0 }
 0x2bc   :  { %2929 = vmatprep.subr.mxu0 %v2700_v29  ;;  %3092 = vmatprep.subr.mxu1 %v2694_v51  ;;  %v2684_v29 = vmax.f32 %v2104_v35, 0.0  ;;  %v8782_v51 = vld [vmem:[#allocation115_spill] sm:$0xff]  ;;  %v2677_v59 = vmax.f32 %v2257_v22, 0.0  ;;  %v2683_v41 = vmax.f32 %v2102_v44, 0.0  ;;  %v2675_v40 = vmax.f32 %v2096_v61, 0.0  ;;  %v7116_v22 = vld [vmem:[%s7850_s5] sm:$0xff] }
 0x2bd   :  { %v7097_v6 = vpop.f32.mrf.mxu0  ;;  %2930 = vmatpush1.msra.mxu0 %v2699_v28  ;;  %v7099_v18 = vpop.f32.mrf.mxu1  ;;  %3093 = vmatpush1.msra.mxu1 %v2693_v36  ;;  %v2090_v63 = vadd.f32 %v8782_v51, %v7075_v60  ;;  %v2670_v28 = vmax.f32 %v2253_v8, 0.0  ;;  %v2676_v36 = vmax.f32 %v2098_v49, 0.0  ;;  %v2669_v56 = vmax.f32 %v2251_v30, 0.0  ;;  %8783 = vst [vmem:[#allocation102_spill] sm:$0xff] %v7116_v22 }
 0x2be   :  { %2931 = vmatprep.subr.mxu0 %v2692_v24  ;;  %3094 = vmatprep.subr.mxu1 %v2686_v45  ;;  %v8784_v61 = vmov 0.0  }
 0x2bf   :  { %v7105_v62 = vpop.f32.mrf.mxu0  ;;  %2932 = vmatpush1.msra.mxu0 %v2691_v39  ;;  %v7107_v3 = vpop.f32.mrf.mxu1  ;;  %3095 = vmatpush1.msra.mxu1 %v2685_v4  ;;  %v2668_v39 = vmax.f32 %v2092_v42, 0.0  ;;  %v2667_v44 = vmax.f32 %v2090_v63, 0.0  ;;  %v7131_v4 = vld [vmem:[%s7850_s5 + $0x8] sm:$0xff]  ;;  %v7148_v63 = vld [vmem:[%s7850_s5 + $0x10] sm:$0xff] }
 0x2c0   :  { %2933 = vmatprep.subr.mxu0 %v2684_v29  ;;  %3096 = vmatprep.subr.mxu1 %v2678_v48  ;;  %8785 = vst [vmem:[#allocation91_spill] sm:$0xff] %v7131_v4  ;;  %8786 = vst [vmem:[#allocation18_spill] sm:$0xff] %v7148_v63 }
 0x2c1   :  { %v7109_v35 = vpop.f32.mrf.mxu0  ;;  %2934 = vmatpush1.msra.mxu0 %v2683_v41  ;;  %v7111_v45 = vpop.f32.mrf.mxu1  ;;  %3097 = vmatpush1.msra.mxu1 %v2677_v59 }
 0x2c2   :  { %2935 = vmatprep.subr.mxu0 %v2676_v36  ;;  %3098 = vmatprep.subr.mxu1 %v2670_v28 }
 0x2c3   :  { %v7118_v8 = vpop.f32.mrf.mxu0  ;;  %2936 = vmatpush1.msra.mxu0 %v2675_v40  ;;  %v7120_v49 = vpop.f32.mrf.mxu1  ;;  %3099 = vmatpush1.msra.mxu1 %v2669_v56  ;;  %v7165_v56 = vld [vmem:[%s7850_s5 + $0x18] sm:$0xff] }
 0x2c4   :  { %2937 = vmatprep.subr.mxu0 %v2668_v39  ;;  %3133 = vmatmul.mubr.f32.vlgmr.msra.gmra.mxu1 %v7116_v22  ;;  %8787 = vst [vmem:[#allocation35_spill] sm:$0xff] %v7165_v56 }
 0x2c5   :  { %v7123_v24 = vpop.f32.mrf.mxu0  ;;  %2938 = vmatpush1.msra.mxu0 %v2667_v44  ;;  %v7125_v30 = vpop.f32.mrf.mxu1  ;;  %3138 = vmatprep.mubr.f32.mxu1 %v8784_v61 }
 0x2c6   :  { %2972 = vmatmul.mubr.f32.vlgmr.msra.gmra.mxu0 %v7116_v22  ;;  %v7182_v22 = vld [vmem:[%s7850_s5 + $0x20] sm:$0xff] }
 0x2c7   :  { %v7134_v42 = vpop.f32.mrf.mxu0  ;;  %v7136_v48 = vpop.f32.mrf.mxu1  ;;  %2977 = vmatprep.mubr.f32.mxu0 %v8784_v61  ;;  %8788 = vst [vmem:[#allocation36_spill] sm:$0xff] %v7182_v22 }
 0x2c8   :  { %3139 = vmatmul.mubr.f32.gmra.mxu1 %v7131_v4 }
 0x2c9   :  { %v7140_v29 = vpop.f32.mrf.mxu0  ;;  %v7142_v51 = vpop.f32.mrf.mxu1  ;;  %3144 = vmatprep.mubr.f32.mxu1 %v8784_v61 }
 0x2ca   :  { %2978 = vmatmul.mubr.f32.gmra.mxu0 %v7131_v4 }
 0x2cb   :  { %v7151_v59 = vpop.f32.mrf.mxu0  ;;  %v7153_v41 = vpop.f32.mrf.mxu1  ;;  %2983 = vmatprep.mubr.f32.mxu0 %v8784_v61 }
 0x2cc   :  { %3145 = vmatmul.mubr.f32.gmra.mxu1 %v7148_v63 }
 0x2cd   :  { %v7157_v28 = vpop.f32.mrf.mxu0  ;;  %v7159_v36 = vpop.f32.mrf.mxu1  ;;  %3150 = vmatprep.mubr.f32.mxu1 %v8784_v61 }
 0x2ce   :  { %2984 = vmatmul.mubr.f32.gmra.mxu0 %v7148_v63 }
 0x2cf   :  { %v7168_v40 = vpop.f32.mrf.mxu0  ;;  %v7170_v39 = vpop.f32.mrf.mxu1  ;;  %2989 = vmatprep.mubr.f32.mxu0 %v8784_v61 }
 0x2d0   :  { %3151 = vmatmul.mubr.f32.gmra.mxu1 %v7165_v56 }
 0x2d1   :  { %v7174_v44 = vpop.f32.mrf.mxu0  ;;  %v7176_v4 = vpop.f32.mrf.mxu1  ;;  %3156 = vmatprep.mubr.f32.mxu1 %v8784_v61 }
 0x2d2   :  { %2990 = vmatmul.mubr.f32.gmra.mxu0 %v7165_v56 }
 0x2d3   :  { %v7185_v63 = vpop.f32.mrf.mxu0  ;;  %v2646_v60 = vpop.f32.mrf.mxu1  ;;  %2995 = vmatprep.mubr.f32.mxu0 %v8784_v61 }
 0x2d4   :  { %3157 = vmatmul.mubr.f32.gmra.mxu1 %v7182_v22 }
 0x2d5   :  { %v2485_v26 = vpop.f32.mrf.mxu0  ;;  %v2650_v57 = vpop.f32.mrf.mxu1  ;;  %3162 = vmatprep.mubr.f32.mxu1 %v8784_v61 }
 0x2d6   :  { %2996 = vmatmul.mubr.f32.gmra.mxu0 %v7182_v22 }
 0x2d7   :  { %v2489_v27 = vpop.f32.mrf.mxu0  ;;  %v2652_v56 = vpop.f32.mrf.mxu1  ;;  %3001 = vmatprep.mubr.f32.mxu0 %v8784_v61 }
 0x2d8   :  { %3163 = vmatmul.mubr.f32.gmra.mxu1 %v7193_v13 }
 0x2d9   :  { %v2491_v15 = vpop.f32.mrf.mxu0  ;;  %v2656_v25 = vpop.f32.mrf.mxu1  ;;  %3168 = vmatprep.mubr.f32.mxu1 %v8784_v61 }
 0x2da   :  { %3002 = vmatmul.mubr.f32.gmra.mxu0 %v7193_v13  ;;  %v2492_v55 = vadd.f32 %v2491_v15, %v6905_v2 }
 0x2db   :  { %v2495_v34 = vpop.f32.mrf.mxu0  ;;  %v2658_v33 = vpop.f32.mrf.mxu1  ;;  %3007 = vmatprep.mubr.f32.mxu0 %v8784_v61 }
 0x2dc   :  { %3169 = vmatmul.mubr.f32.gmra.mxu1 %v7202_v16  ;;  %v2659_v58 = vadd.f32 %v2658_v33, %v6909_v47  ;;  %v2657_v33 = vadd.f32 %v2656_v25, %v6909_v47  ;;  %v2486_v25 = vadd.f32 %v2485_v26, %v6911_v31  ;;  %v2645_v26 = vadd.f32 %v7176_v4, %v6911_v31 }
 0x2dd   :  { %v2497_v22 = vpop.f32.mrf.mxu0  ;;  %v2662_v19 = vpop.f32.mrf.mxu1  ;;  %3174 = vmatprep.mubr.f32.mxu1 %v8784_v61  ;;  %v2474_v4 = vadd.f32 %v7157_v28, %v6915_v11  ;;  %v2633_v28 = vadd.f32 %v7142_v51, %v6915_v11  ;;  %v2627_v51 = vadd.f32 %v7125_v30, %v6918_v21 }
 0x2de   :  { %3008 = vmatmul.mubr.f32.gmra.mxu0 %v7202_v16  ;;  %v2663_v13 = vadd.f32 %v2662_v19, %v8791_v17  ;;  %v7224_v16 = vld [vmem:[%s7850_s5 + $0x40] sm:$0xff]  ;;  %v2498_v19 = vadd.f32 %v2497_v22, %v6909_v47  ;;  %v2653_v22 = vadd.f32 %v2652_v56, %v6905_v2  ;;  %v2786_v38 = vmax.f32 %v2659_v58, 0.0  ;;  %v7244_v58 = vld [vmem:[%s7850_s5 + $0x48] sm:$0xff] }
 0x2df   :  { %v2501_v46 = vpop.f32.mrf.mxu0  ;;  %v2664_v54 = vpop.f32.mrf.mxu1  ;;  %3013 = vmatprep.mubr.f32.mxu0 %v8784_v61  ;;  %v2768_v15 = vmax.f32 %v2486_v25, 0.0  ;;  %v2617_v25 = vadd.f32 %v7107_v3, %v6945_v1 }
 0x2e0   :  { %v2665_v32 = vadd.f32 %v2664_v54, %v8791_v17  ;;  %3175 = vmatmul.mubr.f32.gmra.mxu1 %v7211_v23  ;;  %v2502_v12 = vadd.f32 %v2501_v46, %v8791_v17  ;;  %v2496_v54 = vadd.f32 %v2495_v34, %v6909_v47  ;;  %v2793_v46 = vmax.f32 %v2663_v13, 0.0 }
 0x2e1   :  { %v2503_v14 = vpop.f32.mrf.mxu0  ;;  %3180 = vmatprep.mubr.f32.mxu1 %v8784_v61  ;;  %v2490_v34 = vadd.f32 %v2489_v27, %v6905_v2  ;;  %v2651_v47 = vadd.f32 %v2650_v57, %v6905_v2  ;;  %v2784_v13 = vmax.f32 %v2498_v19, 0.0  ;;  %v2484_v2 = vadd.f32 %v7185_v63, %v6911_v31 }
 0x2e2   :  { %v2504_v52 = vadd.f32 %v2503_v14, %v8791_v17  ;;  %v2794_v37 = vmax.f32 %v2665_v32, 0.0  ;;  %3014 = vmatmul.mubr.f32.gmra.mxu0 %v7211_v23  ;;  %v2791_v17 = vmax.f32 %v2502_v12, 0.0  ;;  %v2783_v32 = vmax.f32 %v2496_v54, 0.0 }
 0x2e3   :  { %3019 = vmatprep.mubr.f32.mxu0 %v8784_v61  ;;  %v2785_v14 = vmax.f32 %v2657_v33, 0.0  ;;  %v2776_v57 = vmax.f32 %v2492_v55, 0.0  ;;  %v2778_v27 = vmax.f32 %v2653_v22, 0.0  ;;  %v2775_v12 = vmax.f32 %v2490_v34, 0.0  ;;  %v7293_v34 = vld [vmem:[%s7850_s5 + $0x58] sm:$0xff] }
 0x2e4   :  { %v2792_v0 = vmax.f32 %v2504_v52, 0.0  ;;  %3181 = vmatmul.mubr.f32.gmra.mxu1 %v7224_v16  ;;  %3390 = vmatprep.subr.mxu1 %v2794_v37  ;;  %v2647_v37 = vadd.f32 %v2646_v60, %v6911_v31  ;;  %v2777_v52 = vmax.f32 %v2651_v47, 0.0  ;;  %v2478_v31 = vadd.f32 %v7168_v40, %v6913_v43 }
 0x2e5   :  { %3391 = vmatpush1.msra.mxu1 %v2793_v46  ;;  %3186 = vmatprep.mubr.f32.mxu1 %v8784_v61  ;;  %v2639_v55 = vadd.f32 %v7159_v36, %v6913_v43  ;;  %v2635_v63 = vadd.f32 %v7153_v41, %v6915_v11  ;;  %v2767_v56 = vmax.f32 %v2484_v2, 0.0  ;;  %v2468_v54 = vadd.f32 %v7140_v29, %v6918_v21  ;;  %v7318_v2 = vld [vmem:[%s7850_s5 + $0x60] sm:$0xff] }
 0x2e6   :  { %3020 = vmatmul.mubr.f32.gmra.mxu0 %v7224_v16  ;;  %3229 = vmatprep.subr.mxu0 %v2792_v0  ;;  %v2480_v0 = vadd.f32 %v7174_v44, %v6913_v43  ;;  %v2770_v60 = vmax.f32 %v2647_v37, 0.0  ;;  %v7268_v44 = vld [vmem:[%s7850_s5 + $0x50] sm:$0xff]  ;;  %v2759_v40 = vmax.f32 %v2478_v31, 0.0  ;;  %v2629_v33 = vadd.f32 %v7136_v48, %v6918_v21 }
 0x2e7   :  { %3230 = vmatpush1.msra.mxu0 %v2791_v17  ;;  %3392 = vmatprep.subr.mxu1 %v2786_v38  ;;  %v2641_v38 = vadd.f32 %v7170_v39, %v6913_v43  ;;  %v2769_v39 = vmax.f32 %v2645_v26, 0.0  ;;  %v2472_v43 = vadd.f32 %v7151_v59, %v6915_v11  ;;  %v2761_v19 = vmax.f32 %v2639_v55, 0.0 }
 0x2e8   :  { %3231 = vmatprep.subr.mxu0 %v2784_v13  ;;  %3025 = vmatprep.mubr.f32.mxu0 %v8784_v61  ;;  %v2760_v41 = vmax.f32 %v2480_v0, 0.0  ;;  %v2752_v59 = vmax.f32 %v2474_v4, 0.0  ;;  %v2754_v46 = vmax.f32 %v2635_v63, 0.0  ;;  %v2466_v11 = vadd.f32 %v7134_v42, %v6918_v21  ;;  %v8794_v0 = vld [vmem:[#allocation43_spill] sm:$0xff] }
 0x2e9   :  { %3232 = vmatpush1.msra.mxu0 %v2783_v32  ;;  %3393 = vmatpush1.msra.mxu1 %v2785_v14  ;;  %v2762_v36 = vmax.f32 %v2641_v38, 0.0  ;;  %v2462_v22 = vadd.f32 %v7123_v24, %v6926_v5  ;;  %v2623_v29 = vadd.f32 %v7120_v49, %v6926_v5  ;;  %v2751_v17 = vmax.f32 %v2472_v43, 0.0  ;;  %v8799_v43 = vld [vmem:[#allocation34_spill] sm:$0xff] }
 0x2ea   :  { %3026 = vmatmul.mubr.f32.gmra.mxu0 %v7244_v58  ;;  %3187 = vmatmul.mubr.f32.gmra.mxu1 %v7244_v58  ;;  %v2753_v48 = vmax.f32 %v2633_v28, 0.0  ;;  %v2460_v21 = vadd.f32 %v7118_v8, %v6926_v5  ;;  %v2621_v24 = vadd.f32 %v7111_v45, %v6926_v5  ;;  %v2744_v49 = vmax.f32 %v2468_v54, 0.0  ;;  %v8800_v54 = vld [vmem:[#allocation38_spill] sm:$0xff] }
 0x2eb   :  { %3233 = vmatprep.subr.mxu0 %v2776_v57  ;;  %3394 = vmatprep.subr.mxu1 %v2778_v27  ;;  %v2746_v30 = vmax.f32 %v2629_v33, 0.0  ;;  %v2743_v42 = vmax.f32 %v2466_v11, 0.0  ;;  %v2745_v47 = vmax.f32 %v2627_v51, 0.0  ;;  %v2456_v13 = vadd.f32 %v7109_v35, %v6945_v1  ;;  %v8792_v27 = vld [vmem:[#allocation5_spill] sm:$0xff]  ;;  %v8801_v33 = vld [vmem:[#allocation88_spill] sm:$0xff] }
 0x2ec   :  { %3234 = vmatpush1.msra.mxu0 %v2775_v12  ;;  %3395 = vmatpush1.msra.mxu1 %v2777_v52  ;;  %v2736_v8 = vmax.f32 %v2462_v22, 0.0  ;;  %v2738_v37 = vmax.f32 %v2623_v29, 0.0  ;;  %v2454_v5 = vadd.f32 %v7105_v62, %v6945_v1  ;;  %v2615_v45 = vadd.f32 %v7099_v18, %v6945_v1  ;;  %v8803_v29 = vld [vmem:[#allocation32_spill] sm:$0xff] }
 0x2ed   :  { %3235 = vmatprep.subr.mxu0 %v2768_v15  ;;  %3396 = vmatprep.subr.mxu1 %v2770_v60  ;;  %v2450_v32 = vadd.f32 %v7097_v6, %v6955_v20  ;;  %v2611_v35 = vadd.f32 %v7087_v53, %v6955_v20  ;;  %v2735_v14 = vmax.f32 %v2460_v21, 0.0  ;;  %v2737_v3 = vmax.f32 %v2621_v24, 0.0  ;;  %v8795_v15 = vld [vmem:[#allocation24_spill] sm:$0xff]  ;;  %v8805_v24 = vld [vmem:[#allocation15_spill] sm:$0xff] }
 0x2ee   :  { %3031 = vmatprep.mubr.f32.mxu0 %v8784_v61  ;;  %3192 = vmatprep.mubr.f32.mxu1 %v8784_v61  ;;  %v2448_v1 = vadd.f32 %v7085_v7, %v6955_v20  ;;  %v2609_v6 = vadd.f32 %v7073_v50, %v6955_v20  ;;  %v2728_v53 = vmax.f32 %v2456_v13, 0.0  ;;  %v2730_v18 = vmax.f32 %v2617_v25, 0.0  ;;  %v8793_v20 = vld [vmem:[#allocation114_spill] sm:$0xff]  ;;  %v8796_v60 = vld [vmem:[#allocation48_spill] sm:$0xff] }
 0x2ef   :  { %3236 = vmatpush1.msra.mxu0 %v2767_v56  ;;  %3397 = vmatpush1.msra.mxu1 %v2769_v39  ;;  %v2727_v62 = vmax.f32 %v2454_v5, 0.0  ;;  %v2729_v26 = vmax.f32 %v2615_v45, 0.0  ;;  %v2444_v57 = vadd.f32 %v7071_v10, %v6981_v9  ;;  %v2605_v12 = vadd.f32 %v8792_v27, %v6981_v9  ;;  %v8797_v10 = vld [vmem:[#allocation54_spill] sm:$0xff]  ;;  %v8809_v45 = vld [vmem:[#allocation95_spill] sm:$0xff] }
 0x2f0   :  { %3032 = vmatmul.mubr.f32.gmra.mxu0 %v7268_v44  ;;  %3193 = vmatmul.mubr.f32.gmra.mxu1 %v7268_v44  ;;  %v2720_v7 = vmax.f32 %v2450_v32, 0.0  ;;  %v2722_v52 = vmax.f32 %v2611_v35, 0.0  ;;  %v2442_v50 = vadd.f32 %v8793_v20, %v6981_v9  ;;  %v2603_v38 = vadd.f32 %v8794_v0, %v6981_v9  ;;  %v7343_v56 = vld [vmem:[%s7850_s5 + $0x68] sm:$0xff]  ;;  %v8798_v9 = vld [vmem:[#allocation39_spill] sm:$0xff] }
 0x2f1   :  { %3237 = vmatprep.subr.mxu0 %v2760_v41  ;;  %3398 = vmatprep.subr.mxu1 %v2762_v36  ;;  %v2438_v31 = vadd.f32 %v8796_v60, %v8795_v15  ;;  %v2599_v55 = vadd.f32 %v8797_v10, %v8795_v15  ;;  %v2719_v4 = vmax.f32 %v2448_v1, 0.0  ;;  %v2721_v63 = vmax.f32 %v2609_v6, 0.0  ;;  %v8810_v6 = vld [vmem:[#allocation59_spill] sm:$0xff]  ;;  %v8816_v0 = vld [vmem:[#allocation110_spill] sm:$0xff] }
 0x2f2   :  { %3238 = vmatpush1.msra.mxu0 %v2759_v40  ;;  %3399 = vmatpush1.msra.mxu1 %v2761_v19  ;;  %v2436_v39 = vadd.f32 %v8798_v9, %v8795_v15  ;;  %v2597_v28 = vadd.f32 %v8799_v43, %v8795_v15  ;;  %v2712_v41 = vmax.f32 %v2444_v57, 0.0  ;;  %v2714_v36 = vmax.f32 %v2605_v12, 0.0  ;;  %v8813_v12 = vld [vmem:[#allocation13_spill] sm:$0xff]  ;;  %v8817_v15 = vld [vmem:[#allocation90_spill] sm:$0xff]  ;;  %v8819_v9 = vld [vmem:[#allocation23_spill] sm:$0xff] }
 0x2f3   :  { %3239 = vmatprep.subr.mxu0 %v2752_v59  ;;  %3400 = vmatprep.subr.mxu1 %v2754_v46  ;;  %v2711_v40 = vmax.f32 %v2442_v50, 0.0  ;;  %v2713_v19 = vmax.f32 %v2603_v38, 0.0  ;;  %v2432_v59 = vadd.f32 %v8801_v33, %v8800_v54  ;;  %v8802_v46 = vld [vmem:[#allocation107_spill] sm:$0xff]  ;;  %v2704_v51 = vmax.f32 %v2438_v31, 0.0  ;;  %v8815_v50 = vld [vmem:[#allocation6_spill] sm:$0xff] }
 0x2f4   :  { %3037 = vmatprep.mubr.f32.mxu0 %v8784_v61  ;;  %3198 = vmatprep.mubr.f32.mxu1 %v8784_v61  ;;  %v2593_v11 = vadd.f32 %v8802_v46, %v8800_v54  ;;  %v2706_v22 = vmax.f32 %v2599_v55, 0.0  ;;  %v2703_v13 = vmax.f32 %v2436_v39, 0.0  ;;  %v2705_v25 = vmax.f32 %v2597_v28, 0.0  ;;  %v7393_v55 = vld [vmem:[%s7850_s5 + $0x78] sm:$0xff]  ;;  %v8821_v46 = vld [vmem:[#allocation91_spill] sm:$0xff] }
 0x2f5   :  { %3240 = vmatpush1.msra.mxu0 %v2751_v17  ;;  %3401 = vmatpush1.msra.mxu1 %v2753_v48  ;;  %v2430_v17 = vadd.f32 %v8803_v29, %v8800_v54  ;;  %v8804_v48 = vld [vmem:[#allocation22_spill] sm:$0xff]  ;;  %v2585_v32 = vadd.f32 %v8809_v45, %v8805_v24  ;;  %v2696_v35 = vmax.f32 %v2432_v59, 0.0  ;;  %v2414_v38 = vadd.f32 %v8816_v0, %v8815_v50  ;;  %v8825_v29 = vld [vmem:[#allocation37_spill] sm:$0xff] }
 0x2f6   :  { %3038 = vmatmul.mubr.f32.gmra.mxu0 %v7293_v34  ;;  %3199 = vmatmul.mubr.f32.gmra.mxu1 %v7293_v34  ;;  %v2591_v21 = vadd.f32 %v8804_v48, %v8800_v54  ;;  %v2575_v60 = vadd.f32 %v8817_v15, %v8815_v50  ;;  %v2573_v39 = vadd.f32 %v8819_v9, %v8815_v50  ;;  %v8820_v59 = vld [vmem:[#allocation102_spill] sm:$0xff] }
 0x2f7   :  { %3241 = vmatprep.subr.mxu0 %v2744_v49  ;;  %3402 = vmatprep.subr.mxu1 %v2746_v30  ;;  %v8806_v49 = vld [vmem:[#allocation104_spill] sm:$0xff]  ;;  %v2689_v10 = vmax.f32 %v2585_v32, 0.0 }
 0x2f8   :  { %3242 = vmatpush1.msra.mxu0 %v2743_v42  ;;  %3403 = vmatpush1.msra.mxu1 %v2745_v47  ;;  %v2426_v30 = vadd.f32 %v8806_v49, %v8805_v24  ;;  %v8807_v42 = vld [vmem:[#allocation94_spill] sm:$0xff]  ;;  %v2697_v1 = vmax.f32 %v2591_v21, 0.0  ;;  %v2673_v33 = vmax.f32 %v2573_v39, 0.0 }
 0x2f9   :  { %3243 = vmatprep.subr.mxu0 %v2736_v8  ;;  %3404 = vmatprep.subr.mxu1 %v2738_v37  ;;  %v2587_v47 = vadd.f32 %v8807_v42, %v8805_v24  ;;  %v7368_v8 = vld [vmem:[%s7850_s5 + $0x70] sm:$0xff]  ;;  %v8808_v37 = vld [vmem:[#allocation96_spill] sm:$0xff]  ;;  %s4028_s5 = smov [#allocation2]  }
 0x2fa   :  { %3043 = vmatprep.mubr.f32.mxu0 %v8784_v61  ;;  %3204 = vmatprep.mubr.f32.mxu1 %v8784_v61  ;;  %v2424_v5 = vadd.f32 %v8808_v37, %v8805_v24  ;;  %v2688_v57 = vmax.f32 %v2426_v30, 0.0  ;;  %s3920_s16 = sshll.u32 %s4028_s5, 4  ;;  %s3921_s16 = int_to_ptr.vmem [resolvable:$true] %s3920_s16 }
 0x2fb   :  { %3244 = vmatpush1.msra.mxu0 %v2735_v14  ;;  %3405 = vmatpush1.msra.mxu1 %v2737_v3  ;;  %v2698_v14 = vmax.f32 %v2593_v11, 0.0  ;;  %v2695_v3 = vmax.f32 %v2430_v17, 0.0  ;;  %v2690_v27 = vmax.f32 %v2587_v47, 0.0  ;;  %v8822_v11 = vld [vmem:[#allocation18_spill] sm:$0xff]  ;;  %v8826_v17 = vld [vmem:[#allocation44_spill] sm:$0xff]  ;;  %s4001_s17 = scalar_lea.vmem %s3921_s16, 2048  ;;  %p4006_p1 = scmp.lt.s32.totalorder %s3921_s16, %s3921_s16 }
 0x2fc   :  { %3044 = vmatmul.mubr.f32.gmra.mxu0 %v7318_v2  ;;  %3205 = vmatmul.mubr.f32.gmra.mxu1 %v7318_v2  ;;  %v2687_v31 = vmax.f32 %v2424_v5, 0.0  ;;  %p4002_p0 = scmp.ne.s32.totalorder %s3921_s16, %s4001_s17  ;;  %p4007_p2 = scmp.lt.s32.totalorder %s4001_s17, %s4001_s17 }
 0x2fd   :  { %3245 = vmatprep.subr.mxu0 %v2728_v53  ;;  %3406 = vmatprep.subr.mxu1 %v2730_v18  ;;  %v8811_v53 = vld [vmem:[#allocation100_spill] sm:$0xff] }
 0x2fe   :  { %3246 = vmatpush1.msra.mxu0 %v2727_v62  ;;  %3407 = vmatpush1.msra.mxu1 %v2729_v26  ;;  %v2420_v18 = vadd.f32 %v8811_v53, %v8810_v6  ;;  %v8812_v62 = vld [vmem:[#allocation17_spill] sm:$0xff]  ;;  %p4008_p3 = por %p4007_p2, %p4006_p1 }
 0x2ff   :  { %3247 = vmatprep.subr.mxu0 %v2720_v7  ;;  %3408 = vmatprep.subr.mxu1 %v2722_v52  ;;  %v2581_v26 = vadd.f32 %v8812_v62, %v8810_v6  ;;  %v2418_v7 = vadd.f32 %v8813_v12, %v8810_v6  ;;  %v8814_v52 = vld [vmem:[#allocation60_spill] sm:$0xff] }
 0x300   :  { %3049 = vmatprep.mubr.f32.mxu0 %v8784_v61  ;;  %3210 = vmatprep.mubr.f32.mxu1 %v8784_v61  ;;  %v2579_v20 = vadd.f32 %v8814_v52, %v8810_v6  ;;  %v2680_v43 = vmax.f32 %v2420_v18, 0.0  ;;  %p4009_p4 = pnand %p4008_p3, %p4002_p0 }
 0x301   :  { %3248 = vmatpush1.msra.mxu0 %v2719_v4  ;;  %3409 = vmatpush1.msra.mxu1 %v2721_v63  ;;  %v8818_v4 = vld [vmem:[#allocation31_spill] sm:$0xff]  ;;  %v2682_v28 = vmax.f32 %v2581_v26, 0.0 }
 0x302   :  { %3050 = vmatmul.mubr.f32.gmra.mxu0 %v7343_v56  ;;  %3211 = vmatmul.mubr.f32.gmra.mxu1 %v7343_v56  ;;  %v2412_v63 = vadd.f32 %v8818_v4, %v8815_v50 }
 0x303   :  { %3249 = vmatprep.subr.mxu0 %v2712_v41  ;;  %3410 = vmatprep.subr.mxu1 %v2714_v36  ;;  %v2679_v41 = vmax.f32 %v2418_v7, 0.0  ;;  %v2681_v36 = vmax.f32 %v2579_v20, 0.0 }
 0x304   :  { %3250 = vmatpush1.msra.mxu0 %v2711_v40  ;;  %3411 = vmatpush1.msra.mxu1 %v2713_v19  ;;  %v2672_v40 = vmax.f32 %v2414_v38, 0.0  ;;  %v2674_v19 = vmax.f32 %v2575_v60, 0.0  ;;  %v2671_v54 = vmax.f32 %v2412_v63, 0.0 }
 0x305   :  { %3251 = vmatprep.subr.mxu0 %v2704_v51  ;;  %3412 = vmatprep.subr.mxu1 %v2706_v22  ;;  %v8823_v51 = vld [vmem:[#allocation35_spill] sm:$0xff]  ;;  %v8824_v22 = vld [vmem:[#allocation36_spill] sm:$0xff] }
 0x306   :  { %3055 = vmatprep.mubr.f32.mxu0 %v8784_v61  ;;  %3216 = vmatprep.mubr.f32.mxu1 %v8784_v61 }
 0x307   :  { %3252 = vmatpush1.msra.mxu0 %v2703_v13  ;;  %3413 = vmatpush1.msra.mxu1 %v2705_v25 }
 0x308   :  { %3056 = vmatmul.mubr.f32.gmra.mxu0 %v7368_v8  ;;  %3217 = vmatmul.mubr.f32.gmra.mxu1 %v7368_v8 }
 0x309   :  { %3253 = vmatprep.subr.mxu0 %v2696_v35  ;;  %3414 = vmatprep.subr.mxu1 %v2698_v14 }
 0x30a   :  { %3254 = vmatpush1.msra.mxu0 %v2695_v3  ;;  %3415 = vmatpush1.msra.mxu1 %v2697_v1 }
 0x30b   :  { %3255 = vmatprep.subr.mxu0 %v2688_v57  ;;  %3416 = vmatprep.subr.mxu1 %v2690_v27 }
 0x30c   :  { %3061 = vmatprep.mubr.f32.mxu0 %v8784_v61  ;;  %3222 = vmatprep.mubr.f32.mxu1 %v8784_v61 }
 0x30d   :  { %3256 = vmatpush1.msra.mxu0 %v2687_v31  ;;  %3417 = vmatpush1.msra.mxu1 %v2689_v10 }
 0x30e   :  { %3062 = vmatmul.mubr.f32.gmra.mxu0 %v7393_v55  ;;  %3223 = vmatmul.mubr.f32.gmra.mxu1 %v7393_v55 }
 0x30f   :  { %3257 = vmatprep.subr.mxu0 %v2680_v43  ;;  %3418 = vmatprep.subr.mxu1 %v2682_v28 }
 0x310   :  { %3258 = vmatpush1.msra.mxu0 %v2679_v41  ;;  %3419 = vmatpush1.msra.mxu1 %v2681_v36 }
 0x311   :  { %3259 = vmatprep.subr.mxu0 %v2672_v40  ;;  %3420 = vmatprep.subr.mxu1 %v2674_v19 }
 0x312   :  { %3260 = vmatpush1.msra.mxu0 %v2671_v54  ;;  %3293 = vmatprep.mubr.f32.mxu0 %v8784_v61 }
 0x313   :  { %3421 = vmatpush1.msra.mxu1 %v2673_v33  ;;  %3454 = vmatprep.mubr.f32.mxu1 %v8784_v61  ;;  %v2830_v33 = vpop.permute.xlu0 %2829 }
 0x314   :  { %3294 = vmatmul.mubr.f32.vlgmr.msra.gmra.mxu0 %v8820_v59  ;;  %3455 = vmatmul.mubr.f32.vlgmr.msra.gmra.mxu1 %v8820_v59 }
 0x315   :  { %3299 = vmatprep.mubr.f32.mxu0 %v8784_v61  ;;  %3460 = vmatprep.mubr.f32.mxu1 %v8784_v61 }
 0x318   :  { %3300 = vmatmul.mubr.f32.gmra.mxu0 %v8821_v46  ;;  %3461 = vmatmul.mubr.f32.gmra.mxu1 %v8821_v46 }
 0x319   :  { %3305 = vmatprep.mubr.f32.mxu0 %v8784_v61  ;;  %3466 = vmatprep.mubr.f32.mxu1 %v8784_v61 }
 0x31c   :  { %3306 = vmatmul.mubr.f32.gmra.mxu0 %v8822_v11  ;;  %3467 = vmatmul.mubr.f32.gmra.mxu1 %v8822_v11 }
 0x31d   :  { %3311 = vmatprep.mubr.f32.mxu0 %v8784_v61  ;;  %3472 = vmatprep.mubr.f32.mxu1 %v8784_v61 }
 0x320   :  { %3312 = vmatmul.mubr.f32.gmra.mxu0 %v8823_v51  ;;  %3473 = vmatmul.mubr.f32.gmra.mxu1 %v8823_v51 }
 0x321   :  { %3317 = vmatprep.mubr.f32.mxu0 %v8784_v61  ;;  %3478 = vmatprep.mubr.f32.mxu1 %v8784_v61 }
 0x324   :  { %3318 = vmatmul.mubr.f32.gmra.mxu0 %v8824_v22  ;;  %3479 = vmatmul.mubr.f32.gmra.mxu1 %v8824_v22 }
 0x325   :  { %3323 = vmatprep.mubr.f32.mxu0 %v8784_v61  ;;  %3484 = vmatprep.mubr.f32.mxu1 %v8784_v61 }
 0x328   :  { %3324 = vmatmul.mubr.f32.gmra.mxu0 %v8825_v29  ;;  %3485 = vmatmul.mubr.f32.gmra.mxu1 %v8825_v29  ;;  %v7577_v29 = vpop.permute.xlu1 %2834 }
 0x329   :  { %3329 = vmatprep.mubr.f32.mxu0 %v8784_v61  ;;  %3490 = vmatprep.mubr.f32.mxu1 %v8784_v61 }
 0x32c   :  { %3330 = vmatmul.mubr.f32.gmra.mxu0 %v8826_v17  ;;  %3491 = vmatmul.mubr.f32.gmra.mxu1 %v8826_v17 }
 0x32d   :  { %3335 = vmatprep.mubr.f32.mxu0 %v8784_v61  ;;  %3496 = vmatprep.mubr.f32.mxu1 %v8784_v61 }
 0x330   :  { %3336 = vmatmul.mubr.f32.gmra.mxu0 %v7211_v23  ;;  %3497 = vmatmul.mubr.f32.gmra.mxu1 %v7211_v23 }
 0x331   :  { %3341 = vmatprep.mubr.f32.mxu0 %v8784_v61  ;;  %3502 = vmatprep.mubr.f32.mxu1 %v8784_v61 }
 0x334   :  { %3342 = vmatmul.mubr.f32.gmra.mxu0 %v7224_v16  ;;  %3503 = vmatmul.mubr.f32.gmra.mxu1 %v7224_v16 }
 0x335   :  { %3347 = vmatprep.mubr.f32.mxu0 %v8784_v61  ;;  %3508 = vmatprep.mubr.f32.mxu1 %v8784_v61 }
 0x338   :  { %3348 = vmatmul.mubr.f32.gmra.mxu0 %v7244_v58  ;;  %3509 = vmatmul.mubr.f32.gmra.mxu1 %v7244_v58 }
 0x339   :  { %3353 = vmatprep.mubr.f32.mxu0 %v8784_v61  ;;  %3514 = vmatprep.mubr.f32.mxu1 %v8784_v61 }
 0x33c   :  { %3354 = vmatmul.mubr.f32.gmra.mxu0 %v7268_v44  ;;  %3515 = vmatmul.mubr.f32.gmra.mxu1 %v7268_v44 }
 0x33d   :  { %3359 = vmatprep.mubr.f32.mxu0 %v8784_v61  ;;  %3520 = vmatprep.mubr.f32.mxu1 %v8784_v61 }
 0x340   :  { %3360 = vmatmul.mubr.f32.gmra.mxu0 %v7293_v34  ;;  %3521 = vmatmul.mubr.f32.gmra.mxu1 %v7293_v34 }
 0x341   :  { %3365 = vmatprep.mubr.f32.mxu0 %v8784_v61  ;;  %3526 = vmatprep.mubr.f32.mxu1 %v8784_v61 }
 0x344   :  { %3366 = vmatmul.mubr.f32.gmra.mxu0 %v7318_v2  ;;  %3527 = vmatmul.mubr.f32.gmra.mxu1 %v7318_v2 }
 0x345   :  { %3371 = vmatprep.mubr.f32.mxu0 %v8784_v61  ;;  %3532 = vmatprep.mubr.f32.mxu1 %v8784_v61 }
 0x348   :  { %3372 = vmatmul.mubr.f32.gmra.mxu0 %v7343_v56  ;;  %3533 = vmatmul.mubr.f32.gmra.mxu1 %v7343_v56 }
 0x349   :  { %3377 = vmatprep.mubr.f32.mxu0 %v8784_v61  ;;  %3538 = vmatprep.mubr.f32.mxu1 %v8784_v61 }
 0x34c   :  { %3378 = vmatmul.mubr.f32.gmra.mxu0 %v7368_v8  ;;  %3539 = vmatmul.mubr.f32.gmra.mxu1 %v7368_v8 }
 0x34d   :  { %3383 = vmatprep.mubr.f32.mxu0 %v8784_v61  ;;  %3544 = vmatprep.mubr.f32.mxu1 %v8784_v61 }
 0x350   :  { %3384 = vmatmul.mubr.f32.gmra.mxu0 %v7393_v55  ;;  %3545 = vmatmul.mubr.f32.gmra.mxu1 %v7393_v55 }
 0x384   :  { %v7467_v16 = vpop.f32.mrf.mxu1 }
 0x386   :  { %v2973_v23 = vpop.f32.mrf.mxu0  ;;  %v7469_v58 = vpop.f32.mrf.mxu1 }
 0x387   :  { %v2974_v17 = vadd.f32 %v2973_v23, %v2830_v33 }
 0x388   :  { %v2975_v44 = vpop.f32.mrf.mxu0  ;;  %v7471_v34 = vpop.f32.mrf.mxu1 }
 0x389   :  { %v2976_v11 = vadd.f32 %v2975_v44, %v2830_v33  ;;  %v3135_v44 = vadd.f32 %v7467_v16, %v2830_v33 }
 0x38a   :  { %v2979_v2 = vpop.f32.mrf.mxu0  ;;  %v7473_v56 = vpop.f32.mrf.mxu1 }
 0x38c   :  { %v2981_v48 = vpop.f32.mrf.mxu0  ;;  %v7475_v21 = vpop.f32.mrf.mxu1 }
 0x38e   :  { %v7477_v24 = vpop.f32.mrf.mxu0  ;;  %v7479_v61 = vpop.f32.mrf.mxu1 }
 0x390   :  { %v2987_v49 = vpop.f32.mrf.mxu0  ;;  %v7481_v30 = vpop.f32.mrf.mxu1 }
 0x392   :  { %v7483_v42 = vpop.f32.mrf.mxu0  ;;  %v7485_v47 = vpop.f32.mrf.mxu1 }
 0x394   :  { %v7487_v13 = vpop.f32.mrf.mxu0  ;;  %v7489_v25 = vpop.f32.mrf.mxu1 }
 0x396   :  { %v7491_v8 = vpop.f32.mrf.mxu0  ;;  %v7493_v37 = vpop.f32.mrf.mxu1 }
 0x398   :  { %v7495_v5 = vpop.f32.mrf.mxu0  ;;  %v7497_v45 = vpop.f32.mrf.mxu1 }
 0x39a   :  { %v7499_v32 = vpop.f32.mrf.mxu0  ;;  %v7501_v35 = vpop.f32.mrf.mxu1 }
 0x39c   :  { %v7503_v14 = vpop.f32.mrf.mxu0  ;;  %v7505_v3 = vpop.f32.mrf.mxu1 }
 0x39e   :  { %v7507_v1 = vpop.f32.mrf.mxu0  ;;  %v7509_v6 = vpop.f32.mrf.mxu1 }
 0x3a0   :  { %v7511_v53 = vpop.f32.mrf.mxu0  ;;  %v7513_v18 = vpop.f32.mrf.mxu1 }
 0x3a2   :  { %v7515_v62 = vpop.f32.mrf.mxu0  ;;  %v7517_v26 = vpop.f32.mrf.mxu1 }
 0x3a4   :  { %v7519_v57 = vpop.f32.mrf.mxu0  ;;  %v7521_v27 = vpop.f32.mrf.mxu1 }
 0x3a6   :  { %v7523_v12 = vpop.f32.mrf.mxu0  ;;  %v7525_v7 = vpop.f32.mrf.mxu1 }
 0x3a8   :  { %v7527_v52 = vpop.f32.mrf.mxu0 }
 0x3aa   :  { %v7529_v20 = vpop.f32.mrf.mxu0  ;;  %v7531_v50 = vpop.f32.mrf.mxu1 }
 0x3ac   :  { %v7533_v0 = vpop.f32.mrf.mxu0  ;;  %v7535_v38 = vpop.f32.mrf.mxu1 }
 0x3b0   :  { %v7537_v15 = vpop.f32.mrf.mxu0  ;;  %v7539_v60 = vpop.f32.mrf.mxu1 }
 0x3b2   :  { %v7541_v31 = vpop.f32.mrf.mxu0  ;;  %v7543_v10 = vpop.f32.mrf.mxu1 }
 0x3b6   :  { %v7545_v55 = vpop.f32.mrf.mxu0  ;;  %v7547_v4 = vpop.f32.mrf.mxu1 }
 0x3b7   :  { %8827 = vst [vmem:[#allocation89_spill] sm:$0xff] %v7547_v4 }
 0x3b8   :  { %v7549_v63 = vpop.f32.mrf.mxu0  ;;  %v7551_v9 = vpop.f32.mrf.mxu1 }
 0x3b9   :  { %8828 = vst [vmem:[#allocation129_spill] sm:$0xff] %v7551_v9 }
 0x3bc   :  { %v7553_v39 = vpop.f32.mrf.mxu0  ;;  %v7555_v43 = vpop.f32.mrf.mxu1 }
 0x3bd   :  { %8829 = vst [vmem:[#allocation71_spill] sm:$0xff] %v7553_v39  ;;  %8830 = vst [vmem:[#allocation108_spill] sm:$0xff] %v7555_v43 }
 0x3be   :  { %v7557_v28 = vpop.f32.mrf.mxu0  ;;  %v7559_v41 = vpop.f32.mrf.mxu1 }
 0x3bf   :  { %8831 = vst [vmem:[#allocation52_spill] sm:$0xff] %v7559_v41  ;;  %v2982_v41 = vadd.f32 %v2981_v48, %v7577_v29 }
 0x3c2   :  { %v7561_v36 = vpop.f32.mrf.mxu0  ;;  %v7563_v40 = vpop.f32.mrf.mxu1 }
 0x3c3   :  { %8832 = vst [vmem:[#allocation84_spill] sm:$0xff] %v7561_v36  ;;  %8833 = vst [vmem:[#allocation49_spill] sm:$0xff] %v7563_v40  ;;  %v7580_v40 = vpop.permute.xlu0 %2839  ;;  %v3739_v36 = vmax.f32 %v2974_v17, %v2976_v11  ;;  %v7596_v11 = vpop.permute.xlu1 %2844 }
 0x3c4   :  { %v7565_v19 = vpop.f32.mrf.mxu0  ;;  %v7567_v54 = vpop.f32.mrf.mxu1  ;;  %v2988_v43 = vadd.f32 %v2987_v49, %v7580_v40  ;;  %v2986_v23 = vadd.f32 %v7477_v24, %v7580_v40  ;;  %v3141_v49 = vadd.f32 %v7471_v34, %v7577_v29  ;;  %v2994_v16 = vadd.f32 %v7487_v13, %v7596_v11 }
 0x3c5   :  { %8834 = vst [vmem:[#allocation92_spill] sm:$0xff] %v7565_v19  ;;  %8835 = vst [vmem:[#allocation42_spill] sm:$0xff] %v7567_v54  ;;  %v2980_v54 = vadd.f32 %v2979_v2, %v7577_v29  ;;  %v3740_v2 = vmax.f32 %v3739_v36, %v3135_v44  ;;  %v3147_v24 = vadd.f32 %v7475_v21, %v7580_v40 }
 0x3c6   :  { %v3757_v17 = vmax.f32 %v2986_v23, %v2988_v43  ;;  %v3143_v13 = vadd.f32 %v7473_v56, %v7577_v29  ;;  %v3149_v21 = vadd.f32 %v7479_v61, %v7580_v40  ;;  %v3155_v56 = vadd.f32 %v7485_v47, %v7596_v11 }
 0x3c7   :  { %v3748_v19 = vmax.f32 %v2980_v54, %v2982_v41  ;;  %v7609_v44 = vpop.permute.xlu0 %2849 }
 0x3c8   :  { %v7569_v59 = vpop.f32.mrf.mxu0  ;;  %v7571_v46 = vpop.f32.mrf.mxu1  ;;  %v3758_v23 = vmax.f32 %v3757_v17, %v3147_v24 }
 0x3c9   :  { %8836 = vst [vmem:[#allocation62_spill] sm:$0xff] %v7569_v59  ;;  %8837 = vst [vmem:[#allocation63_spill] sm:$0xff] %v7571_v46  ;;  %v3749_v54 = vmax.f32 %v3748_v19, %v3141_v49  ;;  %v3000_v19 = vadd.f32 %v7495_v5, %v7609_v44  ;;  %v7624_v17 = vpop.permute.xlu1 %2854 }
 0x3ca   :  { %v7573_v51 = vpop.f32.mrf.mxu0  ;;  %v7575_v22 = vpop.f32.mrf.mxu1 }
 0x3cb   :  { %8838 = vst [vmem:[#allocation51_spill] sm:$0xff] %v7573_v51  ;;  %8839 = vst [vmem:[#allocation61_spill] sm:$0xff] %v7575_v22  ;;  %v8842_v51 = vlaneseq }
 0x3cd   :  { %v3554_v22 = vand.u32 127, %v8842_v51  ;;  %v3137_v51 = vadd.f32 %v7469_v58, %v2830_v33 }
 0x3ce   :  { %v7584_v59 = vpop.f32.mrf.mxu0  ;;  %v7586_v46 = vpop.f32.mrf.mxu1 }
 0x3cf   :  { %8840 = vst [vmem:[#allocation53_spill] sm:$0xff] %v7584_v59  ;;  %8841 = vst [vmem:[#allocation109_spill] sm:$0xff] %v7586_v46  ;;  %v7603_v41 = vadd.s32 896, %v3554_v22  ;;  %v3741_v34 = vmax.f32 %v3740_v2, %v3137_v51 }
 0x3d0   :  { %v7592_v48 = vpop.f32.mrf.mxu0  ;;  %v7594_v9 = vpop.f32.mrf.mxu1 }
 0x3d1   :  { %8843 = vst [vmem:[#allocation72_spill] sm:$0xff] %v7592_v48  ;;  %8844 = vst [vmem:[#allocation73_spill] sm:$0xff] %v7594_v9  ;;  %v2992_v9 = vadd.f32 %v7483_v42, %v7596_v11  ;;  %vm3578_vm0 = vcmp.lt.s32.totalorder %v7603_v41, 1000  ;;  %v3750_v48 = vmax.f32 %v3749_v54, %v3143_v13 }
 0x3d3   :  { %v3766_v58 = vmax.f32 %v2992_v9, %v2994_v16  ;;  %v2998_v9 = vadd.f32 %v7491_v8, %v7609_v44  ;;  %v3006_v8 = vadd.f32 %v7503_v14, %v7624_v17 }
 0x3d4   :  { %v3295_v46 = vpop.f32.mrf.mxu0  ;;  %v3456_v36 = vpop.f32.mrf.mxu1 }
 0x3d5   :  { %v3296_v43 = vadd.f32 %v3295_v46, %v2830_v33  ;;  %v3153_v46 = vadd.f32 %v7481_v30, %v7596_v11  ;;  %v3457_v16 = vadd.f32 %v3456_v36, %v2830_v33  ;;  %v3159_v30 = vadd.f32 %v7489_v25, %v7609_v44 }
 0x3d6   :  { %v3297_v22 = vpop.f32.mrf.mxu0  ;;  %v3458_v49 = vpop.f32.mrf.mxu1  ;;  %v3165_v25 = vadd.f32 %v7497_v45, %v7624_v17 }
 0x3d7   :  { %v3742_v42 = vmax.f32 %v3741_v34, %v3296_v43  ;;  %v3298_v59 = vadd.f32 %v3297_v22, %v2830_v33  ;;  %v3459_v51 = vadd.f32 %v3458_v49, %v2830_v33  ;;  %v3759_v34 = vmax.f32 %v3758_v23, %v3149_v21 }
 0x3d8   :  { %v3301_v5 = vpop.f32.mrf.mxu0  ;;  %v3462_v2 = vpop.f32.mrf.mxu1  ;;  %v3767_v54 = vmax.f32 %v3766_v58, %v3153_v46  ;;  %v3775_v43 = vmax.f32 %v2998_v9, %v3000_v19  ;;  %v7634_v33 = vadd.f32 %v7493_v37, %v7609_v44 }
 0x3d9   :  { %v3743_v61 = vmax.f32 %v3742_v42, %v3298_v59  ;;  %v3302_v24 = vadd.f32 %v3301_v5, %v7577_v29  ;;  %v3004_v59 = vadd.f32 %v7499_v32, %v7624_v17  ;;  %v7641_v19 = vpop.permute.xlu0 %2859  ;;  %v3463_v14 = vadd.f32 %v3462_v2, %v7577_v29 }
 0x3da   :  { %v3303_v13 = vpop.f32.mrf.mxu0  ;;  %v3464_v47 = vpop.f32.mrf.mxu1  ;;  %v3602_v37 = vsel %vm3578_vm0, %v3459_v51, -inf  ;;  %v3768_v21 = vmax.f32 %v3767_v54, %v3155_v56  ;;  %v3776_v42 = vmax.f32 %v3775_v43, %v3159_v30  ;;  %v3012_v32 = vadd.f32 %v7511_v53, %v7641_v19 }
 0x3db   :  { %v3751_v22 = vmax.f32 %v3750_v48, %v3302_v24  ;;  %v3304_v39 = vadd.f32 %v3303_v13, %v7577_v29  ;;  %v3744_v4 = vmax.f32 %v3743_v61, %v3457_v16  ;;  %v3465_v36 = vadd.f32 %v3464_v47, %v7577_v29  ;;  %v7659_v51 = vpop.permute.xlu1 %2864 }
 0x3dc   :  { %v3307_v23 = vpop.f32.mrf.mxu0  ;;  %v3468_v58 = vpop.f32.mrf.mxu1  ;;  %v3784_v5 = vmax.f32 %v3004_v59, %v3006_v8  ;;  %v3010_v29 = vadd.f32 %v7507_v1, %v7641_v19  ;;  %v3777_v43 = vmax.f32 %v3776_v42, %v7634_v33  ;;  %v3171_v1 = vadd.f32 %v7505_v3, %v7641_v19 }
 0x3dd   :  { %v3752_v48 = vmax.f32 %v3751_v22, %v3304_v39  ;;  %v3308_v49 = vadd.f32 %v3307_v23, %v7580_v40  ;;  %v3745_v9 = vmax.f32 %v3744_v4, %v3602_v37  ;;  %v7652_v39 = vadd.f32 %v7501_v35, %v7624_v17 }
 0x3de   :  { %v3309_v45 = vpop.f32.mrf.mxu0  ;;  %v3470_v46 = vpop.f32.mrf.mxu1  ;;  %v3610_v56 = vsel %vm3578_vm0, %v3465_v36, -inf  ;;  %v3469_v54 = vadd.f32 %v3468_v58, %v7580_v40  ;;  %v3793_v13 = vmax.f32 %v3010_v29, %v3012_v32  ;;  %v3018_v47 = vadd.f32 %v7519_v57, %v7659_v51 }
 0x3df   :  { %v3753_v16 = vmax.f32 %v3752_v48, %v3463_v14  ;;  %v3760_v61 = vmax.f32 %v3759_v34, %v3308_v49  ;;  %v3310_v24 = vadd.f32 %v3309_v45, %v7580_v40  ;;  %v3471_v53 = vadd.f32 %v3470_v46, %v7580_v40  ;;  %3746 = vmax.xlane.f32.xlu0 %v3745_v9 }
 0x3e0   :  { %v3313_v2 = vpop.f32.mrf.mxu0  ;;  %v3474_v4 = vpop.f32.mrf.mxu1  ;;  %v3785_v59 = vmax.f32 %v3784_v5, %v3165_v25  ;;  %v7671_v58 = vadd.f32 %v7509_v6, %v7641_v19  ;;  %v3016_v33 = vadd.f32 %v7515_v62, %v7659_v51  ;;  %v3794_v6 = vmax.f32 %v3793_v13, %v3171_v1 }
 0x3e1   :  { %v3754_v34 = vmax.f32 %v3753_v16, %v3610_v56  ;;  %v3761_v30 = vmax.f32 %v3760_v61, %v3310_v24  ;;  %v3314_v35 = vadd.f32 %v3313_v2, %v7596_v11  ;;  %v3475_v3 = vadd.f32 %v3474_v4, %v7596_v11  ;;  %v7678_v25 = vpop.permute.xlu0 %2869 }
 0x3e2   :  { %v3315_v8 = vpop.f32.mrf.mxu0  ;;  %v3476_v22 = vpop.f32.mrf.mxu1  ;;  %v3618_v57 = vsel %vm3578_vm0, %v3471_v53, -inf  ;;  %v3177_v32 = vadd.f32 %v7513_v18, %v7659_v51  ;;  %v3802_v62 = vmax.f32 %v3016_v33, %v3018_v47  ;;  %v3024_v45 = vadd.f32 %v7527_v52, %v7678_v25 }
 0x3e3   :  { %v3769_v36 = vmax.f32 %v3768_v21, %v3314_v35  ;;  %v3316_v23 = vadd.f32 %v3315_v8, %v7596_v11  ;;  %3755 = vmax.xlane.f32.xlu1 %v3754_v34  ;;  %v3762_v40 = vmax.f32 %v3761_v30, %v3469_v54  ;;  %v3477_v37 = vadd.f32 %v3476_v22, %v7596_v11 }
 0x3e4   :  { %v3319_v14 = vpop.f32.mrf.mxu0  ;;  %v3480_v48 = vpop.f32.mrf.mxu1  ;;  %v3786_v5 = vmax.f32 %v3785_v59, %v7652_v39  ;;  %v7690_v24 = vadd.f32 %v7517_v26, %v7659_v51  ;;  %v3022_v18 = vadd.f32 %v7523_v12, %v7678_v25  ;;  %v3183_v29 = vadd.f32 %v7521_v27, %v7678_v25 }
 0x3e5   :  { %v3770_v49 = vmax.f32 %v3769_v36, %v3316_v23  ;;  %v3320_v21 = vadd.f32 %v3319_v14, %v7609_v44  ;;  %v3763_v42 = vmax.f32 %v3762_v40, %v3618_v57  ;;  %v7697_v39 = vpop.permute.xlu1 %2874  ;;  %v3481_v2 = vadd.f32 %v3480_v48, %v7609_v44  ;;  %v7704_v1 = vpop.permute.xlu0 %2879 }
 0x3e6   :  { %v3321_v46 = vpop.f32.mrf.mxu0  ;;  %v3482_v9 = vpop.f32.mrf.mxu1  ;;  %v3626_v26 = vsel %vm3578_vm0, %v3477_v37, -inf  ;;  %v3795_v54 = vmax.f32 %v3794_v6, %v7671_v58  ;;  %v3803_v12 = vmax.f32 %v3802_v62, %v3177_v32  ;;  %v3811_v30 = vmax.f32 %v3022_v18, %v3024_v45 }
 0x3e7   :  { %v3778_v16 = vmax.f32 %v3777_v43, %v3320_v21  ;;  %v3322_v61 = vadd.f32 %v3321_v46, %v7609_v44  ;;  %3764 = vmax.xlane.f32.xlu0 %v3763_v42  ;;  %v3771_v11 = vmax.f32 %v3770_v49, %v3475_v3  ;;  %v3483_v52 = vadd.f32 %v3482_v9, %v7609_v44 }
 0x3e8   :  { %v3325_v56 = vpop.f32.mrf.mxu0  ;;  %v3486_v53 = vpop.f32.mrf.mxu1  ;;  %v3030_v13 = vadd.f32 %v7533_v0, %v7697_v39  ;;  %v3028_v22 = vadd.f32 %v7529_v20, %v7697_v39  ;;  %v3036_v59 = vadd.f32 %v7541_v31, %v7704_v1  ;;  %v3804_v48 = vmax.f32 %v3803_v12, %v7690_v24 }
 0x3e9   :  { %v3779_v4 = vmax.f32 %v3778_v16, %v3322_v61  ;;  %v3326_v34 = vadd.f32 %v3325_v56, %v7624_v17  ;;  %v3772_v43 = vmax.f32 %v3771_v11, %v3626_v26  ;;  %v3634_v36 = vsel %vm3578_vm0, %v3483_v52, -inf  ;;  %v7745_v12 = vpop.permute.xlu0 %2889 }
 0x3ea   :  { %v3327_v35 = vpop.f32.mrf.mxu0  ;;  %v3488_v27 = vpop.f32.mrf.mxu1  ;;  %v3487_v23 = vadd.f32 %v3486_v53, %v7624_v17  ;;  %v3185_v20 = vadd.f32 %v7525_v7, %v7678_v25  ;;  %v3812_v31 = vmax.f32 %v3811_v30, %v3183_v29  ;;  %v3034_v57 = vadd.f32 %v7537_v15, %v7704_v1 }
 0x3eb   :  { %v3780_v47 = vmax.f32 %v3779_v4, %v3481_v2  ;;  %v3787_v44 = vmax.f32 %v3786_v5, %v3326_v34  ;;  %v3328_v8 = vadd.f32 %v3327_v35, %v7624_v17  ;;  %3773 = vmax.xlane.f32.xlu0 %v3772_v43  ;;  %v3489_v3 = vadd.f32 %v3488_v27, %v7624_v17  ;;  %v7729_v15 = vpop.permute.xlu1 %2884 }
 0x3ec   :  { %v3331_v40 = vpop.f32.mrf.mxu0  ;;  %v3492_v58 = vpop.f32.mrf.mxu1  ;;  %v3820_v21 = vmax.f32 %v3028_v22, %v3030_v13  ;;  %v3189_v17 = vadd.f32 %v7531_v50, %v7697_v39  ;;  %v3191_v62 = vadd.f32 %v7535_v38, %v7697_v39  ;;  %v3829_v45 = vmax.f32 %v3034_v57, %v3036_v59 }
 0x3ed   :  { %v3781_v33 = vmax.f32 %v3780_v47, %v3634_v36  ;;  %v3788_v0 = vmax.f32 %v3787_v44, %v3328_v8  ;;  %v3332_v14 = vadd.f32 %v3331_v40, %v7641_v19  ;;  %v3493_v5 = vadd.f32 %v3492_v58, %v7641_v19 }
 0x3ee   :  { %v3333_v49 = vpop.f32.mrf.mxu0  ;;  %v3494_v37 = vpop.f32.mrf.mxu1  ;;  %v3642_v11 = vsel %vm3578_vm0, %v3489_v3, -inf  ;;  %v3813_v24 = vmax.f32 %v3812_v31, %v3185_v20  ;;  %v3195_v50 = vadd.f32 %v7539_v60, %v7704_v1  ;;  %v3042_v38 = vadd.f32 %v7549_v63, %v7729_v15 }
 0x3ef   :  { %v3796_v42 = vmax.f32 %v3795_v54, %v3332_v14  ;;  %v3334_v6 = vadd.f32 %v3333_v49, %v7641_v19  ;;  %3782 = vmax.xlane.f32.xlu1 %v3781_v33  ;;  %v3789_v32 = vmax.f32 %v3788_v0, %v3487_v23  ;;  %v3495_v7 = vadd.f32 %v3494_v37, %v7641_v19  ;;  %v8846_v33 = vld [vmem:[#allocation71_spill] sm:$0xff]  ;;  %v8847_v49 = vld [vmem:[#allocation129_spill] sm:$0xff] }
 0x3f0   :  { %v3337_v46 = vpop.f32.mrf.mxu0  ;;  %v3498_v9 = vpop.f32.mrf.mxu1  ;;  %v3821_v56 = vmax.f32 %v3820_v21, %v3189_v17  ;;  %v3830_v4 = vmax.f32 %v3829_v45, %v3195_v50  ;;  %v3040_v34 = vadd.f32 %v7545_v55, %v7729_v15  ;;  %v3197_v13 = vadd.f32 %v7543_v10, %v7704_v1 }
 0x3f1   :  { %v3797_v16 = vmax.f32 %v3796_v42, %v3334_v6  ;;  %v3338_v61 = vadd.f32 %v3337_v46, %v7659_v51  ;;  %v3790_v52 = vmax.f32 %v3789_v32, %v3642_v11  ;;  %v3650_v26 = vsel %vm3578_vm0, %v3495_v7, -inf }
 0x3f2   :  { %v3339_v18 = vpop.f32.mrf.mxu0  ;;  %v3500_v29 = vpop.f32.mrf.mxu1  ;;  %v3499_v60 = vadd.f32 %v3498_v9, %v7659_v51  ;;  %v3838_v55 = vmax.f32 %v3040_v34, %v3042_v38  ;;  %v3048_v47 = vadd.f32 %v7557_v28, %v7745_v12  ;;  %v3822_v22 = vmax.f32 %v3821_v56, %v3191_v62  ;;  %v8848_v62 = vld [vmem:[#allocation92_spill] sm:$0xff] }
 0x3f3   :  { %v3798_v53 = vmax.f32 %v3797_v16, %v3493_v5  ;;  %v3805_v2 = vmax.f32 %v3804_v48, %v3338_v61  ;;  %v3340_v19 = vadd.f32 %v3339_v18, %v7659_v51  ;;  %3791 = vmax.xlane.f32.xlu0 %v3790_v52  ;;  %v3501_v27 = vadd.f32 %v3500_v29, %v7659_v51  ;;  %v8845_v51 = vld [vmem:[#allocation89_spill] sm:$0xff]  ;;  %v7759_v28 = vpop.permute.xlu1 %2894  ;;  %v8849_v9 = vld [vmem:[#allocation108_spill] sm:$0xff]  ;;  %v7779_v34 = vpop.permute.xlu0 %2899 }
 0x3f4   :  { %v3343_v54 = vpop.f32.mrf.mxu0  ;;  %v3504_v63 = vpop.f32.mrf.mxu1  ;;  %v3831_v40 = vmax.f32 %v3830_v4, %v3197_v13  ;;  %v3201_v58 = vadd.f32 %v8845_v51, %v7729_v15  ;;  %v3046_v0 = vadd.f32 %v8846_v33, %v7745_v12  ;;  %v3203_v37 = vadd.f32 %v8847_v49, %v7729_v15  ;;  %v8850_v16 = vld [vmem:[#allocation84_spill] sm:$0xff] }
 0x3f5   :  { %v3799_v30 = vmax.f32 %v3798_v53, %v3650_v26  ;;  %v3806_v35 = vmax.f32 %v3805_v2, %v3340_v19  ;;  %v3344_v43 = vadd.f32 %v3343_v54, %v7678_v25  ;;  %v3505_v48 = vadd.f32 %v3504_v63, %v7678_v25  ;;  %v8856_v49 = vld [vmem:[#allocation72_spill] sm:$0xff] }
 0x3f6   :  { %v3345_v44 = vpop.f32.mrf.mxu0  ;;  %v3506_v8 = vpop.f32.mrf.mxu1  ;;  %v3658_v57 = vsel %vm3578_vm0, %v3501_v27, -inf  ;;  %v3839_v21 = vmax.f32 %v3838_v55, %v3201_v58  ;;  %v3847_v42 = vmax.f32 %v3046_v0, %v3048_v47  ;;  %v3054_v45 = vadd.f32 %v8848_v62, %v7759_v28  ;;  %v8852_v27 = vld [vmem:[#allocation49_spill] sm:$0xff]  ;;  %v8855_v58 = vld [vmem:[#allocation62_spill] sm:$0xff] }
 0x3f7   :  { %v3814_v59 = vmax.f32 %v3813_v24, %v3344_v43  ;;  %v3346_v36 = vadd.f32 %v3345_v44, %v7678_v25  ;;  %3800 = vmax.xlane.f32.xlu1 %v3799_v30  ;;  %v3807_v23 = vmax.f32 %v3806_v35, %v3499_v60  ;;  %v3507_v10 = vadd.f32 %v3506_v8, %v7678_v25  ;;  %v8851_v30 = vld [vmem:[#allocation52_spill] sm:$0xff]  ;;  %v8853_v43 = vld [vmem:[#allocation51_spill] sm:$0xff] }
 0x3f8   :  { %v3349_v3 = vpop.f32.mrf.mxu0  ;;  %v3510_v14 = vpop.f32.mrf.mxu1  ;;  %v3207_v5 = vadd.f32 %v8849_v9, %v7745_v12  ;;  %v3052_v61 = vadd.f32 %v8850_v16, %v7759_v28  ;;  %v3840_v53 = vmax.f32 %v3839_v21, %v3203_v37  ;;  %v3209_v35 = vadd.f32 %v8851_v30, %v7745_v12  ;;  %v8858_v9 = vld [vmem:[#allocation53_spill] sm:$0xff] }
 0x3f9   :  { %v3815_v20 = vmax.f32 %v3814_v59, %v3346_v36  ;;  %v3350_v31 = vadd.f32 %v3349_v3, %v7697_v39  ;;  %v3808_v17 = vmax.f32 %v3807_v23, %v3658_v57  ;;  %v3666_v11 = vsel %vm3578_vm0, %v3507_v10, -inf }
 0x3fa   :  { %v3351_v6 = vpop.f32.mrf.mxu0  ;;  %v3512_v32 = vpop.f32.mrf.mxu1  ;;  %v3511_v24 = vadd.f32 %v3510_v14, %v7697_v39  ;;  %v3848_v2 = vmax.f32 %v3847_v42, %v3207_v5  ;;  %v3856_v26 = vmax.f32 %v3052_v61, %v3054_v45  ;;  %v3060_v13 = vadd.f32 %v8853_v43, %v7779_v34 }
 0x3fb   :  { %v3816_v7 = vmax.f32 %v3815_v20, %v3505_v48  ;;  %v3823_v46 = vmax.f32 %v3822_v22, %v3350_v31  ;;  %v3352_v25 = vadd.f32 %v3351_v6, %v7697_v39  ;;  %3809 = vmax.xlane.f32.xlu0 %v3808_v17  ;;  %v3513_v52 = vadd.f32 %v3512_v32, %v7697_v39  ;;  %v7797_v14 = vpop.permute.xlu1 %2904 }
 0x3fc   :  { %v3355_v50 = vpop.f32.mrf.mxu0  ;;  %v3516_v38 = vpop.f32.mrf.mxu1  ;;  %v3213_v39 = vadd.f32 %v8852_v27, %v7759_v28  ;;  %v3849_v23 = vmax.f32 %v3848_v2, %v3209_v35  ;;  %v3058_v33 = vadd.f32 %v8855_v58, %v7779_v34  ;;  %v3066_v37 = vadd.f32 %v8856_v49, %v7797_v14 }
 0x3fd   :  { %v3817_v18 = vmax.f32 %v3816_v7, %v3666_v11  ;;  %v3824_v29 = vmax.f32 %v3823_v46, %v3352_v25  ;;  %v3356_v56 = vadd.f32 %v3355_v50, %v7704_v1  ;;  %v3517_v8 = vadd.f32 %v3516_v38, %v7704_v1  ;;  %v8857_v46 = vld [vmem:[#allocation63_spill] sm:$0xff] }
 0x3fe   :  { %v3357_v19 = vpop.f32.mrf.mxu0  ;;  %v3518_v4 = vpop.f32.mrf.mxu1  ;;  %v3674_v36 = vsel %vm3578_vm0, %v3513_v52, -inf  ;;  %v3857_v48 = vmax.f32 %v3856_v26, %v3213_v39  ;;  %v3865_v57 = vmax.f32 %v3058_v33, %v3060_v13  ;;  %v3219_v25 = vadd.f32 %v8857_v46, %v7779_v34 }
 0x3ff   :  { %v3832_v60 = vmax.f32 %v3831_v40, %v3356_v56  ;;  %v3358_v54 = vadd.f32 %v3357_v19, %v7704_v1  ;;  %3818 = vmax.xlane.f32.xlu1 %v3817_v18  ;;  %v3825_v63 = vmax.f32 %v3824_v29, %v3511_v24  ;;  %v3519_v55 = vadd.f32 %v3518_v4, %v7704_v1  ;;  %v8854_v40 = vld [vmem:[#allocation42_spill] sm:$0xff] }
 0x400   :  { %v3361_v47 = vpop.f32.mrf.mxu0  ;;  %v3522_v44 = vpop.f32.mrf.mxu1  ;;  %v3215_v51 = vadd.f32 %v8854_v40, %v7759_v28  ;;  %v3064_v5 = vadd.f32 %v8858_v9, %v7797_v14  ;;  %v3866_v18 = vmax.f32 %v3865_v57, %v3219_v25 }
 0x401   :  { %v3833_v22 = vmax.f32 %v3832_v60, %v3358_v54  ;;  %v3362_v59 = vadd.f32 %v3361_v47, %v7729_v15  ;;  %v3826_v3 = vmax.f32 %v3825_v63, %v3674_v36  ;;  %v3682_v21 = vsel %vm3578_vm0, %v3519_v55, -inf  ;;  %v8859_v60 = vld [vmem:[#allocation61_spill] sm:$0xff] }
 0x402   :  { %v3363_v0 = vpop.f32.mrf.mxu0  ;;  %v3524_v10 = vpop.f32.mrf.mxu1  ;;  %v3523_v62 = vadd.f32 %v3522_v44, %v7729_v15  ;;  %v3858_v11 = vmax.f32 %v3857_v48, %v3215_v51  ;;  %v3874_v29 = vmax.f32 %v3064_v5, %v3066_v37  ;;  %v3221_v54 = vadd.f32 %v8859_v60, %v7779_v34  ;;  %v8860_v63 = vld [vmem:[#allocation109_spill] sm:$0xff] }
 0x403   :  { %v3834_v1 = vmax.f32 %v3833_v22, %v3517_v8  ;;  %v3841_v20 = vmax.f32 %v3840_v53, %v3362_v59  ;;  %v3364_v31 = vadd.f32 %v3363_v0, %v7729_v15  ;;  %v3525_v42 = vadd.f32 %v3524_v10, %v7729_v15  ;;  %3827 = vmax.xlane.f32.xlu0 %v3826_v3  ;;  %v8861_v51 = vld [vmem:[#allocation73_spill] sm:$0xff] }
 0x404   :  { %v3367_v6 = vpop.f32.mrf.mxu0  ;;  %v3528_v32 = vpop.f32.mrf.mxu1  ;;  %v3225_v30 = vadd.f32 %v8860_v63, %v7797_v14  ;;  %v3867_v55 = vmax.f32 %v3866_v18, %v3221_v54  ;;  %v3227_v58 = vadd.f32 %v8861_v51, %v7797_v14 }
 0x405   :  { %v3835_v17 = vmax.f32 %v3834_v1, %v3682_v21  ;;  %v3842_v45 = vmax.f32 %v3841_v20, %v3364_v31  ;;  %v3368_v7 = vadd.f32 %v3367_v6, %v7745_v12  ;;  %v3690_v15 = vsel %vm3578_vm0, %v3525_v42, -inf }
 0x406   :  { %v3369_v16 = vpop.f32.mrf.mxu0  ;;  %v3530_v61 = vpop.f32.mrf.mxu1  ;;  %v3529_v19 = vadd.f32 %v3528_v32, %v7745_v12  ;;  %v3875_v47 = vmax.f32 %v3874_v29, %v3225_v30 }
 0x407   :  { %v3843_v24 = vmax.f32 %v3842_v45, %v3523_v62  ;;  %v3850_v50 = vmax.f32 %v3849_v23, %v3368_v7  ;;  %v3370_v38 = vadd.f32 %v3369_v16, %v7745_v12  ;;  %3836 = vmax.xlane.f32.xlu1 %v3835_v17  ;;  %v3531_v52 = vadd.f32 %v3530_v61, %v7745_v12 }
 0x408   :  { %v3373_v56 = vpop.f32.mrf.mxu0  ;;  %v3534_v53 = vpop.f32.mrf.mxu1  ;;  %v3876_v1 = vmax.f32 %v3875_v47, %v3227_v58 }
 0x409   :  { %v3844_v2 = vmax.f32 %v3843_v24, %v3690_v15  ;;  %v3851_v4 = vmax.f32 %v3850_v50, %v3370_v38  ;;  %v3374_v26 = vadd.f32 %v3373_v56, %v7759_v28  ;;  %v3698_v12 = vsel %vm3578_vm0, %v3531_v52, -inf }
 0x40a   :  { %v3375_v35 = vpop.f32.mrf.mxu0  ;;  %v3536_v27 = vpop.f32.mrf.mxu1  ;;  %v3535_v36 = vadd.f32 %v3534_v53, %v7759_v28 }
 0x40b   :  { %v3852_v39 = vmax.f32 %v3851_v4, %v3529_v19  ;;  %v3859_v43 = vmax.f32 %v3858_v11, %v3374_v26  ;;  %v3376_v13 = vadd.f32 %v3375_v35, %v7759_v28  ;;  %3845 = vmax.xlane.f32.xlu0 %v3844_v2  ;;  %v3537_v44 = vadd.f32 %v3536_v27, %v7759_v28 }
 0x40c   :  { %v3379_v8 = vpop.f32.mrf.mxu0  ;;  %v3540_v22 = vpop.f32.mrf.mxu1 }
 0x40d   :  { %v3853_v59 = vmax.f32 %v3852_v39, %v3698_v12  ;;  %v3860_v23 = vmax.f32 %v3859_v43, %v3376_v13  ;;  %v3380_v40 = vadd.f32 %v3379_v8, %v7779_v34  ;;  %v3706_v20 = vsel %vm3578_vm0, %v3537_v44, -inf }
 0x40e   :  { %v3381_v33 = vpop.f32.mrf.mxu0  ;;  %v3542_v0 = vpop.f32.mrf.mxu1  ;;  %v3541_v37 = vadd.f32 %v3540_v22, %v7779_v34 }
 0x40f   :  { %v3861_v10 = vmax.f32 %v3860_v23, %v3535_v36  ;;  %v3868_v3 = vmax.f32 %v3867_v55, %v3380_v40  ;;  %v3382_v48 = vadd.f32 %v3381_v33, %v7779_v34  ;;  %3854 = vmax.xlane.f32.xlu1 %v3853_v59  ;;  %v3543_v31 = vadd.f32 %v3542_v0, %v7779_v34 }
 0x410   :  { %v3385_v28 = vpop.f32.mrf.mxu0  ;;  %v3546_v57 = vpop.f32.mrf.mxu1 }
 0x411   :  { %v3862_v49 = vmax.f32 %v3861_v10, %v3706_v20  ;;  %v3869_v21 = vmax.f32 %v3868_v3, %v3382_v48  ;;  %v3386_v42 = vadd.f32 %v3385_v28, %v7797_v14  ;;  %v3714_v7 = vsel %vm3578_vm0, %v3543_v31, -inf }
 0x412   :  { %v3387_v6 = vpop.f32.mrf.mxu0  ;;  %v3548_v32 = vpop.f32.mrf.mxu1  ;;  %v3547_v9 = vadd.f32 %v3546_v57, %v7797_v14 }
 0x413   :  { %v3870_v17 = vmax.f32 %v3869_v21, %v3541_v37  ;;  %v3877_v62 = vmax.f32 %v3876_v1, %v3386_v42  ;;  %v3388_v45 = vadd.f32 %v3387_v6, %v7797_v14  ;;  %3863 = vmax.xlane.f32.xlu0 %v3862_v49  ;;  %v3549_v46 = vadd.f32 %v3548_v32, %v7797_v14 }
 0x415   :  { %v3871_v25 = vmax.f32 %v3870_v17, %v3714_v7  ;;  %v3878_v5 = vmax.f32 %v3877_v62, %v3388_v45  ;;  %v3722_v16 = vsel %vm3578_vm0, %v3549_v46, -inf }
 0x417   :  { %v3879_v34 = vmax.f32 %v3878_v5, %v3547_v9  ;;  %3872 = vmax.xlane.f32.xlu1 %v3871_v25 }
 0x419   :  { %v3880_v61 = vmax.f32 %v3879_v34, %v3722_v16 }
 0x41b   :  { %3881 = vmax.xlane.f32.xlu0 %v3880_v61 }
 0x468   :  { %v3747_v11 = vpop.xlane.xlu0 %3746 }
 0x469   :  { %3899 = vst [vmem:[#allocation2] sm:$0xff] %v3747_v11 }
 0x46c   :  { %v3756_v24 = vpop.xlane.xlu1 %3755 }
 0x46d   :  { %3900 = vst [vmem:[#allocation2 + $0x8] sm:$0xff] %v3756_v24 }
 0x470   :  { %v3765_v50 = vpop.xlane.xlu0 %3764 }
 0x471   :  { %3901 = vst [vmem:[#allocation2 + $0x10] sm:$0xff] %v3765_v50 }
 0x474   :  { %v3774_v38 = vpop.xlane.xlu0 %3773 }
 0x475   :  { %3902 = vst [vmem:[#allocation2 + $0x18] sm:$0xff] %v3774_v38 }
 0x478   :  { %v3783_v18 = vpop.xlane.xlu1 %3782 }
 0x479   :  { %3903 = vst [vmem:[#allocation2 + $0x20] sm:$0xff] %v3783_v18 }
 0x47c   :  { %v3792_v29 = vpop.xlane.xlu0 %3791 }
 0x47d   :  { %3904 = vst [vmem:[#allocation2 + $0x28] sm:$0xff] %v3792_v29 }
 0x480   :  { %v3801_v14 = vpop.xlane.xlu1 %3800 }
 0x481   :  { %3905 = vst [vmem:[#allocation2 + $0x30] sm:$0xff] %v3801_v14 }
 0x484   :  { %v3810_v15 = vpop.xlane.xlu0 %3809 }
 0x485   :  { %3906 = vst [vmem:[#allocation2 + $0x38] sm:$0xff] %v3810_v15 }
 0x488   :  { %v3819_v41 = vpop.xlane.xlu1 %3818 }
 0x489   :  { %3907 = vst [vmem:[#allocation2 + $0x40] sm:$0xff] %v3819_v41 }
 0x48c   :  { %v3828_v52 = vpop.xlane.xlu0 %3827 }
 0x48d   :  { %3908 = vst [vmem:[#allocation2 + $0x48] sm:$0xff] %v3828_v52 }
 0x490   :  { %v3837_v56 = vpop.xlane.xlu1 %3836 }
 0x491   :  { %3909 = vst [vmem:[#allocation2 + $0x50] sm:$0xff] %v3837_v56 }
 0x494   :  { %v3846_v53 = vpop.xlane.xlu0 %3845 }
 0x495   :  { %3910 = vst [vmem:[#allocation2 + $0x58] sm:$0xff] %v3846_v53 }
 0x498   :  { %v3855_v2 = vpop.xlane.xlu1 %3854 }
 0x499   :  { %3911 = vst [vmem:[#allocation2 + $0x60] sm:$0xff] %v3855_v2 }
 0x49c   :  { %v3864_v19 = vpop.xlane.xlu0 %3863 }
 0x49d   :  { %3912 = vst [vmem:[#allocation2 + $0x68] sm:$0xff] %v3864_v19 }
 0x4a0   :  { %v3873_v4 = vpop.xlane.xlu1 %3872 }
 0x4a1   :  { %3913 = vst [vmem:[#allocation2 + $0x70] sm:$0xff] %v3873_v4 }
 0x4a4   :  { %v3882_v26 = vpop.xlane.xlu0 %3881 }
 0x4a5   :  { %3914 = vst [vmem:[#allocation2 + $0x78] sm:$0xff] %v3882_v26 }
 0x4a6   :  { %4012 = shalt.err (!%p4009_p4)
}
 0x4a7   :  { %s4029_s18 = smov 128   ;;  %s4030_s19 = smov 8  }
 0x4a8   :  { %3926 = dma.vmem_to_hbm [thread:$0]  %s3921_s16, 2048, %s7852_s7, [#allocation3], %s4029_s18, %s4029_s18, %s4030_s19  }
 0x4a9   :  { %4021 = dma.done.wait [#allocation3], 2048  }
 0x4aa   :  { %4022 = vsyncadd [#allocation3], 4294965248 }
 0x4ab   :  { %3930 = vsyncpa [#allocation3], 1 }

</bundles_post_ra>
